<compile_context>
chip_gen: v7x
topology: tpu7x:2x2x1
jax: 0.10.0
libtpu: 0.0.40
codegen_flags: <defaults>
</compile_context>

<pallas_src>
import functools

import jax
import jax.numpy as jnp
from jax import lax
from jax.experimental import pallas as pl
from jax.experimental.pallas import tpu as pltpu

LN_EPS = 1e-5
BN_EPS = 1e-5


def _layernorm(x, gamma, beta):
    mu = jnp.mean(x, axis=-1, keepdims=True)
    xc = x - mu
    var = jnp.mean(xc * xc, axis=-1, keepdims=True)
    return xc * lax.rsqrt(var + LN_EPS) * gamma + beta


def _fused_layer_kernel(x_ref, ln1g_ref, ln1b_ref, dww_ref, dwb_ref,
                        pww_ref, pwb_ref, outw_ref, outb_ref,
                        ln2g_ref, ln2b_ref, w1_ref, b1_ref, w2_ref, b2_ref,
                        o_ref, *, H, W, heads, dim_head):
    """One full transformer layer for one batch item (grid cell)."""
    D = x_ref.shape[-1]
    N = H * W
    inner = heads * dim_head
    f32, bf16 = jnp.float32, jnp.bfloat16

    x = x_ref[...]                                    # (H, W, D) f32, channel-last
    x_flat = x.reshape(N, D)

    # ---- PreNorm (LayerNorm) for the attention branch ----------------------
    xn = _layernorm(x, ln1g_ref[...], ln1b_ref[...])  # (H, W, D)

    # ---- depthwise 3x3 conv, pad=1 (BatchNorm folded); taps shared q/k/v ----
    zrow = jnp.zeros((1, W, D), f32)
    zcol = jnp.zeros((H + 2, 1, D), f32)
    xp = jnp.concatenate([zrow, xn, zrow], axis=0)
    xp = jnp.concatenate([zcol, xp, zcol], axis=1)    # (H+2, W+2, D) zero-padded

    dww = dww_ref[...]                                # (3, 9, D)  BN-folded weights
    dwb = dwb_ref[...]                                # (3, 1, D)  BN-folded bias
    accs = [None, None, None]                         # q, k, v depthwise outputs
    for t in range(9):                                # tap t = 3*ky + kx
        dy, dx = t // 3, t % 3
        tap = xp[dy:dy + H, dx:dx + W, :]             # shifted input, computed once
        for i in range(3):
            contrib = tap * dww[i, t]
            accs[i] = contrib if accs[i] is None else accs[i] + contrib
    dw_cat = jnp.concatenate(
        [(accs[i] + dwb[i]).reshape(N, D) for i in range(3)], axis=-1)   # (N, 3D)

    # ---- pointwise 1x1 projections: one block-diagonal MXU matmul ----------
    qkv = jnp.dot(dw_cat.astype(bf16), pww_ref[...],
                  preferred_element_type=f32) + pwb_ref[...]             # (N, 3*inner)

    # ---- multi-head attention (softmax scale pre-folded into q weights) ----
    heads_out = []
    for h in range(heads):
        lo = h * dim_head
        qh = qkv[:, lo:lo + dim_head].astype(bf16)
        kh = qkv[:, inner + lo:inner + lo + dim_head].astype(bf16)
        vh = qkv[:, 2 * inner + lo:2 * inner + lo + dim_head].astype(bf16)
        dots = jnp.einsum("nd,md->nm", qh, kh, preferred_element_type=f32)
        dots = dots - jnp.max(dots, axis=-1, keepdims=True)
        p = jnp.exp(dots)
        p = p * pl.reciprocal(jnp.sum(p, axis=-1, keepdims=True), approx=True)
        heads_out.append(jnp.dot(p.astype(bf16), vh, preferred_element_type=f32))
    attn = jnp.concatenate(heads_out, axis=-1)                           # (N, inner)

    # ---- output projection + residual (dropout p=0 -> identity) ------------
    y = jnp.dot(attn.astype(bf16), outw_ref[...],
                preferred_element_type=f32) + outb_ref[...]
    x1 = y + x_flat                                                      # (N, D)

    # ---- PreNorm + FeedForward (Linear/GELU/Linear) + residual --------------
    xn2 = _layernorm(x1, ln2g_ref[...], ln2b_ref[...])
    h1 = jnp.dot(xn2.astype(bf16), w1_ref[...],
                 preferred_element_type=f32) + b1_ref[...]
    # TODO(synk): torch nn.GELU() is the exact erf GELU; tanh approximation used here.
    h1 = jax.nn.gelu(h1, approximate=True)
    y2 = jnp.dot(h1.astype(bf16), w2_ref[...],
                 preferred_element_type=f32) + b2_ref[...]
    o_ref[...] = (y2 + x1).astype(o_ref.dtype)


def _fused_layer(x_tokens, p, image_size, heads, dim_head):
    B, N, D = x_tokens.shape
    H = W = image_size
    inner = heads * dim_head
    mlp = p["w1"].shape[-1]
    x4 = x_tokens.reshape(B, H, W, D)   # free reshape (contiguous), channel-last view

    kernel = functools.partial(_fused_layer_kernel, H=H, W=W,
                               heads=heads, dim_head=dim_head)
    z2 = lambda b: (0, 0)
    z3 = lambda b: (0, 0, 0)
    in_specs = [
        pl.BlockSpec((None, H, W, D), lambda b: (b, 0, 0, 0)),   # x (NHWC)
        pl.BlockSpec((1, D), z2), pl.BlockSpec((1, D), z2),      # LN1 gamma / beta
        pl.BlockSpec((3, 9, D), z3),                             # depthwise w (BN folded)
        pl.BlockSpec((3, 1, D), z3),                             # depthwise b (BN folded)
        pl.BlockSpec((3 * D, 3 * inner), z2),                    # block-diag pointwise w (bf16)
        pl.BlockSpec((1, 3 * inner), z2),                        # pointwise bias (q scaled)
        pl.BlockSpec((inner, D), z2), pl.BlockSpec((1, D), z2),  # out-proj w (bf16) / b
        pl.BlockSpec((1, D), z2), pl.BlockSpec((1, D), z2),      # LN2 gamma / beta
        pl.BlockSpec((D, mlp), z2), pl.BlockSpec((1, mlp), z2),  # FF w1 (bf16) / b1
        pl.BlockSpec((mlp, D), z2), pl.BlockSpec((1, D), z2),    # FF w2 (bf16) / b2
    ]
    return pl.pallas_call(
        kernel, grid=(B,), in_specs=in_specs,
        out_specs=pl.BlockSpec((None, N, D), lambda b: (b, 0, 0)),
        out_shape=jax.ShapeDtypeStruct((B, N, D), jnp.float32),
        compiler_params=pltpu.CompilerParams(dimension_semantics=("parallel",)),
    )(x4, p["ln1_g"], p["ln1_b"], p["dw_w"], p["dw_b"],
      p["pw_blk"], p["pw_bias"], p["out_w"], p["out_b"],
      p["ln2_g"], p["ln2_b"], p["w1"], p["b1"], p["w2"], p["b2"])


def _prepare_layer(lp, heads, dim_head):
    """Fold BN and attention scale into weights; cast MXU operands to bf16."""
    D = lp["ln1_g"].shape[-1]
    inner = heads * dim_head
    scale = dim_head ** -0.5
    # BatchNorm2d (eval-mode) affine folded into the depthwise conv.
    dw_w = lp["dw_w"] * lp["bn_scale"]
    dw_b = lp["dw_b"] * lp["bn_scale"] + lp["bn_shift"]
    # Attention softmax scale folded into the q pointwise projection.
    pw_w = lp["pw_w"].at[0].multiply(scale)
    pw_b = lp["pw_b"].at[0].multiply(scale)
    # Block-diagonal pointwise weight -> single (N,3D)@(3D,3*inner) matmul in-kernel.
    pw_blk = jnp.zeros((3 * D, 3 * inner), jnp.float32)
    for i in range(3):
        pw_blk = pw_blk.at[i * D:(i + 1) * D, i * inner:(i + 1) * inner].set(pw_w[i])
    return dict(
        ln1_g=lp["ln1_g"], ln1_b=lp["ln1_b"],
        dw_w=dw_w, dw_b=dw_b,
        pw_blk=pw_blk.astype(jnp.bfloat16),
        pw_bias=pw_b.reshape(1, 3 * inner),
        out_w=lp["out_w"].astype(jnp.bfloat16), out_b=lp["out_b"],
        ln2_g=lp["ln2_g"], ln2_b=lp["ln2_b"],
        w1=lp["w1"].astype(jnp.bfloat16), b1=lp["b1"],
        w2=lp["w2"].astype(jnp.bfloat16), b2=lp["b2"],
    )


def transformer_forward(x, params, image_size, heads, dim_head):
    """Transformer.forward: for each layer, x = attn(x, image_size) + x; x = ff(x) + x.

    last_stage=False path (no cls token); x is (B, image_size*image_size, dim)."""
    # TODO(synk): last_stage=True cls-token concatenation path not implemented.
    for lp in params:
        p = _prepare_layer(lp, heads, dim_head)
        x = _fused_layer(x, p, image_size, heads, dim_head)
    return x


def init_params(key, dim, depth, heads, dim_head, mlp_dim):
    inner = heads * dim_head
    layers = []
    for _ in range(depth):
        key, *ks = jax.random.split(key, 9)
        dw_w = 0.2 * jax.random.normal(ks[0], (3, 9, dim), jnp.float32)        # depthwise 3x3 (q,k,v)
        dw_b = 0.05 * jax.random.normal(ks[1], (3, 1, dim), jnp.float32)
        pw_w = jax.random.normal(ks[2], (3, dim, inner), jnp.float32) / jnp.sqrt(dim)
        pw_b = 0.05 * jax.random.normal(ks[3], (3, 1, inner), jnp.float32)
        out_w = jax.random.normal(ks[4], (inner, dim), jnp.float32) / jnp.sqrt(inner)
        out_b = 0.05 * jax.random.normal(ks[5], (1, dim), jnp.float32)
        w1 = jax.random.normal(ks[6], (dim, mlp_dim), jnp.float32) / jnp.sqrt(dim)
        b1 = jnp.zeros((1, mlp_dim), jnp.float32)
        w2 = jax.random.normal(ks[7], (mlp_dim, dim), jnp.float32) / jnp.sqrt(mlp_dim)
        b2 = jnp.zeros((1, dim), jnp.float32)
        # BatchNorm2d at torch init: gamma=1, beta=0, running_mean=0, running_var=1.
        # TODO(synk): torch training-mode BN uses batch statistics; eval-mode affine used.
        bn_gamma = jnp.ones((3, 1, dim), jnp.float32)
        bn_beta = jnp.zeros((3, 1, dim), jnp.float32)
        bn_mean = jnp.zeros((3, 1, dim), jnp.float32)
        bn_var = jnp.ones((3, 1, dim), jnp.float32)
        bn_scale = bn_gamma / jnp.sqrt(bn_var + BN_EPS)
        bn_shift = bn_beta - bn_mean * bn_scale
        layers.append(dict(
            ln1_g=jnp.ones((1, dim), jnp.float32),
            ln1_b=jnp.zeros((1, dim), jnp.float32),
            dw_w=dw_w, dw_b=dw_b, bn_scale=bn_scale, bn_shift=bn_shift,
            pw_w=pw_w, pw_b=pw_b, out_w=out_w, out_b=out_b,
            ln2_g=jnp.ones((1, dim), jnp.float32),
            ln2_b=jnp.zeros((1, dim), jnp.float32),
            w1=w1, b1=b1, w2=w2, b2=b2,
        ))
    return layers


if __name__ == "__main__":
    dim, depth, heads, dim_head, mlp_dim = 32, 2, 2, 16, 64
    batch, image_size = 2, 8
    n_tokens = image_size * image_size

    key = jax.random.PRNGKey(0)
    kx, kp = jax.random.split(key)
    x = jax.random.normal(kx, (batch, n_tokens, dim), jnp.float32)
    params = init_params(kp, dim, depth, heads, dim_head, mlp_dim)

    fwd = jax.jit(functools.partial(transformer_forward, image_size=image_size,
                                    heads=heads, dim_head=dim_head))
    out = fwd(x, params)
    out = jax.block_until_ready(out)
    assert out.shape == (batch, n_tokens, dim), out.shape
    assert bool(jnp.all(jnp.isfinite(out)))
    print("KERNEL_OK")
</pallas_src>

<mosaic_0001>
module attributes {stable_mosaic.version = 11 : i64} {
  func.func @_fused_layer_kernel(%arg0: i32, %arg1: memref<1x8x8x32xf32, #tpu.memory_space<vmem>>, %arg2: memref<1x32xf32, #tpu.memory_space<vmem>>, %arg3: memref<1x32xf32, #tpu.memory_space<vmem>>, %arg4: memref<3x9x32xf32, #tpu.memory_space<vmem>>, %arg5: memref<3x1x32xf32, #tpu.memory_space<vmem>>, %arg6: memref<96x96xbf16, #tpu.memory_space<vmem>>, %arg7: memref<1x96xf32, #tpu.memory_space<vmem>>, %arg8: memref<32x32xbf16, #tpu.memory_space<vmem>>, %arg9: memref<1x32xf32, #tpu.memory_space<vmem>>, %arg10: memref<1x32xf32, #tpu.memory_space<vmem>>, %arg11: memref<1x32xf32, #tpu.memory_space<vmem>>, %arg12: memref<32x64xbf16, #tpu.memory_space<vmem>>, %arg13: memref<1x64xf32, #tpu.memory_space<vmem>>, %arg14: memref<64x32xbf16, #tpu.memory_space<vmem>>, %arg15: memref<1x32xf32, #tpu.memory_space<vmem>>, %arg16: memref<1x64x32xf32, #tpu.memory_space<vmem>>) attributes {dimension_semantics = [#tpu.dimension_semantics<parallel>], iteration_bounds = array<i64: 2>, scalar_prefetch = 0 : i64, scratch_operands = 0 : i64, tpu.core_type = #tpu.core_type<tc>, window_params = [{transform_indices = @transform_0, window_bounds = array<i64: 1, 8, 8, 32>}, {pipeline_mode = #tpu.pipeline_mode<synchronous>, transform_indices = @transform_1, window_bounds = array<i64: 1, 32>}, {pipeline_mode = #tpu.pipeline_mode<synchronous>, transform_indices = @transform_2, window_bounds = array<i64: 1, 32>}, {pipeline_mode = #tpu.pipeline_mode<synchronous>, transform_indices = @transform_3, window_bounds = array<i64: 3, 9, 32>}, {pipeline_mode = #tpu.pipeline_mode<synchronous>, transform_indices = @transform_4, window_bounds = array<i64: 3, 1, 32>}, {pipeline_mode = #tpu.pipeline_mode<synchronous>, transform_indices = @transform_5, window_bounds = array<i64: 96, 96>}, {pipeline_mode = #tpu.pipeline_mode<synchronous>, transform_indices = @transform_6, window_bounds = array<i64: 1, 96>}, {pipeline_mode = #tpu.pipeline_mode<synchronous>, transform_indices = @transform_7, window_bounds = array<i64: 32, 32>}, {pipeline_mode = #tpu.pipeline_mode<synchronous>, transform_indices = @transform_8, window_bounds = array<i64: 1, 32>}, {pipeline_mode = #tpu.pipeline_mode<synchronous>, transform_indices = @transform_9, window_bounds = array<i64: 1, 32>}, {pipeline_mode = #tpu.pipeline_mode<synchronous>, transform_indices = @transform_10, window_bounds = array<i64: 1, 32>}, {pipeline_mode = #tpu.pipeline_mode<synchronous>, transform_indices = @transform_11, window_bounds = array<i64: 32, 64>}, {pipeline_mode = #tpu.pipeline_mode<synchronous>, transform_indices = @transform_12, window_bounds = array<i64: 1, 64>}, {pipeline_mode = #tpu.pipeline_mode<synchronous>, transform_indices = @transform_13, window_bounds = array<i64: 64, 32>}, {pipeline_mode = #tpu.pipeline_mode<synchronous>, transform_indices = @transform_14, window_bounds = array<i64: 1, 32>}, {transform_indices = @transform_15, window_bounds = array<i64: 1, 64, 32>}]} {
    %c0 = arith.constant 0 : index
    %c0_0 = arith.constant 0 : index
    %c0_1 = arith.constant 0 : index
    %c0_2 = arith.constant 0 : index
    %0 = vector.load %arg1[%c0, %c0_0, %c0_1, %c0_2] : memref<1x8x8x32xf32, #tpu.memory_space<vmem>>, vector<1x8x8x32xf32>
    %1 = vector.shape_cast %0 : vector<1x8x8x32xf32> to vector<8x8x32xf32>
    %2 = vector.shape_cast %1 : vector<8x8x32xf32> to vector<64x32xf32>
    %c0_3 = arith.constant 0 : index
    %c0_4 = arith.constant 0 : index
    %3 = vector.load %arg2[%c0_3, %c0_4] : memref<1x32xf32, #tpu.memory_space<vmem>>, vector<1x32xf32>
    %c0_5 = arith.constant 0 : index
    %c0_6 = arith.constant 0 : index
    %4 = vector.load %arg3[%c0_5, %c0_6] : memref<1x32xf32, #tpu.memory_space<vmem>>, vector<1x32xf32>
    %cst = arith.constant dense<0.000000e+00> : vector<8x8xf32>
    %5 = vector.multi_reduction <add>, %1, %cst [2] : vector<8x8x32xf32> to vector<8x8xf32>
    %6 = vector.shape_cast %5 : vector<8x8xf32> to vector<8x8x1xf32>
    %cst_7 = arith.constant 3.200000e+01 : f32
    %7 = vector.broadcast %cst_7 : f32 to vector<8x8x1xf32>
    %8 = arith.divf %6, %7 : vector<8x8x1xf32>
    %9 = vector.broadcast %8 : vector<8x8x1xf32> to vector<8x8x32xf32>
    %10 = arith.subf %1, %9 : vector<8x8x32xf32>
    %11 = arith.mulf %10, %10 : vector<8x8x32xf32>
    %cst_8 = arith.constant dense<0.000000e+00> : vector<8x8xf32>
    %12 = vector.multi_reduction <add>, %11, %cst_8 [2] : vector<8x8x32xf32> to vector<8x8xf32>
    %13 = vector.shape_cast %12 : vector<8x8xf32> to vector<8x8x1xf32>
    %cst_9 = arith.constant 3.200000e+01 : f32
    %14 = vector.broadcast %cst_9 : f32 to vector<8x8x1xf32>
    %15 = arith.divf %13, %14 : vector<8x8x1xf32>
    %cst_10 = arith.constant 9.99999974E-6 : f32
    %16 = vector.broadcast %cst_10 : f32 to vector<8x8x1xf32>
    %17 = arith.addf %15, %16 : vector<8x8x1xf32>
    %18 = math.rsqrt %17 : vector<8x8x1xf32>
    %19 = vector.broadcast %18 : vector<8x8x1xf32> to vector<8x8x32xf32>
    %20 = arith.mulf %10, %19 : vector<8x8x32xf32>
    %21 = vector.shape_cast %3 : vector<1x32xf32> to vector<1x1x32xf32>
    %22 = vector.broadcast %21 : vector<1x1x32xf32> to vector<8x8x32xf32>
    %23 = arith.mulf %20, %22 : vector<8x8x32xf32>
    %24 = vector.shape_cast %4 : vector<1x32xf32> to vector<1x1x32xf32>
    %25 = vector.broadcast %24 : vector<1x1x32xf32> to vector<8x8x32xf32>
    %26 = arith.addf %23, %25 : vector<8x8x32xf32>
    %cst_11 = arith.constant 0.000000e+00 : f32
    %27 = vector.broadcast %cst_11 : f32 to vector<1x8x32xf32>
    %cst_12 = arith.constant 0.000000e+00 : f32
    %28 = vector.broadcast %cst_12 : f32 to vector<10x1x32xf32>
    %29 = tpu.concatenate %27, %26, %27 in 0 : vector<1x8x32xf32>, vector<8x8x32xf32>, vector<1x8x32xf32> -> vector<10x8x32xf32>
    %30 = tpu.concatenate %28, %29, %28 in 1 : vector<10x1x32xf32>, vector<10x8x32xf32>, vector<10x1x32xf32> -> vector<10x10x32xf32>
    %c0_13 = arith.constant 0 : index
    %c0_14 = arith.constant 0 : index
    %c0_15 = arith.constant 0 : index
    %31 = vector.load %arg4[%c0_13, %c0_14, %c0_15] : memref<3x9x32xf32, #tpu.memory_space<vmem>>, vector<3x9x32xf32>
    %c0_16 = arith.constant 0 : index
    %c0_17 = arith.constant 0 : index
    %c0_18 = arith.constant 0 : index
    %32 = vector.load %arg5[%c0_16, %c0_17, %c0_18] : memref<3x1x32xf32, #tpu.memory_space<vmem>>, vector<3x1x32xf32>
    %33 = vector.extract_strided_slice %30 {offsets = [0, 0, 0], sizes = [8, 8, 32], strides = [1, 1, 1]} : vector<10x10x32xf32> to vector<8x8x32xf32>
    %34 = vector.extract_strided_slice %31 {offsets = [0, 0, 0], sizes = [1, 1, 32], strides = [1, 1, 1]} : vector<3x9x32xf32> to vector<1x1x32xf32>
    %35 = vector.shape_cast %34 : vector<1x1x32xf32> to vector<32xf32>
    %36 = vector.shape_cast %35 : vector<32xf32> to vector<1x1x32xf32>
    %37 = vector.broadcast %36 : vector<1x1x32xf32> to vector<8x8x32xf32>
    %38 = arith.mulf %33, %37 : vector<8x8x32xf32>
    %39 = vector.extract_strided_slice %31 {offsets = [1, 0, 0], sizes = [1, 1, 32], strides = [1, 1, 1]} : vector<3x9x32xf32> to vector<1x1x32xf32>
    %40 = vector.shape_cast %39 : vector<1x1x32xf32> to vector<32xf32>
    %41 = vector.shape_cast %40 : vector<32xf32> to vector<1x1x32xf32>
    %42 = vector.broadcast %41 : vector<1x1x32xf32> to vector<8x8x32xf32>
    %43 = arith.mulf %33, %42 : vector<8x8x32xf32>
    %44 = vector.extract_strided_slice %31 {offsets = [2, 0, 0], sizes = [1, 1, 32], strides = [1, 1, 1]} : vector<3x9x32xf32> to vector<1x1x32xf32>
    %45 = vector.shape_cast %44 : vector<1x1x32xf32> to vector<32xf32>
    %46 = vector.shape_cast %45 : vector<32xf32> to vector<1x1x32xf32>
    %47 = vector.broadcast %46 : vector<1x1x32xf32> to vector<8x8x32xf32>
    %48 = arith.mulf %33, %47 : vector<8x8x32xf32>
    %49 = vector.extract_strided_slice %30 {offsets = [0, 1, 0], sizes = [8, 8, 32], strides = [1, 1, 1]} : vector<10x10x32xf32> to vector<8x8x32xf32>
    %50 = vector.extract_strided_slice %31 {offsets = [0, 1, 0], sizes = [1, 1, 32], strides = [1, 1, 1]} : vector<3x9x32xf32> to vector<1x1x32xf32>
    %51 = vector.shape_cast %50 : vector<1x1x32xf32> to vector<32xf32>
    %52 = vector.shape_cast %51 : vector<32xf32> to vector<1x1x32xf32>
    %53 = vector.broadcast %52 : vector<1x1x32xf32> to vector<8x8x32xf32>
    %54 = arith.mulf %49, %53 : vector<8x8x32xf32>
    %55 = arith.addf %38, %54 : vector<8x8x32xf32>
    %56 = vector.extract_strided_slice %31 {offsets = [1, 1, 0], sizes = [1, 1, 32], strides = [1, 1, 1]} : vector<3x9x32xf32> to vector<1x1x32xf32>
    %57 = vector.shape_cast %56 : vector<1x1x32xf32> to vector<32xf32>
    %58 = vector.shape_cast %57 : vector<32xf32> to vector<1x1x32xf32>
    %59 = vector.broadcast %58 : vector<1x1x32xf32> to vector<8x8x32xf32>
    %60 = arith.mulf %49, %59 : vector<8x8x32xf32>
    %61 = arith.addf %43, %60 : vector<8x8x32xf32>
    %62 = vector.extract_strided_slice %31 {offsets = [2, 1, 0], sizes = [1, 1, 32], strides = [1, 1, 1]} : vector<3x9x32xf32> to vector<1x1x32xf32>
    %63 = vector.shape_cast %62 : vector<1x1x32xf32> to vector<32xf32>
    %64 = vector.shape_cast %63 : vector<32xf32> to vector<1x1x32xf32>
    %65 = vector.broadcast %64 : vector<1x1x32xf32> to vector<8x8x32xf32>
    %66 = arith.mulf %49, %65 : vector<8x8x32xf32>
    %67 = arith.addf %48, %66 : vector<8x8x32xf32>
    %68 = vector.extract_strided_slice %30 {offsets = [0, 2, 0], sizes = [8, 8, 32], strides = [1, 1, 1]} : vector<10x10x32xf32> to vector<8x8x32xf32>
    %69 = vector.extract_strided_slice %31 {offsets = [0, 2, 0], sizes = [1, 1, 32], strides = [1, 1, 1]} : vector<3x9x32xf32> to vector<1x1x32xf32>
    %70 = vector.shape_cast %69 : vector<1x1x32xf32> to vector<32xf32>
    %71 = vector.shape_cast %70 : vector<32xf32> to vector<1x1x32xf32>
    %72 = vector.broadcast %71 : vector<1x1x32xf32> to vector<8x8x32xf32>
    %73 = arith.mulf %68, %72 : vector<8x8x32xf32>
    %74 = arith.addf %55, %73 : vector<8x8x32xf32>
    %75 = vector.extract_strided_slice %31 {offsets = [1, 2, 0], sizes = [1, 1, 32], strides = [1, 1, 1]} : vector<3x9x32xf32> to vector<1x1x32xf32>
    %76 = vector.shape_cast %75 : vector<1x1x32xf32> to vector<32xf32>
    %77 = vector.shape_cast %76 : vector<32xf32> to vector<1x1x32xf32>
    %78 = vector.broadcast %77 : vector<1x1x32xf32> to vector<8x8x32xf32>
    %79 = arith.mulf %68, %78 : vector<8x8x32xf32>
    %80 = arith.addf %61, %79 : vector<8x8x32xf32>
    %81 = vector.extract_strided_slice %31 {offsets = [2, 2, 0], sizes = [1, 1, 32], strides = [1, 1, 1]} : vector<3x9x32xf32> to vector<1x1x32xf32>
    %82 = vector.shape_cast %81 : vector<1x1x32xf32> to vector<32xf32>
    %83 = vector.shape_cast %82 : vector<32xf32> to vector<1x1x32xf32>
    %84 = vector.broadcast %83 : vector<1x1x32xf32> to vector<8x8x32xf32>
    %85 = arith.mulf %68, %84 : vector<8x8x32xf32>
    %86 = arith.addf %67, %85 : vector<8x8x32xf32>
    %87 = vector.extract_strided_slice %30 {offsets = [1, 0, 0], sizes = [8, 8, 32], strides = [1, 1, 1]} : vector<10x10x32xf32> to vector<8x8x32xf32>
    %88 = vector.extract_strided_slice %31 {offsets = [0, 3, 0], sizes = [1, 1, 32], strides = [1, 1, 1]} : vector<3x9x32xf32> to vector<1x1x32xf32>
    %89 = vector.shape_cast %88 : vector<1x1x32xf32> to vector<32xf32>
    %90 = vector.shape_cast %89 : vector<32xf32> to vector<1x1x32xf32>
    %91 = vector.broadcast %90 : vector<1x1x32xf32> to vector<8x8x32xf32>
    %92 = arith.mulf %87, %91 : vector<8x8x32xf32>
    %93 = arith.addf %74, %92 : vector<8x8x32xf32>
    %94 = vector.extract_strided_slice %31 {offsets = [1, 3, 0], sizes = [1, 1, 32], strides = [1, 1, 1]} : vector<3x9x32xf32> to vector<1x1x32xf32>
    %95 = vector.shape_cast %94 : vector<1x1x32xf32> to vector<32xf32>
    %96 = vector.shape_cast %95 : vector<32xf32> to vector<1x1x32xf32>
    %97 = vector.broadcast %96 : vector<1x1x32xf32> to vector<8x8x32xf32>
    %98 = arith.mulf %87, %97 : vector<8x8x32xf32>
    %99 = arith.addf %80, %98 : vector<8x8x32xf32>
    %100 = vector.extract_strided_slice %31 {offsets = [2, 3, 0], sizes = [1, 1, 32], strides = [1, 1, 1]} : vector<3x9x32xf32> to vector<1x1x32xf32>
    %101 = vector.shape_cast %100 : vector<1x1x32xf32> to vector<32xf32>
    %102 = vector.shape_cast %101 : vector<32xf32> to vector<1x1x32xf32>
    %103 = vector.broadcast %102 : vector<1x1x32xf32> to vector<8x8x32xf32>
    %104 = arith.mulf %87, %103 : vector<8x8x32xf32>
    %105 = arith.addf %86, %104 : vector<8x8x32xf32>
    %106 = vector.extract_strided_slice %30 {offsets = [1, 1, 0], sizes = [8, 8, 32], strides = [1, 1, 1]} : vector<10x10x32xf32> to vector<8x8x32xf32>
    %107 = vector.extract_strided_slice %31 {offsets = [0, 4, 0], sizes = [1, 1, 32], strides = [1, 1, 1]} : vector<3x9x32xf32> to vector<1x1x32xf32>
    %108 = vector.shape_cast %107 : vector<1x1x32xf32> to vector<32xf32>
    %109 = vector.shape_cast %108 : vector<32xf32> to vector<1x1x32xf32>
    %110 = vector.broadcast %109 : vector<1x1x32xf32> to vector<8x8x32xf32>
    %111 = arith.mulf %106, %110 : vector<8x8x32xf32>
    %112 = arith.addf %93, %111 : vector<8x8x32xf32>
    %113 = vector.extract_strided_slice %31 {offsets = [1, 4, 0], sizes = [1, 1, 32], strides = [1, 1, 1]} : vector<3x9x32xf32> to vector<1x1x32xf32>
    %114 = vector.shape_cast %113 : vector<1x1x32xf32> to vector<32xf32>
    %115 = vector.shape_cast %114 : vector<32xf32> to vector<1x1x32xf32>
    %116 = vector.broadcast %115 : vector<1x1x32xf32> to vector<8x8x32xf32>
    %117 = arith.mulf %106, %116 : vector<8x8x32xf32>
    %118 = arith.addf %99, %117 : vector<8x8x32xf32>
    %119 = vector.extract_strided_slice %31 {offsets = [2, 4, 0], sizes = [1, 1, 32], strides = [1, 1, 1]} : vector<3x9x32xf32> to vector<1x1x32xf32>
    %120 = vector.shape_cast %119 : vector<1x1x32xf32> to vector<32xf32>
    %121 = vector.shape_cast %120 : vector<32xf32> to vector<1x1x32xf32>
    %122 = vector.broadcast %121 : vector<1x1x32xf32> to vector<8x8x32xf32>
    %123 = arith.mulf %106, %122 : vector<8x8x32xf32>
    %124 = arith.addf %105, %123 : vector<8x8x32xf32>
    %125 = vector.extract_strided_slice %30 {offsets = [1, 2, 0], sizes = [8, 8, 32], strides = [1, 1, 1]} : vector<10x10x32xf32> to vector<8x8x32xf32>
    %126 = vector.extract_strided_slice %31 {offsets = [0, 5, 0], sizes = [1, 1, 32], strides = [1, 1, 1]} : vector<3x9x32xf32> to vector<1x1x32xf32>
    %127 = vector.shape_cast %126 : vector<1x1x32xf32> to vector<32xf32>
    %128 = vector.shape_cast %127 : vector<32xf32> to vector<1x1x32xf32>
    %129 = vector.broadcast %128 : vector<1x1x32xf32> to vector<8x8x32xf32>
    %130 = arith.mulf %125, %129 : vector<8x8x32xf32>
    %131 = arith.addf %112, %130 : vector<8x8x32xf32>
    %132 = vector.extract_strided_slice %31 {offsets = [1, 5, 0], sizes = [1, 1, 32], strides = [1, 1, 1]} : vector<3x9x32xf32> to vector<1x1x32xf32>
    %133 = vector.shape_cast %132 : vector<1x1x32xf32> to vector<32xf32>
    %134 = vector.shape_cast %133 : vector<32xf32> to vector<1x1x32xf32>
    %135 = vector.broadcast %134 : vector<1x1x32xf32> to vector<8x8x32xf32>
    %136 = arith.mulf %125, %135 : vector<8x8x32xf32>
    %137 = arith.addf %118, %136 : vector<8x8x32xf32>
    %138 = vector.extract_strided_slice %31 {offsets = [2, 5, 0], sizes = [1, 1, 32], strides = [1, 1, 1]} : vector<3x9x32xf32> to vector<1x1x32xf32>
    %139 = vector.shape_cast %138 : vector<1x1x32xf32> to vector<32xf32>
    %140 = vector.shape_cast %139 : vector<32xf32> to vector<1x1x32xf32>
    %141 = vector.broadcast %140 : vector<1x1x32xf32> to vector<8x8x32xf32>
    %142 = arith.mulf %125, %141 : vector<8x8x32xf32>
    %143 = arith.addf %124, %142 : vector<8x8x32xf32>
    %144 = vector.extract_strided_slice %30 {offsets = [2, 0, 0], sizes = [8, 8, 32], strides = [1, 1, 1]} : vector<10x10x32xf32> to vector<8x8x32xf32>
    %145 = vector.extract_strided_slice %31 {offsets = [0, 6, 0], sizes = [1, 1, 32], strides = [1, 1, 1]} : vector<3x9x32xf32> to vector<1x1x32xf32>
    %146 = vector.shape_cast %145 : vector<1x1x32xf32> to vector<32xf32>
    %147 = vector.shape_cast %146 : vector<32xf32> to vector<1x1x32xf32>
    %148 = vector.broadcast %147 : vector<1x1x32xf32> to vector<8x8x32xf32>
    %149 = arith.mulf %144, %148 : vector<8x8x32xf32>
    %150 = arith.addf %131, %149 : vector<8x8x32xf32>
    %151 = vector.extract_strided_slice %31 {offsets = [1, 6, 0], sizes = [1, 1, 32], strides = [1, 1, 1]} : vector<3x9x32xf32> to vector<1x1x32xf32>
    %152 = vector.shape_cast %151 : vector<1x1x32xf32> to vector<32xf32>
    %153 = vector.shape_cast %152 : vector<32xf32> to vector<1x1x32xf32>
    %154 = vector.broadcast %153 : vector<1x1x32xf32> to vector<8x8x32xf32>
    %155 = arith.mulf %144, %154 : vector<8x8x32xf32>
    %156 = arith.addf %137, %155 : vector<8x8x32xf32>
    %157 = vector.extract_strided_slice %31 {offsets = [2, 6, 0], sizes = [1, 1, 32], strides = [1, 1, 1]} : vector<3x9x32xf32> to vector<1x1x32xf32>
    %158 = vector.shape_cast %157 : vector<1x1x32xf32> to vector<32xf32>
    %159 = vector.shape_cast %158 : vector<32xf32> to vector<1x1x32xf32>
    %160 = vector.broadcast %159 : vector<1x1x32xf32> to vector<8x8x32xf32>
    %161 = arith.mulf %144, %160 : vector<8x8x32xf32>
    %162 = arith.addf %143, %161 : vector<8x8x32xf32>
    %163 = vector.extract_strided_slice %30 {offsets = [2, 1, 0], sizes = [8, 8, 32], strides = [1, 1, 1]} : vector<10x10x32xf32> to vector<8x8x32xf32>
    %164 = vector.extract_strided_slice %31 {offsets = [0, 7, 0], sizes = [1, 1, 32], strides = [1, 1, 1]} : vector<3x9x32xf32> to vector<1x1x32xf32>
    %165 = vector.shape_cast %164 : vector<1x1x32xf32> to vector<32xf32>
    %166 = vector.shape_cast %165 : vector<32xf32> to vector<1x1x32xf32>
    %167 = vector.broadcast %166 : vector<1x1x32xf32> to vector<8x8x32xf32>
    %168 = arith.mulf %163, %167 : vector<8x8x32xf32>
    %169 = arith.addf %150, %168 : vector<8x8x32xf32>
    %170 = vector.extract_strided_slice %31 {offsets = [1, 7, 0], sizes = [1, 1, 32], strides = [1, 1, 1]} : vector<3x9x32xf32> to vector<1x1x32xf32>
    %171 = vector.shape_cast %170 : vector<1x1x32xf32> to vector<32xf32>
    %172 = vector.shape_cast %171 : vector<32xf32> to vector<1x1x32xf32>
    %173 = vector.broadcast %172 : vector<1x1x32xf32> to vector<8x8x32xf32>
    %174 = arith.mulf %163, %173 : vector<8x8x32xf32>
    %175 = arith.addf %156, %174 : vector<8x8x32xf32>
    %176 = vector.extract_strided_slice %31 {offsets = [2, 7, 0], sizes = [1, 1, 32], strides = [1, 1, 1]} : vector<3x9x32xf32> to vector<1x1x32xf32>
    %177 = vector.shape_cast %176 : vector<1x1x32xf32> to vector<32xf32>
    %178 = vector.shape_cast %177 : vector<32xf32> to vector<1x1x32xf32>
    %179 = vector.broadcast %178 : vector<1x1x32xf32> to vector<8x8x32xf32>
    %180 = arith.mulf %163, %179 : vector<8x8x32xf32>
    %181 = arith.addf %162, %180 : vector<8x8x32xf32>
    %182 = vector.extract_strided_slice %30 {offsets = [2, 2, 0], sizes = [8, 8, 32], strides = [1, 1, 1]} : vector<10x10x32xf32> to vector<8x8x32xf32>
    %183 = vector.extract_strided_slice %31 {offsets = [0, 8, 0], sizes = [1, 1, 32], strides = [1, 1, 1]} : vector<3x9x32xf32> to vector<1x1x32xf32>
    %184 = vector.shape_cast %183 : vector<1x1x32xf32> to vector<32xf32>
    %185 = vector.shape_cast %184 : vector<32xf32> to vector<1x1x32xf32>
    %186 = vector.broadcast %185 : vector<1x1x32xf32> to vector<8x8x32xf32>
    %187 = arith.mulf %182, %186 : vector<8x8x32xf32>
    %188 = arith.addf %169, %187 : vector<8x8x32xf32>
    %189 = vector.extract_strided_slice %31 {offsets = [1, 8, 0], sizes = [1, 1, 32], strides = [1, 1, 1]} : vector<3x9x32xf32> to vector<1x1x32xf32>
    %190 = vector.shape_cast %189 : vector<1x1x32xf32> to vector<32xf32>
    %191 = vector.shape_cast %190 : vector<32xf32> to vector<1x1x32xf32>
    %192 = vector.broadcast %191 : vector<1x1x32xf32> to vector<8x8x32xf32>
    %193 = arith.mulf %182, %192 : vector<8x8x32xf32>
    %194 = arith.addf %175, %193 : vector<8x8x32xf32>
    %195 = vector.extract_strided_slice %31 {offsets = [2, 8, 0], sizes = [1, 1, 32], strides = [1, 1, 1]} : vector<3x9x32xf32> to vector<1x1x32xf32>
    %196 = vector.shape_cast %195 : vector<1x1x32xf32> to vector<32xf32>
    %197 = vector.shape_cast %196 : vector<32xf32> to vector<1x1x32xf32>
    %198 = vector.broadcast %197 : vector<1x1x32xf32> to vector<8x8x32xf32>
    %199 = arith.mulf %182, %198 : vector<8x8x32xf32>
    %200 = arith.addf %181, %199 : vector<8x8x32xf32>
    %201 = vector.extract_strided_slice %32 {offsets = [0, 0, 0], sizes = [1, 1, 32], strides = [1, 1, 1]} : vector<3x1x32xf32> to vector<1x1x32xf32>
    %202 = vector.shape_cast %201 : vector<1x1x32xf32> to vector<1x32xf32>
    %203 = vector.shape_cast %202 : vector<1x32xf32> to vector<1x1x32xf32>
    %204 = vector.broadcast %203 : vector<1x1x32xf32> to vector<8x8x32xf32>
    %205 = arith.addf %188, %204 : vector<8x8x32xf32>
    %206 = vector.shape_cast %205 : vector<8x8x32xf32> to vector<64x32xf32>
    %207 = vector.extract_strided_slice %32 {offsets = [1, 0, 0], sizes = [1, 1, 32], strides = [1, 1, 1]} : vector<3x1x32xf32> to vector<1x1x32xf32>
    %208 = vector.shape_cast %207 : vector<1x1x32xf32> to vector<1x32xf32>
    %209 = vector.shape_cast %208 : vector<1x32xf32> to vector<1x1x32xf32>
    %210 = vector.broadcast %209 : vector<1x1x32xf32> to vector<8x8x32xf32>
    %211 = arith.addf %194, %210 : vector<8x8x32xf32>
    %212 = vector.shape_cast %211 : vector<8x8x32xf32> to vector<64x32xf32>
    %213 = vector.extract_strided_slice %32 {offsets = [2, 0, 0], sizes = [1, 1, 32], strides = [1, 1, 1]} : vector<3x1x32xf32> to vector<1x1x32xf32>
    %214 = vector.shape_cast %213 : vector<1x1x32xf32> to vector<1x32xf32>
    %215 = vector.shape_cast %214 : vector<1x32xf32> to vector<1x1x32xf32>
    %216 = vector.broadcast %215 : vector<1x1x32xf32> to vector<8x8x32xf32>
    %217 = arith.addf %200, %216 : vector<8x8x32xf32>
    %218 = vector.shape_cast %217 : vector<8x8x32xf32> to vector<64x32xf32>
    %219 = tpu.concatenate %206, %212, %218 in 1 : vector<64x32xf32>, vector<64x32xf32>, vector<64x32xf32> -> vector<64x96xf32>
    %220 = arith.truncf %219 : vector<64x96xf32> to vector<64x96xbf16>
    %c0_19 = arith.constant 0 : index
    %c0_20 = arith.constant 0 : index
    %221 = vector.load %arg6[%c0_19, %c0_20] : memref<96x96xbf16, #tpu.memory_space<vmem>>, vector<96x96xbf16>
    %cst_21 = arith.constant dense<0.000000e+00> : vector<64x96xf32>
    %222 = tpu.matmul %220, %221, %cst_21 {dimension_numbers = #tpu.dot_dimension_numbers<[1], [0], [0], [1], [0, 0, 1, 1], [], []>} : vector<64x96xbf16>, vector<96x96xbf16>, vector<64x96xf32> -> vector<64x96xf32>
    %c0_22 = arith.constant 0 : index
    %c0_23 = arith.constant 0 : index
    %223 = vector.load %arg7[%c0_22, %c0_23] : memref<1x96xf32, #tpu.memory_space<vmem>>, vector<1x96xf32>
    %224 = vector.broadcast %223 : vector<1x96xf32> to vector<64x96xf32>
    %225 = arith.addf %222, %224 : vector<64x96xf32>
    %226 = vector.extract_strided_slice %225 {offsets = [0, 0], sizes = [64, 16], strides = [1, 1]} : vector<64x96xf32> to vector<64x16xf32>
    %227 = arith.truncf %226 : vector<64x16xf32> to vector<64x16xbf16>
    %228 = vector.extract_strided_slice %225 {offsets = [0, 32], sizes = [64, 16], strides = [1, 1]} : vector<64x96xf32> to vector<64x16xf32>
    %229 = arith.truncf %228 : vector<64x16xf32> to vector<64x16xbf16>
    %230 = vector.extract_strided_slice %225 {offsets = [0, 64], sizes = [64, 16], strides = [1, 1]} : vector<64x96xf32> to vector<64x16xf32>
    %231 = arith.truncf %230 : vector<64x16xf32> to vector<64x16xbf16>
    "tpu.trace_start"() <{level = 10 : i32, message = "nd,md->nm"}> : () -> ()
    %cst_24 = arith.constant dense<0.000000e+00> : vector<64x64xf32>
    %232 = tpu.matmul %227, %229, %cst_24 {dimension_numbers = #tpu.dot_dimension_numbers<[1], [1], [0], [0], [0, 0, 1, 0], [], []>} : vector<64x16xbf16>, vector<64x16xbf16>, vector<64x64xf32> -> vector<64x64xf32>
    "tpu.trace_stop"() : () -> ()
    %cst_25 = arith.constant dense<0xFF800000> : vector<64xf32>
    %233 = vector.multi_reduction <maximumf>, %232, %cst_25 [1] : vector<64x64xf32> to vector<64xf32>
    %234 = vector.shape_cast %233 : vector<64xf32> to vector<64x1xf32>
    %235 = vector.broadcast %234 : vector<64x1xf32> to vector<64x64xf32>
    %236 = arith.subf %232, %235 : vector<64x64xf32>
    %237 = math.exp %236 : vector<64x64xf32>
    %cst_26 = arith.constant dense<0.000000e+00> : vector<64xf32>
    %238 = vector.multi_reduction <add>, %237, %cst_26 [1] : vector<64x64xf32> to vector<64xf32>
    %239 = vector.shape_cast %238 : vector<64xf32> to vector<64x1xf32>
    %240 = tpu.reciprocal %239 {approx = true} : vector<64x1xf32> -> vector<64x1xf32>
    %241 = vector.broadcast %240 : vector<64x1xf32> to vector<64x64xf32>
    %242 = arith.mulf %237, %241 : vector<64x64xf32>
    %243 = arith.truncf %242 : vector<64x64xf32> to vector<64x64xbf16>
    %cst_27 = arith.constant dense<0.000000e+00> : vector<64x16xf32>
    %244 = tpu.matmul %243, %231, %cst_27 {dimension_numbers = #tpu.dot_dimension_numbers<[1], [0], [0], [1], [0, 0, 1, 1], [], []>} : vector<64x64xbf16>, vector<64x16xbf16>, vector<64x16xf32> -> vector<64x16xf32>
    %245 = vector.extract_strided_slice %225 {offsets = [0, 16], sizes = [64, 16], strides = [1, 1]} : vector<64x96xf32> to vector<64x16xf32>
    %246 = arith.truncf %245 : vector<64x16xf32> to vector<64x16xbf16>
    %247 = vector.extract_strided_slice %225 {offsets = [0, 48], sizes = [64, 16], strides = [1, 1]} : vector<64x96xf32> to vector<64x16xf32>
    %248 = arith.truncf %247 : vector<64x16xf32> to vector<64x16xbf16>
    %249 = vector.extract_strided_slice %225 {offsets = [0, 80], sizes = [64, 16], strides = [1, 1]} : vector<64x96xf32> to vector<64x16xf32>
    %250 = arith.truncf %249 : vector<64x16xf32> to vector<64x16xbf16>
    "tpu.trace_start"() <{level = 10 : i32, message = "nd,md->nm"}> : () -> ()
    %cst_28 = arith.constant dense<0.000000e+00> : vector<64x64xf32>
    %251 = tpu.matmul %246, %248, %cst_28 {dimension_numbers = #tpu.dot_dimension_numbers<[1], [1], [0], [0], [0, 0, 1, 0], [], []>} : vector<64x16xbf16>, vector<64x16xbf16>, vector<64x64xf32> -> vector<64x64xf32>
    "tpu.trace_stop"() : () -> ()
    %cst_29 = arith.constant dense<0xFF800000> : vector<64xf32>
    %252 = vector.multi_reduction <maximumf>, %251, %cst_29 [1] : vector<64x64xf32> to vector<64xf32>
    %253 = vector.shape_cast %252 : vector<64xf32> to vector<64x1xf32>
    %254 = vector.broadcast %253 : vector<64x1xf32> to vector<64x64xf32>
    %255 = arith.subf %251, %254 : vector<64x64xf32>
    %256 = math.exp %255 : vector<64x64xf32>
    %cst_30 = arith.constant dense<0.000000e+00> : vector<64xf32>
    %257 = vector.multi_reduction <add>, %256, %cst_30 [1] : vector<64x64xf32> to vector<64xf32>
    %258 = vector.shape_cast %257 : vector<64xf32> to vector<64x1xf32>
    %259 = tpu.reciprocal %258 {approx = true} : vector<64x1xf32> -> vector<64x1xf32>
    %260 = vector.broadcast %259 : vector<64x1xf32> to vector<64x64xf32>
    %261 = arith.mulf %256, %260 : vector<64x64xf32>
    %262 = arith.truncf %261 : vector<64x64xf32> to vector<64x64xbf16>
    %cst_31 = arith.constant dense<0.000000e+00> : vector<64x16xf32>
    %263 = tpu.matmul %262, %250, %cst_31 {dimension_numbers = #tpu.dot_dimension_numbers<[1], [0], [0], [1], [0, 0, 1, 1], [], []>} : vector<64x64xbf16>, vector<64x16xbf16>, vector<64x16xf32> -> vector<64x16xf32>
    %264 = tpu.concatenate %244, %263 in 1 : vector<64x16xf32>, vector<64x16xf32> -> vector<64x32xf32>
    %265 = arith.truncf %264 : vector<64x32xf32> to vector<64x32xbf16>
    %c0_32 = arith.constant 0 : index
    %c0_33 = arith.constant 0 : index
    %266 = vector.load %arg8[%c0_32, %c0_33] : memref<32x32xbf16, #tpu.memory_space<vmem>>, vector<32x32xbf16>
    %cst_34 = arith.constant dense<0.000000e+00> : vector<64x32xf32>
    %267 = tpu.matmul %265, %266, %cst_34 {dimension_numbers = #tpu.dot_dimension_numbers<[1], [0], [0], [1], [0, 0, 1, 1], [], []>} : vector<64x32xbf16>, vector<32x32xbf16>, vector<64x32xf32> -> vector<64x32xf32>
    %c0_35 = arith.constant 0 : index
    %c0_36 = arith.constant 0 : index
    %268 = vector.load %arg9[%c0_35, %c0_36] : memref<1x32xf32, #tpu.memory_space<vmem>>, vector<1x32xf32>
    %269 = vector.broadcast %268 : vector<1x32xf32> to vector<64x32xf32>
    %270 = arith.addf %267, %269 : vector<64x32xf32>
    %271 = arith.addf %270, %2 : vector<64x32xf32>
    %c0_37 = arith.constant 0 : index
    %c0_38 = arith.constant 0 : index
    %272 = vector.load %arg10[%c0_37, %c0_38] : memref<1x32xf32, #tpu.memory_space<vmem>>, vector<1x32xf32>
    %c0_39 = arith.constant 0 : index
    %c0_40 = arith.constant 0 : index
    %273 = vector.load %arg11[%c0_39, %c0_40] : memref<1x32xf32, #tpu.memory_space<vmem>>, vector<1x32xf32>
    %cst_41 = arith.constant dense<0.000000e+00> : vector<64xf32>
    %274 = vector.multi_reduction <add>, %271, %cst_41 [1] : vector<64x32xf32> to vector<64xf32>
    %275 = vector.shape_cast %274 : vector<64xf32> to vector<64x1xf32>
    %cst_42 = arith.constant 3.200000e+01 : f32
    %276 = vector.broadcast %cst_42 : f32 to vector<64x1xf32>
    %277 = arith.divf %275, %276 : vector<64x1xf32>
    %278 = vector.broadcast %277 : vector<64x1xf32> to vector<64x32xf32>
    %279 = arith.subf %271, %278 : vector<64x32xf32>
    %280 = arith.mulf %279, %279 : vector<64x32xf32>
    %cst_43 = arith.constant dense<0.000000e+00> : vector<64xf32>
    %281 = vector.multi_reduction <add>, %280, %cst_43 [1] : vector<64x32xf32> to vector<64xf32>
    %282 = vector.shape_cast %281 : vector<64xf32> to vector<64x1xf32>
    %cst_44 = arith.constant 3.200000e+01 : f32
    %283 = vector.broadcast %cst_44 : f32 to vector<64x1xf32>
    %284 = arith.divf %282, %283 : vector<64x1xf32>
    %cst_45 = arith.constant 9.99999974E-6 : f32
    %285 = vector.broadcast %cst_45 : f32 to vector<64x1xf32>
    %286 = arith.addf %284, %285 : vector<64x1xf32>
    %287 = math.rsqrt %286 : vector<64x1xf32>
    %288 = vector.broadcast %287 : vector<64x1xf32> to vector<64x32xf32>
    %289 = arith.mulf %279, %288 : vector<64x32xf32>
    %290 = vector.broadcast %272 : vector<1x32xf32> to vector<64x32xf32>
    %291 = arith.mulf %289, %290 : vector<64x32xf32>
    %292 = vector.broadcast %273 : vector<1x32xf32> to vector<64x32xf32>
    %293 = arith.addf %291, %292 : vector<64x32xf32>
    %294 = arith.truncf %293 : vector<64x32xf32> to vector<64x32xbf16>
    %c0_46 = arith.constant 0 : index
    %c0_47 = arith.constant 0 : index
    %295 = vector.load %arg12[%c0_46, %c0_47] : memref<32x64xbf16, #tpu.memory_space<vmem>>, vector<32x64xbf16>
    %cst_48 = arith.constant dense<0.000000e+00> : vector<64x64xf32>
    %296 = tpu.matmul %294, %295, %cst_48 {dimension_numbers = #tpu.dot_dimension_numbers<[1], [0], [0], [1], [0, 0, 1, 1], [], []>} : vector<64x32xbf16>, vector<32x64xbf16>, vector<64x64xf32> -> vector<64x64xf32>
    %c0_49 = arith.constant 0 : index
    %c0_50 = arith.constant 0 : index
    %297 = vector.load %arg13[%c0_49, %c0_50] : memref<1x64xf32, #tpu.memory_space<vmem>>, vector<1x64xf32>
    %298 = vector.broadcast %297 : vector<1x64xf32> to vector<64x64xf32>
    %299 = arith.addf %296, %298 : vector<64x64xf32>
    %300 = arith.mulf %299, %299 : vector<64x64xf32>
    %301 = arith.mulf %299, %300 : vector<64x64xf32>
    %cst_51 = arith.constant 4.471500e-02 : f32
    %302 = vector.broadcast %cst_51 : f32 to vector<64x64xf32>
    %303 = arith.mulf %302, %301 : vector<64x64xf32>
    %304 = arith.addf %299, %303 : vector<64x64xf32>
    %cst_52 = arith.constant 0.797884583 : f32
    %305 = vector.broadcast %cst_52 : f32 to vector<64x64xf32>
    %306 = arith.mulf %305, %304 : vector<64x64xf32>
    %307 = math.tanh %306 : vector<64x64xf32>
    %cst_53 = arith.constant 1.000000e+00 : f32
    %308 = vector.broadcast %cst_53 : f32 to vector<64x64xf32>
    %309 = arith.addf %308, %307 : vector<64x64xf32>
    %cst_54 = arith.constant 5.000000e-01 : f32
    %310 = vector.broadcast %cst_54 : f32 to vector<64x64xf32>
    %311 = arith.mulf %310, %309 : vector<64x64xf32>
    %312 = arith.mulf %299, %311 : vector<64x64xf32>
    %313 = arith.truncf %312 : vector<64x64xf32> to vector<64x64xbf16>
    %c0_55 = arith.constant 0 : index
    %c0_56 = arith.constant 0 : index
    %314 = vector.load %arg14[%c0_55, %c0_56] : memref<64x32xbf16, #tpu.memory_space<vmem>>, vector<64x32xbf16>
    %cst_57 = arith.constant dense<0.000000e+00> : vector<64x32xf32>
    %315 = tpu.matmul %313, %314, %cst_57 {dimension_numbers = #tpu.dot_dimension_numbers<[1], [0], [0], [1], [0, 0, 1, 1], [], []>} : vector<64x64xbf16>, vector<64x32xbf16>, vector<64x32xf32> -> vector<64x32xf32>
    %c0_58 = arith.constant 0 : index
    %c0_59 = arith.constant 0 : index
    %316 = vector.load %arg15[%c0_58, %c0_59] : memref<1x32xf32, #tpu.memory_space<vmem>>, vector<1x32xf32>
    %317 = vector.broadcast %316 : vector<1x32xf32> to vector<64x32xf32>
    %318 = arith.addf %315, %317 : vector<64x32xf32>
    %319 = arith.addf %318, %271 : vector<64x32xf32>
    %c0_60 = arith.constant 0 : index
    %c0_61 = arith.constant 0 : index
    %c0_62 = arith.constant 0 : index
    %320 = vector.load %arg16[%c0_60, %c0_61, %c0_62] : memref<1x64x32xf32, #tpu.memory_space<vmem>>, vector<1x64x32xf32>
    %321 = vector.shape_cast %320 : vector<1x64x32xf32> to vector<64x32xf32>
    %322 = vector.shape_cast %319 : vector<64x32xf32> to vector<1x64x32xf32>
    tpu.vector_store %arg16[%c0_60, %c0_61, %c0_62], %322 {strides = array<i32>} : memref<1x64x32xf32, #tpu.memory_space<vmem>>, vector<1x64x32xf32>,
    return
  }
  func.func @transform_0(%arg0: i32) -> (i32, i32, i32, i32) {
    %c0_i32 = arith.constant 0 : i32
    %c0_i32_0 = arith.constant 0 : i32
    %c0_i32_1 = arith.constant 0 : i32
    %c0_i32_2 = arith.constant 0 : i32
    return %arg0, %c0_i32, %c0_i32_0, %c0_i32_1 : i32, i32, i32, i32
  }
  func.func @transform_1(%arg0: i32) -> (i32, i32) {
    %c0_i32 = arith.constant 0 : i32
    %c0_i32_0 = arith.constant 0 : i32
    %c0_i32_1 = arith.constant 0 : i32
    return %c0_i32, %c0_i32_0 : i32, i32
  }
  func.func @transform_2(%arg0: i32) -> (i32, i32) {
    %c0_i32 = arith.constant 0 : i32
    %c0_i32_0 = arith.constant 0 : i32
    %c0_i32_1 = arith.constant 0 : i32
    return %c0_i32, %c0_i32_0 : i32, i32
  }
  func.func @transform_3(%arg0: i32) -> (i32, i32, i32) {
    %c0_i32 = arith.constant 0 : i32
    %c0_i32_0 = arith.constant 0 : i32
    %c0_i32_1 = arith.constant 0 : i32
    %c0_i32_2 = arith.constant 0 : i32
    return %c0_i32, %c0_i32_0, %c0_i32_1 : i32, i32, i32
  }
  func.func @transform_4(%arg0: i32) -> (i32, i32, i32) {
    %c0_i32 = arith.constant 0 : i32
    %c0_i32_0 = arith.constant 0 : i32
    %c0_i32_1 = arith.constant 0 : i32
    %c0_i32_2 = arith.constant 0 : i32
    return %c0_i32, %c0_i32_0, %c0_i32_1 : i32, i32, i32
  }
  func.func @transform_5(%arg0: i32) -> (i32, i32) {
    %c0_i32 = arith.constant 0 : i32
    %c0_i32_0 = arith.constant 0 : i32
    %c0_i32_1 = arith.constant 0 : i32
    return %c0_i32, %c0_i32_0 : i32, i32
  }
  func.func @transform_6(%arg0: i32) -> (i32, i32) {
    %c0_i32 = arith.constant 0 : i32
    %c0_i32_0 = arith.constant 0 : i32
    %c0_i32_1 = arith.constant 0 : i32
    return %c0_i32, %c0_i32_0 : i32, i32
  }
  func.func @transform_7(%arg0: i32) -> (i32, i32) {
    %c0_i32 = arith.constant 0 : i32
    %c0_i32_0 = arith.constant 0 : i32
    %c0_i32_1 = arith.constant 0 : i32
    return %c0_i32, %c0_i32_0 : i32, i32
  }
  func.func @transform_8(%arg0: i32) -> (i32, i32) {
    %c0_i32 = arith.constant 0 : i32
    %c0_i32_0 = arith.constant 0 : i32
    %c0_i32_1 = arith.constant 0 : i32
    return %c0_i32, %c0_i32_0 : i32, i32
  }
  func.func @transform_9(%arg0: i32) -> (i32, i32) {
    %c0_i32 = arith.constant 0 : i32
    %c0_i32_0 = arith.constant 0 : i32
    %c0_i32_1 = arith.constant 0 : i32
    return %c0_i32, %c0_i32_0 : i32, i32
  }
  func.func @transform_10(%arg0: i32) -> (i32, i32) {
    %c0_i32 = arith.constant 0 : i32
    %c0_i32_0 = arith.constant 0 : i32
    %c0_i32_1 = arith.constant 0 : i32
    return %c0_i32, %c0_i32_0 : i32, i32
  }
  func.func @transform_11(%arg0: i32) -> (i32, i32) {
    %c0_i32 = arith.constant 0 : i32
    %c0_i32_0 = arith.constant 0 : i32
    %c0_i32_1 = arith.constant 0 : i32
    return %c0_i32, %c0_i32_0 : i32, i32
  }
  func.func @transform_12(%arg0: i32) -> (i32, i32) {
    %c0_i32 = arith.constant 0 : i32
    %c0_i32_0 = arith.constant 0 : i32
    %c0_i32_1 = arith.constant 0 : i32
    return %c0_i32, %c0_i32_0 : i32, i32
  }
  func.func @transform_13(%arg0: i32) -> (i32, i32) {
    %c0_i32 = arith.constant 0 : i32
    %c0_i32_0 = arith.constant 0 : i32
    %c0_i32_1 = arith.constant 0 : i32
    return %c0_i32, %c0_i32_0 : i32, i32
  }
  func.func @transform_14(%arg0: i32) -> (i32, i32) {
    %c0_i32 = arith.constant 0 : i32
    %c0_i32_0 = arith.constant 0 : i32
    %c0_i32_1 = arith.constant 0 : i32
    return %c0_i32, %c0_i32_0 : i32, i32
  }
  func.func @transform_15(%arg0: i32) -> (i32, i32, i32) {
    %c0_i32 = arith.constant 0 : i32
    %c0_i32_0 = arith.constant 0 : i32
    %c0_i32_1 = arith.constant 0 : i32
    return %arg0, %c0_i32, %c0_i32_0 : i32, i32, i32
  }
}

</mosaic_0001>

<bundles_post_ra>
// kernel: transformer_forward.2
= control target key start
LH: loop header
LB: loop body
LE: loop exit
PB: predicated region body
PF: predicated region fallthrough
CT: control target
= control target key end

     0   :  { %s4282_s18 = smov 0   ;;  %s6065_s0 = inlined_call_operand.vmem [shape: f32[2,8,8,32], index: 0, kind: input, shape index: {}]   ;;  %s6066_s1 = inlined_call_operand.vmem [shape: f32[1,32], index: 1, kind: input, shape index: {}]   ;;  %s6067_s2 = inlined_call_operand.vmem [shape: f32[1,32], index: 2, kind: input, shape index: {}]   ;;  %s6068_s3 = inlined_call_operand.vmem [shape: f32[3,9,32], index: 3, kind: input, shape index: {}]   ;;  %s6069_s4 = inlined_call_operand.vmem [shape: f32[3,1,32], index: 4, kind: input, shape index: {}]   ;;  %s6070_s5 = inlined_call_operand.vmem [shape: bf16[96,96], index: 5, kind: input, shape index: {}]   ;;  %s6071_s6 = inlined_call_operand.vmem [shape: f32[1,96], index: 6, kind: input, shape index: {}]   ;;  %s6072_s7 = inlined_call_operand.vmem [shape: bf16[32,32], index: 7, kind: input, shape index: {}]   ;;  %s6073_s8 = inlined_call_operand.vmem [shape: f32[1,32], index: 8, kind: input, shape index: {}]   ;;  %s6074_s9 = inlined_call_operand.vmem [shape: f32[1,32], index: 9, kind: input, shape index: {}]   ;;  %s6075_s10 = inlined_call_operand.vmem [shape: f32[1,32], index: 10, kind: input, shape index: {}]   ;;  %s6076_s11 = inlined_call_operand.vmem [shape: bf16[32,64], index: 11, kind: input, shape index: {}]   ;;  %s6077_s12 = inlined_call_operand.vmem [shape: f32[1,64], index: 12, kind: input, shape index: {}]   ;;  %s6078_s13 = inlined_call_operand.vmem [shape: bf16[64,32], index: 13, kind: input, shape index: {}]   ;;  %s6079_s14 = inlined_call_operand.vmem [shape: f32[1,32], index: 14, kind: input, shape index: {}]   ;;  %s6080_s15 = inlined_call_operand.vmem [shape: f32[2,64,32], index: 15, kind: output, shape index: {}]  }
   0x1 LB: > { %s3707_s19 = sadd.s32 4294967295, %s4192_s18   ;;  %p3711_p0 = scmp.ge.s32.totalorder %s4192_s18, 1  ;;  %s4192_s18 = sphi %s4282_s18, %s25_s18  }
   0x2   : > { %p437_p1 = scmp.lt.s32.totalorder %s4192_s18, 3 }
   0x4   : > { %p438_p2 = pnand %p3711_p0, %p437_p1 }
   0x6   : > { %441 = sbr.rel (%p438_p2) target bundleno = 2954 (0xb8a), region = 80 }
   0xd   : > { %p485_p3 = scmp.lt.s32.totalorder %s3707_s19, 1  ;;  %vm506_vm0 = vcmask 261120   ;;  %v695_v56 = vlaneseq  ;;  %v4194_v59 = vmov 0.0   ;;  %v4364_v61 = vld [vmem:[%s6068_s3 + $0x10] sm:$0xff]  ;;  %vm667_vm1 = vcmask 1040384   ;;  %s4195_s25 = smov 32  }
   0xe   : > { %v649_v60 = vrot.slane %v4194_v59, 7  ;;  %vm767_vm2 = vcmask 1046528   ;;  %vm996_vm3 = vcmask 1045504   ;;  %s4196_s26 = smov 64   ;;  %vm2335_vm4 = vcmask 523264   ;;  %s4197_s24 = smov 96  }
   0xf   : > { %s6106_s19 = smov (!%p485_p3, %s3707_s19), 1  ;;  %v4356_v57 = vshrl.u32 %v695_v56, 7  ;;  %vm2403_vm5 = vcmask 785408   ;;  %vm2497_vm6 = vcmask 130048   ;;  %s4198_s27 = smov 80  }
  0x10   : > { %s3778_s20 = sshll.u32 %s6106_s19, 6  ;;  %v4371_v63 = vsel %vm667_vm1, 0.0, %v649_v60  ;;  %s4200_s28 = smov 48  }
  0x11   : > { %s4298_s23 = scalar_lea.vmem %s6065_s0, %s3778_s20  ;;  %v4359_v58 = vsub.s32 1, %v4356_v57  ;;  %s4201_s17 = smov 16  }
  0x12   : > { %v496_v0 = vld [vmem:[%s4298_s23] sm:$0xff]  ;;  %v498_v1 = vld [vmem:[%s4298_s23 + $0x10] sm:$0xff]  ;;  %v497_v2 = vld [vmem:[%s4298_s23 + $0x8] sm:$0xff]  ;;  %s494_s21 = scalar_lea.vmem %s6080_s15, %s3778_s20 }
  0x13   : > { %v507_v3 = vsel %vm506_vm0, %v496_v0, 0.0  ;;  %v513_v4 = vsel %vm506_vm0, %v498_v1, 0.0  ;;  %v499_v5 = vld [vmem:[%s4298_s23 + $0x18] sm:$0xff]  ;;  %v510_v6 = vsel %vm506_vm0, %v497_v2, 0.0  ;;  %v500_v7 = vld [vmem:[%s4298_s23 + $0x20] sm:$0xff]  ;;  %v501_v9 = vld [vmem:[%s4298_s23 + $0x28] sm:$0xff]  ;;  %v4368_v62 = vrot.slane %v4364_v61, %v4359_v58 }
  0x14   : > { %508 = vadd.xlane.f32.xlu0 %v507_v3  ;;  %514 = vadd.xlane.f32.xlu1 %v513_v4  ;;  %v516_v8 = vsel %vm506_vm0, %v499_v5, 0.0  ;;  %v519_v10 = vsel %vm506_vm0, %v500_v7, 0.0  ;;  %v522_v11 = vsel %vm506_vm0, %v501_v9, 0.0  ;;  %v502_v12 = vld [vmem:[%s4298_s23 + $0x30] sm:$0xff]  ;;  %v503_v13 = vld [vmem:[%s4298_s23 + $0x38] sm:$0xff]  ;;  %v4382_v3 = vsub.s32 0, %v4356_v57 }
  0x15   : > { %v525_v14 = vsel %vm506_vm0, %v502_v12, 0.0  ;;  %v528_v15 = vsel %vm506_vm0, %v503_v13, 0.0  ;;  %v812_v4 = vmul.f32 %v4368_v62, %v4371_v63 }
  0x18   : > { %511 = vadd.xlane.f32.xlu0 %v510_v6  ;;  %517 = vadd.xlane.f32.xlu1 %v516_v8 }
  0x1c   : > { %520 = vadd.xlane.f32.xlu0 %v519_v10  ;;  %523 = vadd.xlane.f32.xlu1 %v522_v11 }
  0x20   : > { %526 = vadd.xlane.f32.xlu0 %v525_v14  ;;  %529 = vadd.xlane.f32.xlu1 %v528_v15 }
  0xa1   : > { %v509_v16 = vpop.xlane.xlu0 %508  ;;  %v515_v17 = vpop.xlane.xlu1 %514 }
  0xa2   : > { %v532_v18 = vmul.f32 0.03125, %v509_v16  ;;  %v534_v19 = vmul.f32 0.03125, %v515_v17 }
  0xa4   : > { %v4316_v20 = vsub.f32 %v496_v0, %v532_v18  ;;  %v4318_v21 = vsub.f32 %v498_v1, %v534_v19  ;;  %v4374_v0 = vsel %vm667_vm1, %v649_v60, 0.0  ;;  %v4379_v1 = vld [vmem:[%s6068_s3 + $0x20] sm:$0xff] }
  0xa5   : > { %v512_v22 = vpop.xlane.xlu0 %511  ;;  %v518_v23 = vpop.xlane.xlu1 %517  ;;  %v4393_v8 = vrot.slane %v4379_v1, %v4359_v58 }
  0xa6   : > { %v533_v24 = vmul.f32 0.03125, %v512_v22  ;;  %v535_v25 = vmul.f32 0.03125, %v518_v23  ;;  %v548_v26 = vmul.f32 %v4316_v20, %v4316_v20  ;;  %v550_v27 = vmul.f32 %v4318_v21, %v4318_v21 }
  0xa7   : > { %v888_v18 = vmul.f32 %v4393_v8, %v4371_v63  ;;  %v889_v19 = vmul.f32 %v4393_v8, %v4374_v0 }
  0xa8   : > { %v4324_v28 = vsub.f32 %v497_v2, %v533_v24  ;;  %v4326_v29 = vsub.f32 %v499_v5, %v535_v25  ;;  %v556_v30 = vsel %vm506_vm0, %v548_v26, 0.0  ;;  %v562_v33 = vsel %vm506_vm0, %v550_v27, 0.0 }
  0xa9   : > { %557 = vadd.xlane.f32.xlu0 %v556_v30  ;;  %v521_v31 = vpop.xlane.xlu0 %520  ;;  %v524_v32 = vpop.xlane.xlu1 %523  ;;  %v4387_v5 = vsub.s32 2, %v4356_v57 }
  0xaa   : > { %v536_v34 = vmul.f32 0.03125, %v521_v31  ;;  %v537_v35 = vmul.f32 0.03125, %v524_v32  ;;  %v549_v36 = vmul.f32 %v4324_v28, %v4324_v28  ;;  %v551_v37 = vmul.f32 %v4326_v29, %v4326_v29 }
  0xab   : > { %v4401_v14 = vrot.slane %v4364_v61, %v4387_v5  ;;  %v4409_v24 = vrot.slane %v4379_v1, %v4387_v5 }
  0xac   : > { %v4334_v38 = vsub.f32 %v500_v7, %v536_v34  ;;  %v4336_v39 = vsub.f32 %v501_v9, %v537_v35  ;;  %v559_v40 = vsel %vm506_vm0, %v549_v36, 0.0  ;;  %v565_v43 = vsel %vm506_vm0, %v551_v37, 0.0 }
  0xad   : > { %563 = vadd.xlane.f32.xlu0 %v562_v33  ;;  %560 = vadd.xlane.f32.xlu1 %v559_v40  ;;  %v527_v41 = vpop.xlane.xlu0 %526  ;;  %v530_v42 = vpop.xlane.xlu1 %529  ;;  %v813_v7 = vmul.f32 %v4368_v62, %v4374_v0  ;;  %v1041_v30 = vmul.f32 %v4401_v14, %v4371_v63  ;;  %v1042_v31 = vmul.f32 %v4401_v14, %v4374_v0  ;;  %v920_v36 = vrot.slane %v888_v18, 1 }
  0xae   : > { %v538_v44 = vmul.f32 0.03125, %v527_v41  ;;  %v539_v45 = vmul.f32 0.03125, %v530_v42  ;;  %v552_v46 = vmul.f32 %v4334_v38, %v4334_v38  ;;  %v553_v47 = vmul.f32 %v4336_v39, %v4336_v39 }
  0xaf   : > { %v845_v17 = vrot.slane %v813_v7, 1  ;;  %v4420_v35 = vrot.slane %v4379_v1, %v4382_v3  ;;  %v921_v37 = vrot.slane %v889_v19, 1  ;;  %v1117_v42 = vmul.f32 %v4409_v24, %v4371_v63 }
  0xb0   : > { %v4344_v48 = vsub.f32 %v502_v12, %v538_v44  ;;  %v4346_v49 = vsub.f32 %v503_v13, %v539_v45  ;;  %v568_v50 = vsel %vm506_vm0, %v552_v46, 0.0  ;;  %v571_v51 = vsel %vm506_vm0, %v553_v47, 0.0 }
  0xb1   : > { %566 = vadd.xlane.f32.xlu1 %v565_v43  ;;  %569 = vadd.xlane.f32.xlu0 %v568_v50  ;;  %v4397_v12 = vrot.slane %v4364_v61, %v4382_v3  ;;  %v844_v13 = vrot.slane %v812_v4, 1  ;;  %v1118_v43 = vmul.f32 %v4409_v24, %v4374_v0  ;;  %v1073_v47 = vrot.slane %v1041_v30, 2 }
  0xb2   : > { %v554_v52 = vmul.f32 %v4344_v48, %v4344_v48  ;;  %v555_v53 = vmul.f32 %v4346_v49, %v4346_v49  ;;  %v1074_v50 = vrot.slane %v1042_v31, 2  ;;  %v723_v56 = vmul.f32 %v4420_v35, %v4371_v63 }
  0xb3   : > { %v711_v27 = vmul.f32 %v4397_v12, %v4371_v63  ;;  %v846_v34 = vsel %vm767_vm2, %v844_v13, %v845_v17  ;;  %v922_v59 = vsel %vm767_vm2, %v920_v36, %v921_v37  ;;  %v1150_v7 = vrot.slane %v1118_v43, 2 }
  0xb4   : > { %v574_v54 = vsel %vm506_vm0, %v554_v52, 0.0  ;;  %v577_v55 = vsel %vm506_vm0, %v555_v53, 0.0  ;;  %v4443_v13 = vsub.s32 5, %v4356_v57  ;;  %v4454_v18 = vsub.s32 7, %v4356_v57 }
  0xb5   : > { %572 = vadd.xlane.f32.xlu1 %v571_v51  ;;  %575 = vadd.xlane.f32.xlu0 %v574_v54  ;;  %v876_v46 = vadd.f32 %v846_v34, %v711_v27  ;;  %v4427_v51 = vsub.s32 3, %v4356_v57  ;;  %v4432_v54 = vld [vmem:[%s6066_s1] ss:$0 sm:$0xff] }
  0xb6   : > { %6090 = vst [vmem:[#allocation4_spill] sm:$0xff] %v4443_v13  ;;  %6092 = vst [vmem:[#allocation6_spill] sm:$0xff] %v4454_v18  ;;  %v4481_v37 = vrot.slane %v4364_v61, %v4454_v18 }
  0xb7   : > { %6088 = vst [vmem:[#allocation2_spill] sm:$0xff] %v4427_v51  ;;  %v4459_v19 = vrot.slane %v4364_v61, %v4427_v51 }
  0xb9   : > { %578 = vadd.xlane.f32.xlu1 %v577_v55  ;;  %v4435_v55 = vsub.s32 4, %v4356_v57 }
  0xbb   : > { %6089 = vst [vmem:[#allocation3_spill] sm:$0xff] %v4435_v55  ;;  %v4465_v27 = vrot.slane %v4364_v61, %v4435_v55  ;;  %v4492_v43 = vrot.slane %v4379_v1, %v4435_v55 }
 0x136   : > { %v558_v2 = vpop.xlane.xlu0 %557 }
 0x137   : > { %v580_v6 = vmul.f32 0.03125, %v558_v2 }
 0x139   : > { %v588_v9 = vadd.f32 1e-05, %v580_v6  ;;  %v1149_v6 = vrot.slane %v1117_v42, 2 }
 0x13a   : > { %v561_v10 = vpop.xlane.xlu1 %560  ;;  %v564_v11 = vpop.xlane.xlu0 %563 }
 0x13b   : > { %4064 = vrsqrt.f32 %v588_v9  ;;  %v581_v15 = vmul.f32 0.03125, %v561_v10  ;;  %v582_v16 = vmul.f32 0.03125, %v564_v11  ;;  %v1075_v11 = vsel %vm996_vm3, %v1073_v47, %v1074_v50 }
 0x13c   : > { %v1151_v30 = vsel %vm996_vm3, %v1149_v6, %v1150_v7 }
 0x13d   : > { %v589_v22 = vadd.f32 1e-05, %v581_v15  ;;  %v590_v23 = vadd.f32 1e-05, %v582_v16  ;;  %v4446_v15 = vsub.s32 6, %v4356_v57 }
 0x13e   : > { %v567_v25 = vpop.xlane.xlu1 %566  ;;  %v570_v26 = vpop.xlane.xlu0 %569  ;;  %v4451_v16 = vld [vmem:[%s6067_s2] ss:$0 sm:$0xff] }
 0x13f   : > { %4066 = vrsqrt.f32 %v589_v22  ;;  %v583_v32 = vmul.f32 0.03125, %v567_v25  ;;  %v584_v33 = vmul.f32 0.03125, %v570_v26  ;;  %6091 = vst [vmem:[#allocation5_spill] sm:$0xff] %v4446_v15  ;;  %v952_v22 = vadd.f32 %v922_v59, %v723_v56 }
 0x140   : > { %4068 = vrsqrt.f32 %v590_v23  ;;  %v4461_v26 = vadd.f32 %v1075_v11, %v876_v46  ;;  %v4476_v34 = vrot.slane %v4364_v61, %v4446_v15  ;;  %v4505_v46 = vrot.slane %v4379_v1, %v4454_v18 }
 0x141   : > { %v591_v40 = vadd.f32 1e-05, %v583_v32  ;;  %v592_v41 = vadd.f32 1e-05, %v584_v33  ;;  %v4472_v33 = vrot.slane %v4364_v61, %v4443_v13  ;;  %v4488_v42 = vadd.f32 %v1151_v30, %v952_v22 }
 0x142   : > { %v573_v44 = vpop.xlane.xlu1 %572  ;;  %v576_v45 = vpop.xlane.xlu0 %575  ;;  %v4497_v61 = vrot.slane %v4379_v1, %v4443_v13 }
 0x143   : > { %4070 = vrsqrt.f32 %v591_v40  ;;  %v585_v52 = vmul.f32 0.03125, %v573_v44  ;;  %v586_v53 = vmul.f32 0.03125, %v576_v45  ;;  %v4485_v40 = vrot.slane %v4379_v1, %v4427_v51 }
 0x144   : > { %4072 = vrsqrt.f32 %v592_v41  ;;  %v4501_v45 = vrot.slane %v4379_v1, %v4446_v15 }
 0x145   : > { %v4065_v60 = vpop.eup %4064  ;;  %v593_v2 = vadd.f32 1e-05, %v585_v52  ;;  %v594_v4 = vadd.f32 1e-05, %v586_v53 }
 0x146   : > { %v604_v9 = vmul.f32 %v4065_v60, %v4316_v20  ;;  %v579_v10 = vpop.xlane.xlu1 %578 }
 0x147   : > { %4074 = vrsqrt.f32 %v593_v2  ;;  %v587_v17 = vmul.f32 0.03125, %v579_v10 }
 0x148   : > { %v618_v20 = vmul.f32 %v4432_v54, %v604_v9  ;;  %4076 = vrsqrt.f32 %v594_v4 }
 0x149   : > { %v4067_v23 = vpop.eup %4066  ;;  %v595_v25 = vadd.f32 1e-05, %v587_v17 }
 0x14a   : > { %v4069_v57 = vpop.eup %4068  ;;  %v632_v31 = vadd.f32 %v4451_v16, %v618_v20  ;;  %v605_v32 = vmul.f32 %v4067_v23, %v4324_v28 }
 0x14b   : > { %v606_v36 = vmul.f32 %v4069_v57, %v4318_v21  ;;  %4078 = vrsqrt.f32 %v595_v25 }
 0x14c   : > { %v650_v28 = vrot.slane %v632_v31, 7  ;;  %v619_v41 = vmul.f32 %v4432_v54, %v605_v32 }
 0x14d   : > { %v4071_v44 = vpop.eup %4070  ;;  %v620_v21 = vmul.f32 %v4432_v54, %v606_v36 }
 0x14e   : > { %v4073_v47 = vpop.eup %4072  ;;  %v4508_v50 = vsel %vm667_vm1, 0.0, %v650_v28  ;;  %v4511_v52 = vsel %vm667_vm1, %v650_v28, 0.0  ;;  %v633_v53 = vadd.f32 %v4451_v16, %v619_v41  ;;  %v607_v56 = vmul.f32 %v4071_v44, %v4326_v29 }
 0x14f   : > { %6093 = vst [vmem:[#allocation7_spill] sm:$0xff] %v4511_v52  ;;  %v634_v59 = vadd.f32 %v4451_v16, %v620_v21  ;;  %v608_v60 = vmul.f32 %v4073_v47, %v4334_v38  ;;  %v712_v2 = vmul.f32 %v4397_v12, %v4508_v50  ;;  %v814_v1 = vmul.f32 %v4368_v62, %v4508_v50 }
 0x150   : > { %v651_v4 = vrot.slane %v633_v53, 7  ;;  %v621_v6 = vmul.f32 %v4432_v54, %v607_v56  ;;  %v815_v7 = vmul.f32 %v4368_v62, %v4511_v52  ;;  %v1043_v9 = vmul.f32 %v4401_v14, %v4508_v50 }
 0x151   : > { %v4075_v29 = vpop.eup %4074  ;;  %v652_v10 = vrot.slane %v634_v59, 7  ;;  %v622_v11 = vmul.f32 %v4432_v54, %v608_v60  ;;  %v847_v38 = vrot.slane %v814_v1, 1  ;;  %v1044_v17 = vmul.f32 %v4401_v14, %v4511_v52 }
 0x152   : > { %v4077_v20 = vpop.eup %4076  ;;  %v4530_v22 = vsel %vm667_vm1, 0.0, %v651_v4  ;;  %v4533_v23 = vsel %vm667_vm1, %v651_v4, 0.0  ;;  %v635_v25 = vadd.f32 %v4451_v16, %v621_v6  ;;  %v609_v30 = vmul.f32 %v4075_v29, %v4336_v39 }
 0x153   : > { %v4538_v57 = vsel %vm667_vm1, 0.0, %v652_v10  ;;  %v4541_v31 = vsel %vm667_vm1, %v652_v10, 0.0  ;;  %v636_v32 = vadd.f32 %v4451_v16, %v622_v11  ;;  %v610_v36 = vmul.f32 %v4077_v20, %v4344_v48 }
 0x154   : > { %v653_v28 = vrot.slane %v635_v25, 7  ;;  %v623_v41 = vmul.f32 %v4432_v54, %v609_v30  ;;  %v848_v44 = vrot.slane %v815_v7, 1  ;;  %v1076_v21 = vrot.slane %v1043_v9, 2 }
 0x155   : > { %v4079_v47 = vpop.eup %4078  ;;  %v654_v53 = vrot.slane %v636_v32, 7  ;;  %v624_v56 = vmul.f32 %v4432_v54, %v610_v36  ;;  %v1077_v39 = vrot.slane %v1044_v17, 2  ;;  %v1213_v59 = vmul.f32 %v4459_v19, %v4508_v50 }
 0x156   : > { %v4550_v60 = vsel %vm667_vm1, 0.0, %v653_v28  ;;  %v4553_v1 = vsel %vm667_vm1, %v653_v28, 0.0  ;;  %v637_v48 = vadd.f32 %v4451_v16, %v623_v41  ;;  %v611_v4 = vmul.f32 %v4079_v47, %v4346_v49 }
 0x157   : > { %v4558_v6 = vsel %vm667_vm1, 0.0, %v654_v53  ;;  %v4561_v7 = vsel %vm667_vm1, %v654_v53, 0.0  ;;  %v638_v9 = vadd.f32 %v4451_v16, %v624_v56  ;;  %v849_v29 = vsel %vm767_vm2, %v847_v38, %v848_v44 }
 0x158   : > { %v655_v10 = vrot.slane %v637_v48, 7  ;;  %v625_v11 = vmul.f32 %v4432_v54, %v611_v4  ;;  %v877_v17 = vadd.f32 %v849_v29, %v712_v2  ;;  %v1078_v20 = vsel %vm996_vm3, %v1076_v21, %v1077_v39 }
 0x159   : > { %v656_v25 = vrot.slane %v638_v9, 7  ;;  %v1214_v49 = vmul.f32 %v4459_v19, %v4530_v22  ;;  %v1221_v30 = vadd.f32 %v1213_v59, %v4461_v26  ;;  %v1329_v32 = vmul.f32 %v4465_v27, %v4508_v50 }
 0x15a   : > { %v4573_v36 = vsel %vm667_vm1, 0.0, %v655_v10  ;;  %v4576_v38 = vsel %vm667_vm1, %v655_v10, 0.0  ;;  %v639_v54 = vadd.f32 %v4451_v16, %v625_v11  ;;  %v1106_v2 = vadd.f32 %v1078_v20, %v877_v17 }
 0x15b   : > { %v4580_v28 = vsel %vm667_vm1, 0.0, %v656_v25  ;;  %v4583_v41 = vsel %vm667_vm1, %v656_v25, 0.0  ;;  %v1330_v26 = vmul.f32 %v4465_v27, %v4511_v52  ;;  %v1331_v44 = vmul.f32 %v4465_v27, %v4530_v22 }
 0x15c   : > { %v657_v21 = vrot.slane %v639_v54, 7  ;;  %v1222_v47 = vadd.f32 %v1214_v49, %v1106_v2  ;;  %v1332_v53 = vmul.f32 %v4465_v27, %v4533_v23  ;;  %v1361_v56 = vrot.slane %v1329_v32, 1  ;;  %v4609_v49 = vld [vmem:[%s6068_s3 + $0x18] ss:$0 sm:$0xff] }
 0x15d   : > { %v1362_v16 = vrot.slane %v1330_v26, 1  ;;  %v1364_v39 = vrot.slane %v1331_v44, 1  ;;  %v1557_v59 = vmul.f32 %v4472_v33, %v4508_v50  ;;  %v1558_v48 = vmul.f32 %v4472_v33, %v4511_v52 }
 0x15e   : > { %v4596_v4 = vsel %vm667_vm1, 0.0, %v657_v21  ;;  %v4599_v9 = vsel %vm667_vm1, %v657_v21, 0.0  ;;  %v1365_v29 = vrot.slane %v1332_v53, 1  ;;  %v1559_v10 = vmul.f32 %v4472_v33, %v4530_v22 }
 0x15f   : > { %v1363_v11 = vsel %vm767_vm2, %v1361_v56, %v1362_v16  ;;  %v1560_v17 = vmul.f32 %v4472_v33, %v4533_v23  ;;  %v1589_v20 = vrot.slane %v1557_v59, 2  ;;  %v1590_v25 = vrot.slane %v1558_v48, 2 }
 0x160   : > { %v1366_v32 = vsel %vm767_vm2, %v1364_v39, %v1365_v29  ;;  %v1393_v54 = vadd.f32 %v1363_v11, %v1221_v30  ;;  %v1592_v2 = vrot.slane %v1559_v10, 2  ;;  %v1729_v26 = vmul.f32 %v4476_v34, %v4530_v22 }
 0x161   : > { %v1394_v44 = vadd.f32 %v1366_v32, %v1222_v47  ;;  %v1591_v21 = vsel %vm996_vm3, %v1589_v20, %v1590_v25  ;;  %v1593_v53 = vrot.slane %v1560_v17, 2  ;;  %v1730_v56 = vmul.f32 %v4476_v34, %v4538_v57 }
 0x162   : > { %v1621_v16 = vadd.f32 %v1591_v21, %v1393_v54  ;;  %v1845_v59 = vmul.f32 %v4481_v37, %v4530_v22  ;;  %v1846_v48 = vmul.f32 %v4481_v37, %v4533_v23  ;;  %v1847_v30 = vmul.f32 %v4481_v37, %v4538_v57 }
 0x163   : > { %v1594_v39 = vsel %vm996_vm3, %v1592_v2, %v1593_v53  ;;  %v1848_v47 = vmul.f32 %v4481_v37, %v4541_v31  ;;  %v2073_v29 = vmul.f32 %v4609_v49, %v4530_v22  ;;  %v2074_v10 = vmul.f32 %v4609_v49, %v4533_v23 }
 0x164   : > { %v1622_v11 = vadd.f32 %v1594_v39, %v1394_v44  ;;  %v1737_v17 = vadd.f32 %v1729_v26, %v1621_v16  ;;  %v1877_v20 = vrot.slane %v1845_v59, 1  ;;  %v1878_v25 = vrot.slane %v1846_v48, 1  ;;  %v4639_v16 = vld [vmem:[%s6069_s4 + $0x1] ss:$0 sm:$0xff] }
 0x165   : > { %v1880_v32 = vrot.slane %v1847_v30, 1  ;;  %v1881_v54 = vrot.slane %v1848_v47, 1  ;;  %v2075_v21 = vmul.f32 %v4609_v49, %v4538_v57  ;;  %v2076_v2 = vmul.f32 %v4609_v49, %v4541_v31 }
 0x166   : > { %v1738_v53 = vadd.f32 %v1730_v56, %v1622_v11  ;;  %v1879_v15 = vsel %vm767_vm2, %v1877_v20, %v1878_v25  ;;  %v2105_v18 = vrot.slane %v2073_v29, 2  ;;  %v2106_v13 = vrot.slane %v2074_v10, 2 }
 0x167   : > { %v1882_v55 = vsel %vm767_vm2, %v1880_v32, %v1881_v54  ;;  %v1909_v51 = vadd.f32 %v1879_v15, %v1737_v17  ;;  %v2108_v44 = vrot.slane %v2075_v21, 2  ;;  %v2109_v26 = vrot.slane %v2076_v2, 2 }
 0x168   : > { %v1910_v59 = vadd.f32 %v1882_v55, %v1738_v53  ;;  %v2107_v48 = vsel %vm996_vm3, %v2105_v18, %v2106_v13  ;;  %v713_v56 = vmul.f32 %v4397_v12, %v4530_v22  ;;  %v714_v30 = vmul.f32 %v4397_v12, %v4538_v57 }
 0x169   : > { %v2110_v39 = vsel %vm996_vm3, %v2108_v44, %v2109_v26  ;;  %v2137_v47 = vadd.f32 %v2107_v48, %v1909_v51  ;;  %v816_v15 = vmul.f32 %v4368_v62, %v4530_v22  ;;  %v817_v29 = vmul.f32 %v4368_v62, %v4533_v23 }
 0x16a   : > { %v2138_v10 = vadd.f32 %v2110_v39, %v1910_v59  ;;  %v818_v55 = vmul.f32 %v4368_v62, %v4538_v57  ;;  %v819_v13 = vmul.f32 %v4368_v62, %v4541_v31  ;;  %v1045_v18 = vmul.f32 %v4401_v14, %v4530_v22 }
 0x16b   : > { %v2241_v11 = vadd.f32 %v4639_v16, %v2137_v47  ;;  %v850_v17 = vrot.slane %v816_v15, 1  ;;  %v851_v51 = vrot.slane %v817_v29, 1  ;;  %v1046_v20 = vmul.f32 %v4401_v14, %v4533_v23 }
 0x16c   : > { %v2242_v25 = vadd.f32 %v4639_v16, %v2138_v10  ;;  %v853_v32 = vrot.slane %v818_v55, 1  ;;  %v854_v54 = vrot.slane %v819_v13, 1  ;;  %v1047_v21 = vmul.f32 %v4401_v14, %v4538_v57 }
 0x16d   : > { %v852_v2 = vsel %vm767_vm2, %v850_v17, %v851_v51  ;;  %v1048_v53 = vmul.f32 %v4401_v14, %v4541_v31  ;;  %v1079_v44 = vrot.slane %v1045_v18, 2  ;;  %v1080_v26 = vrot.slane %v1046_v20, 2 }
 0x16e   : > { %v3990_v59 = vpack.i.bf16 %v2242_v25, %v2241_v11  ;;  %v855_v48 = vsel %vm767_vm2, %v853_v32, %v854_v54  ;;  %v878_v39 = vadd.f32 %v852_v2, %v713_v56  ;;  %v1082_v47 = vrot.slane %v1047_v21, 2 }
 0x16f   : > { %v879_v15 = vadd.f32 %v855_v48, %v714_v30  ;;  %v1081_v29 = vsel %vm996_vm3, %v1079_v44, %v1080_v26  ;;  %v1083_v10 = vrot.slane %v1048_v53, 2  ;;  %v1215_v55 = vmul.f32 %v4459_v19, %v4538_v57 }
 0x170   : > { %3991 = vrot.lane.b32.xlu0 %v3990_v59, %s4195_s25  ;;  %v1107_v13 = vadd.f32 %v1081_v29, %v878_v39  ;;  %v1216_v18 = vmul.f32 %v4459_v19, %v4550_v60  ;;  %v1333_v11 = vmul.f32 %v4465_v27, %v4538_v57  ;;  %v1334_v56 = vmul.f32 %v4465_v27, %v4541_v31 }
 0x171   : > { %v1084_v30 = vsel %vm996_vm3, %v1082_v47, %v1083_v10  ;;  %v1335_v17 = vmul.f32 %v4465_v27, %v4550_v60  ;;  %v1336_v51 = vmul.f32 %v4465_v27, %v4553_v1  ;;  %v1561_v20 = vmul.f32 %v4472_v33, %v4538_v57 }
 0x172   : > { %v1108_v25 = vadd.f32 %v1084_v30, %v879_v15  ;;  %v1223_v32 = vadd.f32 %v1215_v55, %v1107_v13  ;;  %v1367_v54 = vrot.slane %v1333_v11, 1  ;;  %v1368_v21 = vrot.slane %v1334_v56, 1 }
 0x173   : > { %v1370_v2 = vrot.slane %v1335_v17, 1  ;;  %v1371_v53 = vrot.slane %v1336_v51, 1  ;;  %v1562_v44 = vmul.f32 %v4472_v33, %v4541_v31  ;;  %v1563_v26 = vmul.f32 %v4472_v33, %v4550_v60 }
 0x174   : > { %v1224_v59 = vadd.f32 %v1216_v18, %v1108_v25  ;;  %v1369_v48 = vsel %vm767_vm2, %v1367_v54, %v1368_v21  ;;  %v1564_v39 = vmul.f32 %v4472_v33, %v4553_v1  ;;  %v1595_v47 = vrot.slane %v1561_v20, 2 }
 0x175   : > { %v1372_v15 = vsel %vm767_vm2, %v1370_v2, %v1371_v53  ;;  %v1395_v29 = vadd.f32 %v1369_v48, %v1223_v32  ;;  %v1596_v10 = vrot.slane %v1562_v44, 2  ;;  %v1598_v55 = vrot.slane %v1563_v26, 2 }
 0x176   : > { %v1396_v13 = vadd.f32 %v1372_v15, %v1224_v59  ;;  %v1599_v11 = vrot.slane %v1564_v39, 2  ;;  %v1731_v56 = vmul.f32 %v4476_v34, %v4550_v60  ;;  %v1732_v30 = vmul.f32 %v4476_v34, %v4558_v6 }
 0x177   : > { %v1597_v18 = vsel %vm996_vm3, %v1595_v47, %v1596_v10  ;;  %v1849_v17 = vmul.f32 %v4481_v37, %v4550_v60  ;;  %v1850_v51 = vmul.f32 %v4481_v37, %v4553_v1  ;;  %v1851_v20 = vmul.f32 %v4481_v37, %v4558_v6 }
 0x178   : > { %v1600_v25 = vsel %vm996_vm3, %v1598_v55, %v1599_v11  ;;  %v1623_v32 = vadd.f32 %v1597_v18, %v1395_v29  ;;  %v1852_v54 = vmul.f32 %v4481_v37, %v4561_v7  ;;  %v2077_v21 = vmul.f32 %v4609_v49, %v4550_v60 }
 0x179   : > { %v1624_v2 = vadd.f32 %v1600_v25, %v1396_v13  ;;  %v1883_v53 = vrot.slane %v1849_v17, 1  ;;  %v1884_v44 = vrot.slane %v1850_v51, 1  ;;  %v1886_v26 = vrot.slane %v1851_v20, 1 }
 0x17a   : > { %v1739_v59 = vadd.f32 %v1731_v56, %v1623_v32  ;;  %v1887_v48 = vrot.slane %v1852_v54, 1  ;;  %v2078_v39 = vmul.f32 %v4609_v49, %v4553_v1  ;;  %v2079_v47 = vmul.f32 %v4609_v49, %v4558_v6 }
 0x17b   : > { %v1740_v15 = vadd.f32 %v1732_v30, %v1624_v2  ;;  %v1885_v29 = vsel %vm767_vm2, %v1883_v53, %v1884_v44  ;;  %v2080_v10 = vmul.f32 %v4609_v49, %v4561_v7  ;;  %v2111_v55 = vrot.slane %v2077_v21, 2 }
 0x17c   : > { %v1888_v13 = vsel %vm767_vm2, %v1886_v26, %v1887_v48  ;;  %v1911_v11 = vadd.f32 %v1885_v29, %v1739_v59  ;;  %v2112_v18 = vrot.slane %v2078_v39, 2  ;;  %v2114_v17 = vrot.slane %v2079_v47, 2 }
 0x17d   : > { %v1912_v56 = vadd.f32 %v1888_v13, %v1740_v15  ;;  %v2115_v51 = vrot.slane %v2080_v10, 2  ;;  %v724_v20 = vmul.f32 %v4420_v35, %v4508_v50  ;;  %v890_v25 = vmul.f32 %v4393_v8, %v4508_v50 }
 0x17e   : > { %v2113_v30 = vsel %vm996_vm3, %v2111_v55, %v2112_v18  ;;  %v891_v32 = vmul.f32 %v4393_v8, %v4511_v52  ;;  %v1119_v54 = vmul.f32 %v4409_v24, %v4508_v50  ;;  %v1120_v21 = vmul.f32 %v4409_v24, %v4511_v52 }
 0x17f   : > { %v2116_v2 = vsel %vm996_vm3, %v2114_v17, %v2115_v51  ;;  %v2139_v53 = vadd.f32 %v2113_v30, %v1911_v11  ;;  %v923_v44 = vrot.slane %v890_v25, 1  ;;  %v1233_v26 = vmul.f32 %v4485_v40, %v4508_v50 }
 0x180   : > { %v2140_v59 = vadd.f32 %v2116_v2, %v1912_v56  ;;  %v924_v48 = vrot.slane %v891_v32, 1  ;;  %v1152_v39 = vrot.slane %v1119_v54, 2  ;;  %v1153_v47 = vrot.slane %v1120_v21, 2  ;;  %v4050_v56 = vld [vmem:[%s6070_s5] sm:$0xff]  }
 0x181   : > { %v2243_v15 = vadd.f32 %v4639_v16, %v2139_v53  ;;  %v1234_v29 = vmul.f32 %v4485_v40, %v4530_v22  ;;  %v1241_v10 = vadd.f32 %v1233_v26, %v4488_v42  ;;  %v1405_v55 = vmul.f32 %v4492_v43, %v4508_v50  ;;  %v4051_v42 = vld [vmem:[%s6070_s5 + $0x8] sm:$0xff]   ;;  %3842 = vmatprep.subr.bf16.mxu0 %v4050_v56 }
 0x182   : > { %v2244_v13 = vadd.f32 %v4639_v16, %v2140_v59  ;;  %v925_v11 = vsel %vm767_vm2, %v923_v44, %v924_v48  ;;  %v1154_v18 = vsel %vm996_vm3, %v1152_v39, %v1153_v47  ;;  %v1406_v17 = vmul.f32 %v4492_v43, %v4511_v52  ;;  %3843 = vmatpush3.bf16.msra.mxu0 %v4050_v56 }
 0x183   : > { %v953_v51 = vadd.f32 %v925_v11, %v724_v20  ;;  %v1407_v25 = vmul.f32 %v4492_v43, %v4530_v22  ;;  %v1408_v30 = vmul.f32 %v4492_v43, %v4533_v23  ;;  %v1437_v32 = vrot.slane %v1405_v55, 1  ;;  %3844 = vmatprep.subr.bf16.mxu0 %v4051_v42  ;;  %v4052_v55 = vld [vmem:[%s6070_s5 + $0x10] sm:$0xff]  }
 0x184   : > { %v3995_v54 = vpack.i.bf16 %v2244_v13, %v2243_v15  ;;  %v1438_v21 = vrot.slane %v1406_v17, 1  ;;  %v1633_v2 = vmul.f32 %v4497_v61, %v4508_v50  ;;  %v1634_v53 = vmul.f32 %v4497_v61, %v4511_v52  ;;  %v4767_v13 = vld [vmem:[%s6068_s3 + $0x28] ss:$0 sm:$0xff] }
 0x185   : > { %v1182_v44 = vadd.f32 %v1154_v18, %v953_v51  ;;  %v1440_v26 = vrot.slane %v1407_v25, 1  ;;  %v1441_v59 = vrot.slane %v1408_v30, 1  ;;  %v1635_v20 = vmul.f32 %v4497_v61, %v4530_v22 }
 0x186   : > { %3996 = vrot.lane.b32.xlu1 %v3995_v54, %s4195_s25  ;;  %v1439_v48 = vsel %vm767_vm2, %v1437_v32, %v1438_v21  ;;  %v1636_v39 = vmul.f32 %v4497_v61, %v4533_v23  ;;  %v1665_v47 = vrot.slane %v1633_v2, 2  ;;  %v1666_v15 = vrot.slane %v1634_v53, 2  ;;  %3845 = vmatpush3.bf16.msra.mxu0 %v4051_v42 }
 0x187   : > { %v1242_v11 = vadd.f32 %v1234_v29, %v1182_v44  ;;  %v1442_v18 = vsel %vm767_vm2, %v1440_v26, %v1441_v59  ;;  %v1469_v17 = vadd.f32 %v1439_v48, %v1241_v10  ;;  %v1668_v56 = vrot.slane %v1635_v20, 2  ;;  %3846 = vmatprep.subr.bf16.mxu0 %v4052_v55 }
 0x188   : > { %v1667_v51 = vsel %vm996_vm3, %v1665_v47, %v1666_v15  ;;  %v1669_v25 = vrot.slane %v1636_v39, 2  ;;  %v1749_v30 = vmul.f32 %v4501_v45, %v4530_v22  ;;  %v1750_v32 = vmul.f32 %v4501_v45, %v4538_v57 }
 0x189   : > { %v1470_v54 = vadd.f32 %v1442_v18, %v1242_v11  ;;  %v1697_v21 = vadd.f32 %v1667_v51, %v1469_v17  ;;  %v1921_v2 = vmul.f32 %v4505_v46, %v4530_v22  ;;  %v1922_v29 = vmul.f32 %v4505_v46, %v4533_v23 }
 0x18a   : > { %v1670_v10 = vsel %vm996_vm3, %v1668_v56, %v1669_v25  ;;  %v1923_v53 = vmul.f32 %v4505_v46, %v4538_v57  ;;  %v1924_v44 = vmul.f32 %v4505_v46, %v4541_v31  ;;  %v2149_v26 = vmul.f32 %v4767_v13, %v4530_v22  ;;  %3847 = vmatpush3.bf16.msra.mxu0 %v4052_v55 }
 0x18b   : > { %v1698_v59 = vadd.f32 %v1670_v10, %v1470_v54  ;;  %v1757_v20 = vadd.f32 %v1749_v30, %v1697_v21  ;;  %v1953_v48 = vrot.slane %v1921_v2, 1  ;;  %v1954_v39 = vrot.slane %v1922_v29, 1 }
 0x18c   : > { %v1956_v47 = vrot.slane %v1923_v53, 1  ;;  %v1957_v15 = vrot.slane %v1924_v44, 1  ;;  %v2150_v42 = vmul.f32 %v4767_v13, %v4533_v23  ;;  %v2151_v11 = vmul.f32 %v4767_v13, %v4538_v57  ;;  %v4801_v53 = vld [vmem:[%s6069_s4 + $0x2] ss:$0 sm:$0xff] }
 0x18d   : > { %v1758_v18 = vadd.f32 %v1750_v32, %v1698_v59  ;;  %v1955_v17 = vsel %vm767_vm2, %v1953_v48, %v1954_v39  ;;  %v2152_v56 = vmul.f32 %v4767_v13, %v4541_v31  ;;  %v2181_v51 = vrot.slane %v2149_v26, 2 }
 0x18e   : > { %v1958_v25 = vsel %vm767_vm2, %v1956_v47, %v1957_v15  ;;  %v1985_v30 = vadd.f32 %v1955_v17, %v1757_v20  ;;  %v2182_v54 = vrot.slane %v2150_v42, 2  ;;  %v2184_v21 = vrot.slane %v2151_v11, 2 }
 0x18f   : > { %v1986_v2 = vadd.f32 %v1958_v25, %v1758_v18  ;;  %v2185_v29 = vrot.slane %v2152_v56, 2  ;;  %v715_v10 = vmul.f32 %v4397_v12, %v4550_v60  ;;  %v716_v32 = vmul.f32 %v4397_v12, %v4558_v6 }
 0x190   : > { %v2183_v55 = vsel %vm996_vm3, %v2181_v51, %v2182_v54  ;;  %v820_v44 = vmul.f32 %v4368_v62, %v4550_v60  ;;  %v821_v26 = vmul.f32 %v4368_v62, %v4553_v1  ;;  %v822_v59 = vmul.f32 %v4368_v62, %v4558_v6 }
 0x191   : > { %v2186_v20 = vsel %vm996_vm3, %v2184_v21, %v2185_v29  ;;  %v2213_v48 = vadd.f32 %v2183_v55, %v1985_v30  ;;  %v823_v39 = vmul.f32 %v4368_v62, %v4561_v7  ;;  %v1049_v47 = vmul.f32 %v4401_v14, %v4550_v60 }
 0x192   : > { %v2214_v15 = vadd.f32 %v2186_v20, %v1986_v2  ;;  %v856_v42 = vrot.slane %v820_v44, 1  ;;  %v857_v11 = vrot.slane %v821_v26, 1  ;;  %v859_v18 = vrot.slane %v822_v59, 1 }
 0x193   : > { %v2255_v17 = vadd.f32 %v4801_v53, %v2213_v48  ;;  %v860_v56 = vrot.slane %v823_v39, 1  ;;  %v1050_v51 = vmul.f32 %v4401_v14, %v4553_v1  ;;  %v1051_v25 = vmul.f32 %v4401_v14, %v4558_v6 }
 0x194   : > { %v2256_v30 = vadd.f32 %v4801_v53, %v2214_v15  ;;  %v858_v54 = vsel %vm767_vm2, %v856_v42, %v857_v11  ;;  %v1052_v21 = vmul.f32 %v4401_v14, %v4561_v7  ;;  %v1085_v2 = vrot.slane %v1049_v47, 2 }
 0x195   : > { %v861_v29 = vsel %vm767_vm2, %v859_v18, %v860_v56  ;;  %v880_v55 = vadd.f32 %v858_v54, %v715_v10  ;;  %v1086_v44 = vrot.slane %v1050_v51, 2  ;;  %v1088_v26 = vrot.slane %v1051_v25, 2 }
 0x196   : > { %v4000_v59 = vpack.i.bf16 %v2256_v30, %v2255_v17  ;;  %v881_v20 = vadd.f32 %v861_v29, %v716_v32  ;;  %v1089_v48 = vrot.slane %v1052_v21, 2  ;;  %v1217_v39 = vmul.f32 %v4459_v19, %v4558_v6 }
 0x197   : > { %v1087_v52 = vsel %vm996_vm3, %v1085_v2, %v1086_v44  ;;  %v1218_v15 = vmul.f32 %v4459_v19, %v4573_v36  ;;  %v1337_v42 = vmul.f32 %v4465_v27, %v4558_v6  ;;  %v1338_v47 = vmul.f32 %v4465_v27, %v4561_v7 }
 0x198   : > { %4001 = vrot.lane.b32.xlu1 %v4000_v59, %s4196_s26  ;;  %v1090_v10 = vsel %vm996_vm3, %v1088_v26, %v1089_v48  ;;  %v1109_v32 = vadd.f32 %v1087_v52, %v880_v55  ;;  %v1339_v11 = vmul.f32 %v4465_v27, %v4573_v36  ;;  %v1340_v18 = vmul.f32 %v4465_v27, %v4576_v38  ;;  %v4053_v26 = vld [vmem:[%s6070_s5 + $0x18] sm:$0xff]  }
 0x199   : > { %v1110_v17 = vadd.f32 %v1090_v10, %v881_v20  ;;  %v1373_v56 = vrot.slane %v1337_v42, 1  ;;  %v1374_v51 = vrot.slane %v1338_v47, 1  ;;  %v1565_v25 = vmul.f32 %v4472_v33, %v4558_v6  ;;  %3848 = vmatprep.subr.bf16.mxu0 %v4053_v26 }
 0x19a   : > { %v1225_v30 = vadd.f32 %v1217_v39, %v1109_v32  ;;  %v1376_v54 = vrot.slane %v1339_v11, 1  ;;  %v1377_v21 = vrot.slane %v1340_v18, 1  ;;  %v1566_v2 = vmul.f32 %v4472_v33, %v4561_v7  ;;  %3849 = vmatpush3.bf16.msra.mxu0 %v4053_v26 }
 0x19b   : > { %v1226_v29 = vadd.f32 %v1218_v15, %v1110_v17  ;;  %v1375_v52 = vsel %vm767_vm2, %v1373_v56, %v1374_v51  ;;  %v1567_v55 = vmul.f32 %v4472_v33, %v4573_v36  ;;  %v1568_v44 = vmul.f32 %v4472_v33, %v4576_v38 }
 0x19c   : > { %v1378_v59 = vsel %vm767_vm2, %v1376_v54, %v1377_v21  ;;  %v1397_v20 = vadd.f32 %v1375_v52, %v1225_v30  ;;  %v1601_v48 = vrot.slane %v1565_v25, 2  ;;  %v1602_v39 = vrot.slane %v1566_v2, 2 }
 0x19d   : > { %v1398_v42 = vadd.f32 %v1378_v59, %v1226_v29  ;;  %v1604_v47 = vrot.slane %v1567_v55, 2  ;;  %v1605_v15 = vrot.slane %v1568_v44, 2  ;;  %v1733_v10 = vmul.f32 %v4476_v34, %v4573_v36 }
 0x19e   : > { %v1603_v32 = vsel %vm996_vm3, %v1601_v48, %v1602_v39  ;;  %v1734_v11 = vmul.f32 %v4476_v34, %v4580_v28  ;;  %v1853_v18 = vmul.f32 %v4481_v37, %v4573_v36  ;;  %v1854_v17 = vmul.f32 %v4481_v37, %v4576_v38 }
 0x19f   : > { %v1606_v56 = vsel %vm996_vm3, %v1604_v47, %v1605_v15  ;;  %v1625_v51 = vadd.f32 %v1603_v32, %v1397_v20  ;;  %v1855_v25 = vmul.f32 %v4481_v37, %v4580_v28  ;;  %v1856_v30 = vmul.f32 %v4481_v37, %v4583_v41 }
 0x1a0   : > { %v1626_v54 = vadd.f32 %v1606_v56, %v1398_v42  ;;  %v1889_v21 = vrot.slane %v1853_v18, 1  ;;  %v1890_v2 = vrot.slane %v1854_v17, 1  ;;  %v2081_v29 = vmul.f32 %v4609_v49, %v4573_v36 }
 0x1a1   : > { %v1741_v52 = vadd.f32 %v1733_v10, %v1625_v51  ;;  %v1892_v55 = vrot.slane %v1855_v25, 1  ;;  %v1893_v44 = vrot.slane %v1856_v30, 1  ;;  %v2082_v26 = vmul.f32 %v4609_v49, %v4576_v38 }
 0x1a2   : > { %v1742_v59 = vadd.f32 %v1734_v11, %v1626_v54  ;;  %v1891_v20 = vsel %vm767_vm2, %v1889_v21, %v1890_v2  ;;  %v2083_v48 = vmul.f32 %v4609_v49, %v4580_v28  ;;  %v2084_v39 = vmul.f32 %v4609_v49, %v4583_v41 }
 0x1a3   : > { %v1894_v42 = vsel %vm767_vm2, %v1892_v55, %v1893_v44  ;;  %v1913_v47 = vadd.f32 %v1891_v20, %v1741_v52  ;;  %v2117_v15 = vrot.slane %v2081_v29, 2  ;;  %v2118_v32 = vrot.slane %v2082_v26, 2 }
 0x1a4   : > { %v1914_v10 = vadd.f32 %v1894_v42, %v1742_v59  ;;  %v2120_v18 = vrot.slane %v2083_v48, 2  ;;  %v2121_v17 = vrot.slane %v2084_v39, 2  ;;  %v725_v56 = vmul.f32 %v4420_v35, %v4530_v22 }
 0x1a5   : > { %v2119_v11 = vsel %vm996_vm3, %v2117_v15, %v2118_v32  ;;  %v726_v51 = vmul.f32 %v4420_v35, %v4538_v57  ;;  %v892_v25 = vmul.f32 %v4393_v8, %v4530_v22  ;;  %v893_v49 = vmul.f32 %v4393_v8, %v4533_v23 }
 0x1a6   : > { %v2122_v30 = vsel %vm996_vm3, %v2120_v18, %v2121_v17  ;;  %v2141_v54 = vadd.f32 %v2119_v11, %v1913_v47  ;;  %v894_v21 = vmul.f32 %v4393_v8, %v4538_v57  ;;  %v895_v2 = vmul.f32 %v4393_v8, %v4541_v31 }
 0x1a7   : > { %v2142_v29 = vadd.f32 %v2122_v30, %v1914_v10  ;;  %v926_v52 = vrot.slane %v892_v25, 1  ;;  %v927_v55 = vrot.slane %v893_v49, 1  ;;  %v1121_v44 = vmul.f32 %v4409_v24, %v4530_v22 }
 0x1a8   : > { %v2245_v26 = vadd.f32 %v4639_v16, %v2141_v54  ;;  %v929_v59 = vrot.slane %v894_v21, 1  ;;  %v930_v20 = vrot.slane %v895_v2, 1  ;;  %v1122_v48 = vmul.f32 %v4409_v24, %v4533_v23 }
 0x1a9   : > { %v2246_v39 = vadd.f32 %v4639_v16, %v2142_v29  ;;  %v928_v42 = vsel %vm767_vm2, %v926_v52, %v927_v55  ;;  %v1123_v47 = vmul.f32 %v4409_v24, %v4538_v57  ;;  %v1124_v15 = vmul.f32 %v4409_v24, %v4541_v31 }
 0x1aa   : > { %v931_v32 = vsel %vm767_vm2, %v929_v59, %v930_v20  ;;  %v954_v10 = vadd.f32 %v928_v42, %v725_v56  ;;  %v1155_v18 = vrot.slane %v1121_v44, 2  ;;  %v1156_v17 = vrot.slane %v1122_v48, 2  ;;  %v4054_v20 = vld [vmem:[%s6070_s5 + $0x20] sm:$0xff]  }
 0x1ab   : > { %v4010_v11 = vpack.i.bf16 %v2246_v39, %v2245_v26  ;;  %v955_v25 = vadd.f32 %v931_v32, %v726_v51  ;;  %v1158_v49 = vrot.slane %v1123_v47, 2  ;;  %v1159_v30 = vrot.slane %v1124_v15, 2  ;;  %3850 = vmatprep.subr.bf16.mxu0 %v4054_v20 }
 0x1ac   : > { %v1157_v54 = vsel %vm996_vm3, %v1155_v18, %v1156_v17  ;;  %v1235_v16 = vmul.f32 %v4485_v40, %v4538_v57  ;;  %v1236_v21 = vmul.f32 %v4485_v40, %v4550_v60  ;;  %v1409_v2 = vmul.f32 %v4492_v43, %v4538_v57  ;;  %3851 = vmatpush3.bf16.msra.mxu0 %v4054_v20 }
 0x1ad   : > { %4011 = vrot.lane.b32.xlu0 %v4010_v11, %s4195_s25  ;;  %v1160_v56 = vsel %vm996_vm3, %v1158_v49, %v1159_v30  ;;  %v1183_v29 = vadd.f32 %v1157_v54, %v954_v10  ;;  %v1410_v51 = vmul.f32 %v4492_v43, %v4541_v31  ;;  %v1411_v52 = vmul.f32 %v4492_v43, %v4550_v60 }
 0x1ae   : > { %v1184_v55 = vadd.f32 %v1160_v56, %v955_v25  ;;  %v1412_v44 = vmul.f32 %v4492_v43, %v4553_v1  ;;  %v1443_v26 = vrot.slane %v1409_v2, 1  ;;  %v1637_v59 = vmul.f32 %v4497_v61, %v4538_v57 }
 0x1af   : > { %v1243_v48 = vadd.f32 %v1235_v16, %v1183_v29  ;;  %v1444_v39 = vrot.slane %v1410_v51, 1  ;;  %v1446_v42 = vrot.slane %v1411_v52, 1  ;;  %v1638_v47 = vmul.f32 %v4497_v61, %v4541_v31 }
 0x1b0   : > { %v1244_v15 = vadd.f32 %v1236_v21, %v1184_v55  ;;  %v1447_v32 = vrot.slane %v1412_v44, 1  ;;  %v1639_v10 = vmul.f32 %v4497_v61, %v4550_v60  ;;  %v1640_v18 = vmul.f32 %v4497_v61, %v4553_v1 }
 0x1b1   : > { %v1445_v17 = vsel %vm767_vm2, %v1443_v26, %v1444_v39  ;;  %v1671_v11 = vrot.slane %v1637_v59, 2  ;;  %v1672_v25 = vrot.slane %v1638_v47, 2  ;;  %v1751_v49 = vmul.f32 %v4501_v45, %v4550_v60 }
 0x1b2   : > { %v1448_v30 = vsel %vm767_vm2, %v1446_v42, %v1447_v32  ;;  %v1471_v54 = vadd.f32 %v1445_v17, %v1243_v48  ;;  %v1674_v16 = vrot.slane %v1639_v10, 2  ;;  %v1675_v21 = vrot.slane %v1640_v18, 2 }
 0x1b3   : > { %v1472_v2 = vadd.f32 %v1448_v30, %v1244_v15  ;;  %v1673_v56 = vsel %vm996_vm3, %v1671_v11, %v1672_v25  ;;  %v1752_v29 = vmul.f32 %v4501_v45, %v4558_v6  ;;  %v1925_v51 = vmul.f32 %v4505_v46, %v4550_v60 }
 0x1b4   : > { %v1676_v52 = vsel %vm996_vm3, %v1674_v16, %v1675_v21  ;;  %v1699_v55 = vadd.f32 %v1673_v56, %v1471_v54  ;;  %v1926_v44 = vmul.f32 %v4505_v46, %v4553_v1  ;;  %v1927_v26 = vmul.f32 %v4505_v46, %v4558_v6 }
 0x1b5   : > { %v1700_v59 = vadd.f32 %v1676_v52, %v1472_v2  ;;  %v1928_v20 = vmul.f32 %v4505_v46, %v4561_v7  ;;  %v1959_v48 = vrot.slane %v1925_v51, 1  ;;  %v2153_v39 = vmul.f32 %v4767_v13, %v4550_v60 }
 0x1b6   : > { %v1759_v42 = vadd.f32 %v1751_v49, %v1699_v55  ;;  %v1960_v47 = vrot.slane %v1926_v44, 1  ;;  %v1962_v15 = vrot.slane %v1927_v26, 1  ;;  %v2154_v32 = vmul.f32 %v4767_v13, %v4553_v1 }
 0x1b7   : > { %v1760_v10 = vadd.f32 %v1752_v29, %v1700_v59  ;;  %v1963_v18 = vrot.slane %v1928_v20, 1  ;;  %v2155_v17 = vmul.f32 %v4767_v13, %v4558_v6  ;;  %v2156_v11 = vmul.f32 %v4767_v13, %v4561_v7 }
 0x1b8   : > { %v1961_v25 = vsel %vm767_vm2, %v1959_v48, %v1960_v47  ;;  %v2187_v30 = vrot.slane %v2153_v39, 2  ;;  %v2188_v54 = vrot.slane %v2154_v32, 2  ;;  %v727_v49 = vmul.f32 %v4420_v35, %v4550_v60 }
 0x1b9   : > { %v1964_v16 = vsel %vm767_vm2, %v1962_v15, %v1963_v18  ;;  %v1987_v21 = vadd.f32 %v1961_v25, %v1759_v42  ;;  %v2190_v2 = vrot.slane %v2155_v17, 2  ;;  %v2191_v56 = vrot.slane %v2156_v11, 2 }
 0x1ba   : > { %v1988_v29 = vadd.f32 %v1964_v16, %v1760_v10  ;;  %v2189_v51 = vsel %vm996_vm3, %v2187_v30, %v2188_v54  ;;  %v728_v52 = vmul.f32 %v4420_v35, %v4558_v6  ;;  %v896_v55 = vmul.f32 %v4393_v8, %v4550_v60 }
 0x1bb   : > { %v2192_v44 = vsel %vm996_vm3, %v2190_v2, %v2191_v56  ;;  %v2215_v26 = vadd.f32 %v2189_v51, %v1987_v21  ;;  %v897_v59 = vmul.f32 %v4393_v8, %v4553_v1  ;;  %v898_v20 = vmul.f32 %v4393_v8, %v4558_v6 }
 0x1bc   : > { %v2216_v48 = vadd.f32 %v2192_v44, %v1988_v29  ;;  %v899_v39 = vmul.f32 %v4393_v8, %v4561_v7  ;;  %v932_v42 = vrot.slane %v896_v55, 1  ;;  %v1125_v47 = vmul.f32 %v4409_v24, %v4550_v60 }
 0x1bd   : > { %v2257_v15 = vadd.f32 %v4801_v53, %v2215_v26  ;;  %v933_v32 = vrot.slane %v897_v59, 1  ;;  %v935_v10 = vrot.slane %v898_v20, 1  ;;  %v1126_v18 = vmul.f32 %v4409_v24, %v4553_v1 }
 0x1be   : > { %v2258_v17 = vadd.f32 %v4801_v53, %v2216_v48  ;;  %v936_v11 = vrot.slane %v899_v39, 1  ;;  %v1127_v25 = vmul.f32 %v4409_v24, %v4558_v6  ;;  %v1128_v30 = vmul.f32 %v4409_v24, %v4561_v7 }
 0x1bf   : > { %v934_v54 = vsel %vm767_vm2, %v932_v42, %v933_v32  ;;  %v1161_v16 = vrot.slane %v1125_v47, 2  ;;  %v1162_v21 = vrot.slane %v1126_v18, 2  ;;  %v1237_v2 = vmul.f32 %v4485_v40, %v4558_v6 }
 0x1c0   : > { %v4005_v56 = vpack.i.bf16 %v2258_v17, %v2257_v15  ;;  %v937_v29 = vsel %vm767_vm2, %v935_v10, %v936_v11  ;;  %v956_v51 = vadd.f32 %v934_v54, %v727_v49  ;;  %v1164_v55 = vrot.slane %v1127_v25, 2 }
 0x1c1   : > { %v957_v44 = vadd.f32 %v937_v29, %v728_v52  ;;  %v1163_v26 = vsel %vm996_vm3, %v1161_v16, %v1162_v21  ;;  %v1165_v59 = vrot.slane %v1128_v30, 2  ;;  %v1238_v20 = vmul.f32 %v4485_v40, %v4573_v36 }
 0x1c2   : > { %4006 = vrot.lane.b32.xlu1 %v4005_v56, %s4196_s26  ;;  %v1185_v48 = vadd.f32 %v1163_v26, %v956_v51  ;;  %v1413_v39 = vmul.f32 %v4492_v43, %v4558_v6  ;;  %v1414_v42 = vmul.f32 %v4492_v43, %v4561_v7  ;;  %v1415_v49 = vmul.f32 %v4492_v43, %v4573_v36 }
 0x1c3   : > { %v1166_v52 = vsel %vm996_vm3, %v1164_v55, %v1165_v59  ;;  %v1416_v47 = vmul.f32 %v4492_v43, %v4576_v38  ;;  %v1641_v15 = vmul.f32 %v4497_v61, %v4558_v6  ;;  %v1642_v32 = vmul.f32 %v4497_v61, %v4561_v7 }
 0x1c4   : > { %v1186_v10 = vadd.f32 %v1166_v52, %v957_v44  ;;  %v1245_v18 = vadd.f32 %v1237_v2, %v1185_v48  ;;  %v1449_v17 = vrot.slane %v1413_v39, 1  ;;  %v1450_v11 = vrot.slane %v1414_v42, 1 }
 0x1c5   : > { %v1452_v25 = vrot.slane %v1415_v49, 1  ;;  %v1453_v30 = vrot.slane %v1416_v47, 1  ;;  %v1643_v54 = vmul.f32 %v4497_v61, %v4573_v36  ;;  %v1644_v16 = vmul.f32 %v4497_v61, %v4576_v38 }
 0x1c6   : > { %v1246_v21 = vadd.f32 %v1238_v20, %v1186_v10  ;;  %v1451_v56 = vsel %vm767_vm2, %v1449_v17, %v1450_v11  ;;  %v1677_v29 = vrot.slane %v1641_v15, 2  ;;  %v1678_v51 = vrot.slane %v1642_v32, 2 }
 0x1c7   : > { %v1454_v55 = vsel %vm767_vm2, %v1452_v25, %v1453_v30  ;;  %v1473_v26 = vadd.f32 %v1451_v56, %v1245_v18  ;;  %v1680_v44 = vrot.slane %v1643_v54, 2  ;;  %v1681_v2 = vrot.slane %v1644_v16, 2 }
 0x1c8   : > { %v1474_v59 = vadd.f32 %v1454_v55, %v1246_v21  ;;  %v1679_v48 = vsel %vm996_vm3, %v1677_v29, %v1678_v51  ;;  %v1753_v39 = vmul.f32 %v4501_v45, %v4573_v36  ;;  %v1754_v42 = vmul.f32 %v4501_v45, %v4580_v28 }
 0x1c9   : > { %v1682_v20 = vsel %vm996_vm3, %v1680_v44, %v1681_v2  ;;  %v1701_v49 = vadd.f32 %v1679_v48, %v1473_v26  ;;  %v1929_v52 = vmul.f32 %v4505_v46, %v4573_v36  ;;  %v1930_v47 = vmul.f32 %v4505_v46, %v4576_v38 }
 0x1ca   : > { %v1702_v15 = vadd.f32 %v1682_v20, %v1474_v59  ;;  %v1931_v32 = vmul.f32 %v4505_v46, %v4580_v28  ;;  %v1932_v10 = vmul.f32 %v4505_v46, %v4583_v41  ;;  %v2157_v18 = vmul.f32 %v4767_v13, %v4573_v36 }
 0x1cb   : > { %v1761_v17 = vadd.f32 %v1753_v39, %v1701_v49  ;;  %v1965_v11 = vrot.slane %v1929_v52, 1  ;;  %v1966_v25 = vrot.slane %v1930_v47, 1  ;;  %v2158_v30 = vmul.f32 %v4767_v13, %v4576_v38  ;;  %v4055_v39 = vld [vmem:[%s6070_s5 + $0x28] sm:$0xff]  }
 0x1cc   : > { %v1762_v54 = vadd.f32 %v1754_v42, %v1702_v15  ;;  %v1968_v16 = vrot.slane %v1931_v32, 1  ;;  %v1969_v21 = vrot.slane %v1932_v10, 1  ;;  %v2159_v56 = vmul.f32 %v4767_v13, %v4580_v28  ;;  %3852 = vmatprep.subr.bf16.mxu0 %v4055_v39 }
 0x1cd   : > { %v1967_v29 = vsel %vm767_vm2, %v1965_v11, %v1966_v25  ;;  %v2160_v51 = vmul.f32 %v4767_v13, %v4583_v41  ;;  %v2193_v55 = vrot.slane %v2157_v18, 2  ;;  %v2194_v26 = vrot.slane %v2158_v30, 2  ;;  %3853 = vmatpush3.bf16.msra.mxu0 %v4055_v39 }
 0x1ce   : > { %v1970_v44 = vsel %vm767_vm2, %v1968_v16, %v1969_v21  ;;  %v1989_v2 = vadd.f32 %v1967_v29, %v1761_v17  ;;  %v2196_v59 = vrot.slane %v2159_v56, 2  ;;  %v717_v48 = vmul.f32 %v4397_v12, %v4573_v36 }
 0x1cf   : > { %v1990_v42 = vadd.f32 %v1970_v44, %v1762_v54  ;;  %v2195_v20 = vsel %vm996_vm3, %v2193_v55, %v2194_v26  ;;  %v2197_v49 = vrot.slane %v2160_v51, 2  ;;  %v718_v52 = vmul.f32 %v4397_v12, %v4580_v28 }
 0x1d0   : > { %v2217_v47 = vadd.f32 %v2195_v20, %v1989_v2  ;;  %v824_v15 = vmul.f32 %v4368_v62, %v4573_v36  ;;  %v825_v32 = vmul.f32 %v4368_v62, %v4576_v38  ;;  %v826_v10 = vmul.f32 %v4368_v62, %v4580_v28 }
 0x1d1   : > { %v2198_v18 = vsel %vm996_vm3, %v2196_v59, %v2197_v49  ;;  %v827_v17 = vmul.f32 %v4368_v62, %v4583_v41  ;;  %v1053_v11 = vmul.f32 %v4401_v14, %v4573_v36  ;;  %v1054_v12 = vmul.f32 %v4401_v14, %v4576_v38 }
 0x1d2   : > { %v2218_v25 = vadd.f32 %v2198_v18, %v1990_v42  ;;  %v2259_v30 = vadd.f32 %v4801_v53, %v2217_v47  ;;  %v862_v54 = vrot.slane %v824_v15, 1  ;;  %v863_v16 = vrot.slane %v825_v32, 1 }
 0x1d3   : > { %v865_v21 = vrot.slane %v826_v10, 1  ;;  %v866_v56 = vrot.slane %v827_v17, 1  ;;  %v1055_v29 = vmul.f32 %v4401_v14, %v4580_v28  ;;  %v1056_v62 = vmul.f32 %v4401_v14, %v4583_v41 }
 0x1d4   : > { %v2260_v51 = vadd.f32 %v4801_v53, %v2218_v25  ;;  %v864_v55 = vsel %vm767_vm2, %v862_v54, %v863_v16  ;;  %v1091_v26 = vrot.slane %v1053_v11, 2  ;;  %v1092_v44 = vrot.slane %v1054_v12, 2 }
 0x1d5   : > { %v867_v2 = vsel %vm767_vm2, %v865_v21, %v866_v56  ;;  %v882_v59 = vadd.f32 %v864_v55, %v717_v48  ;;  %v1094_v39 = vrot.slane %v1055_v29, 2  ;;  %v1095_v42 = vrot.slane %v1056_v62, 2 }
 0x1d6   : > { %v4020_v20 = vpack.i.bf16 %v2260_v51, %v2259_v30  ;;  %v883_v49 = vadd.f32 %v867_v2, %v718_v52  ;;  %v1093_v47 = vsel %vm996_vm3, %v1091_v26, %v1092_v44  ;;  %v1219_v15 = vmul.f32 %v4459_v19, %v4580_v28 }
 0x1d7   : > { %v1096_v14 = vsel %vm996_vm3, %v1094_v39, %v1095_v42  ;;  %v1111_v32 = vadd.f32 %v1093_v47, %v882_v59  ;;  %v1220_v10 = vmul.f32 %v4459_v19, %v4596_v4  ;;  %v1341_v18 = vmul.f32 %v4465_v27, %v4580_v28 }
 0x1d8   : > { %4021 = vrot.lane.b32.xlu0 %v4020_v20, %s4196_s26  ;;  %v1112_v48 = vadd.f32 %v1096_v14, %v883_v49  ;;  %v1342_v52 = vmul.f32 %v4465_v27, %v4583_v41  ;;  %v1343_v17 = vmul.f32 %v4465_v27, %v4596_v4  ;;  %v1344_v11 = vmul.f32 %v4465_v27, %v4599_v9 }
 0x1d9   : > { %v1227_v12 = vadd.f32 %v1219_v15, %v1111_v32  ;;  %v1379_v25 = vrot.slane %v1341_v18, 1  ;;  %v1569_v19 = vmul.f32 %v4472_v33, %v4580_v28  ;;  %v1570_v30 = vmul.f32 %v4472_v33, %v4583_v41 }
 0x1da   : > { %v1228_v54 = vadd.f32 %v1220_v10, %v1112_v48  ;;  %v1380_v16 = vrot.slane %v1342_v52, 1  ;;  %v1382_v21 = vrot.slane %v1343_v17, 1  ;;  %v1383_v56 = vrot.slane %v1344_v11, 1 }
 0x1db   : > { %v1571_v29 = vmul.f32 %v4472_v33, %v4596_v4  ;;  %v1572_v62 = vmul.f32 %v4472_v33, %v4599_v9  ;;  %v1607_v51 = vrot.slane %v1569_v19, 2  ;;  %v1608_v27 = vrot.slane %v1570_v30, 2 }
 0x1dc   : > { %v1381_v55 = vsel %vm767_vm2, %v1379_v25, %v1380_v16  ;;  %v1384_v26 = vsel %vm767_vm2, %v1382_v21, %v1383_v56  ;;  %v1735_v44 = vmul.f32 %v4476_v34, %v4596_v4  ;;  %v1736_v2 = vmul.f32 %v4476_v34, %v4371_v63  ;;  %v4176_v34 = vld [vmem:[%s6068_s3 + $0x18] ss:$0 sm:$0xff] }
 0x1dd   : > { %v1399_v59 = vadd.f32 %v1381_v55, %v1227_v12  ;;  %v1400_v39 = vadd.f32 %v1384_v26, %v1228_v54  ;;  %v1609_v42 = vsel %vm996_vm3, %v1607_v51, %v1608_v27  ;;  %v1610_v20 = vrot.slane %v1571_v29, 2 }
 0x1de   : > { %v1611_v49 = vrot.slane %v1572_v62, 2  ;;  %v1857_v33 = vmul.f32 %v4481_v37, %v4596_v4  ;;  %v1858_v47 = vmul.f32 %v4481_v37, %v4599_v9  ;;  %v1859_v15 = vmul.f32 %v4481_v37, %v4371_v63 }
 0x1df   : > { %v1627_v14 = vadd.f32 %v1609_v42, %v1399_v59  ;;  %v1860_v32 = vmul.f32 %v4481_v37, %v4374_v0  ;;  %v2085_v10 = vmul.f32 %v4176_v34, %v4596_v4  ;;  %v2086_v18 = vmul.f32 %v4176_v34, %v4599_v9 }
 0x1e0   : > { %v1612_v48 = vsel %vm996_vm3, %v1610_v20, %v1611_v49  ;;  %v1895_v52 = vrot.slane %v1857_v33, 1  ;;  %v1896_v17 = vrot.slane %v1858_v47, 1  ;;  %v1898_v11 = vrot.slane %v1859_v15, 1  ;;  %v4177_v15 = vld [vmem:[%s6069_s4 + $0x1] ss:$0 sm:$0xff] }
 0x1e1   : > { %v1628_v12 = vadd.f32 %v1612_v48, %v1400_v39  ;;  %v1743_v25 = vadd.f32 %v1735_v44, %v1627_v14  ;;  %v1899_v19 = vrot.slane %v1860_v32, 1  ;;  %v2087_v30 = vmul.f32 %v4176_v34, %v4371_v63 }
 0x1e2   : > { %v1897_v37 = vsel %vm767_vm2, %v1895_v52, %v1896_v17  ;;  %v2088_v54 = vmul.f32 %v4176_v34, %v4374_v0  ;;  %v2123_v16 = vrot.slane %v2085_v10, 2  ;;  %v2124_v21 = vrot.slane %v2086_v18, 2 }
 0x1e3   : > { %v1744_v56 = vadd.f32 %v1736_v2, %v1628_v12  ;;  %v1900_v29 = vsel %vm767_vm2, %v1898_v11, %v1899_v19  ;;  %v1915_v62 = vadd.f32 %v1897_v37, %v1743_v25  ;;  %v2126_v51 = vrot.slane %v2087_v30, 2 }
 0x1e4   : > { %v2125_v27 = vsel %vm996_vm3, %v2123_v16, %v2124_v21  ;;  %v2127_v55 = vrot.slane %v2088_v54, 2  ;;  %v729_v26 = vmul.f32 %v4420_v35, %v4573_v36  ;;  %v730_v44 = vmul.f32 %v4420_v35, %v4580_v28 }
 0x1e5   : > { %v1916_v59 = vadd.f32 %v1900_v29, %v1744_v56  ;;  %v2143_v39 = vadd.f32 %v2125_v27, %v1915_v62  ;;  %v900_v42 = vmul.f32 %v4393_v8, %v4573_v36  ;;  %v901_v2 = vmul.f32 %v4393_v8, %v4576_v38 }
 0x1e6   : > { %v2128_v20 = vsel %vm996_vm3, %v2126_v51, %v2127_v55  ;;  %v902_v49 = vmul.f32 %v4393_v8, %v4580_v28  ;;  %v903_v33 = vmul.f32 %v4393_v8, %v4583_v41  ;;  %v1129_v47 = vmul.f32 %v4409_v24, %v4573_v36 }
 0x1e7   : > { %v2144_v35 = vadd.f32 %v2128_v20, %v1916_v59  ;;  %v2247_v14 = vadd.f32 %v4177_v15, %v2143_v39  ;;  %v938_v32 = vrot.slane %v900_v42, 1  ;;  %v939_v34 = vrot.slane %v901_v2, 1 }
 0x1e8   : > { %v941_v10 = vrot.slane %v902_v49, 1  ;;  %v942_v18 = vrot.slane %v903_v33, 1  ;;  %v1130_v48 = vmul.f32 %v4409_v24, %v4576_v38  ;;  %v1131_v52 = vmul.f32 %v4409_v24, %v4580_v28 }
 0x1e9   : > { %v2248_v8 = vadd.f32 %v4177_v15, %v2144_v35  ;;  %v940_v17 = vsel %vm767_vm2, %v938_v32, %v939_v34  ;;  %v1132_v11 = vmul.f32 %v4409_v24, %v4583_v41  ;;  %v1167_v12 = vrot.slane %v1129_v47, 2 }
 0x1ea   : > { %v943_v25 = vsel %vm767_vm2, %v941_v10, %v942_v18  ;;  %v958_v19 = vadd.f32 %v940_v17, %v729_v26  ;;  %v1168_v30 = vrot.slane %v1130_v48, 2  ;;  %v1170_v37 = vrot.slane %v1131_v52, 2 }
 0x1eb   : > { %v4015_v54 = vpack.i.bf16 %v2248_v8, %v2247_v14  ;;  %v959_v16 = vadd.f32 %v943_v25, %v730_v44  ;;  %v1171_v21 = vrot.slane %v1132_v11, 2  ;;  %v1239_v56 = vmul.f32 %v4485_v40, %v4580_v28 }
 0x1ec   : > { %v1169_v29 = vsel %vm996_vm3, %v1167_v12, %v1168_v30  ;;  %v1240_v62 = vmul.f32 %v4485_v40, %v4596_v4  ;;  %v1417_v24 = vmul.f32 %v4492_v43, %v4580_v28  ;;  %v1418_v51 = vmul.f32 %v4492_v43, %v4583_v41 }
 0x1ed   : > { %4016 = vrot.lane.b32.xlu1 %v4015_v54, %s4195_s25  ;;  %v1172_v27 = vsel %vm996_vm3, %v1170_v37, %v1171_v21  ;;  %v1187_v55 = vadd.f32 %v1169_v29, %v958_v19  ;;  %v1419_v26 = vmul.f32 %v4492_v43, %v4596_v4  ;;  %v1420_v44 = vmul.f32 %v4492_v43, %v4599_v9  ;;  %s4199_s25 = smov 112  }
 0x1ee   : > { %v1188_v59 = vadd.f32 %v1172_v27, %v959_v16  ;;  %v1455_v39 = vrot.slane %v1417_v24, 1  ;;  %v1456_v40 = vrot.slane %v1418_v51, 1  ;;  %v1645_v42 = vmul.f32 %v4497_v61, %v4580_v28 }
 0x1ef   : > { %v1247_v2 = vadd.f32 %v1239_v56, %v1187_v55  ;;  %v1458_v20 = vrot.slane %v1419_v26, 1  ;;  %v1459_v49 = vrot.slane %v1420_v44, 1  ;;  %v1646_v33 = vmul.f32 %v4497_v61, %v4583_v41  ;;  %v5185_v26 = vld [vmem:[%s6068_s3] sm:$0xff] }
 0x1f0   : > { %v1248_v47 = vadd.f32 %v1240_v62, %v1188_v59  ;;  %v1457_v35 = vsel %vm767_vm2, %v1455_v39, %v1456_v40  ;;  %v1647_v15 = vmul.f32 %v4497_v61, %v4596_v4  ;;  %v1648_v43 = vmul.f32 %v4497_v61, %v4599_v9 }
 0x1f1   : > { %v1460_v14 = vsel %vm767_vm2, %v1458_v20, %v1459_v49  ;;  %v1475_v32 = vadd.f32 %v1457_v35, %v1247_v2  ;;  %v1683_v34 = vrot.slane %v1645_v42, 2  ;;  %v1684_v10 = vrot.slane %v1646_v33, 2 }
 0x1f2   : > { %v1476_v18 = vadd.f32 %v1460_v14, %v1248_v47  ;;  %v1686_v48 = vrot.slane %v1647_v15, 2  ;;  %v1687_v52 = vrot.slane %v1648_v43, 2  ;;  %v1755_v8 = vmul.f32 %v4501_v45, %v4596_v4 }
 0x1f3   : > { %v1685_v17 = vsel %vm996_vm3, %v1683_v34, %v1684_v10  ;;  %v1756_v11 = vmul.f32 %v4501_v45, %v4371_v63  ;;  %v1933_v12 = vmul.f32 %v4505_v46, %v4596_v4  ;;  %v1934_v61 = vmul.f32 %v4505_v46, %v4599_v9 }
 0x1f4   : > { %v1688_v25 = vsel %vm996_vm3, %v1686_v48, %v1687_v52  ;;  %v1703_v19 = vadd.f32 %v1685_v17, %v1475_v32  ;;  %v1935_v30 = vmul.f32 %v4505_v46, %v4371_v63  ;;  %v1936_v37 = vmul.f32 %v4505_v46, %v4374_v0 }
 0x1f5   : > { %v1704_v54 = vadd.f32 %v1688_v25, %v1476_v18  ;;  %v1971_v16 = vrot.slane %v1933_v12, 1  ;;  %v1972_v21 = vrot.slane %v1934_v61, 1  ;;  %v2161_v45 = vmul.f32 %v4767_v13, %v4596_v4 }
 0x1f6   : > { %v1763_v56 = vadd.f32 %v1755_v8, %v1703_v19  ;;  %v1974_v29 = vrot.slane %v1935_v30, 1  ;;  %v1975_v62 = vrot.slane %v1936_v37, 1  ;;  %v2162_v24 = vmul.f32 %v4767_v13, %v4599_v9 }
 0x1f7   : > { %v1764_v51 = vadd.f32 %v1756_v11, %v1704_v54  ;;  %v1973_v27 = vsel %vm767_vm2, %v1971_v16, %v1972_v21  ;;  %v2163_v55 = vmul.f32 %v4767_v13, %v4371_v63  ;;  %v2164_v46 = vmul.f32 %v4767_v13, %v4374_v0 }
 0x1f8   : > { %v1976_v44 = vsel %vm767_vm2, %v1974_v29, %v1975_v62  ;;  %v1991_v59 = vadd.f32 %v1973_v27, %v1763_v56  ;;  %v2199_v39 = vrot.slane %v2161_v45, 2  ;;  %v2200_v40 = vrot.slane %v2162_v24, 2  ;;  %v6094_v29 = vld [vmem:[#allocation2_spill] sm:$0xff] }
 0x1f9   : > { %v1992_v42 = vadd.f32 %v1976_v44, %v1764_v51  ;;  %v2202_v2 = vrot.slane %v2163_v55, 2  ;;  %v2203_v20 = vrot.slane %v2164_v46, 2  ;;  %v5191_v33 = vrot.slane %v5185_v26, %v4382_v3  ;;  %v6095_v51 = vld [vmem:[#allocation3_spill] sm:$0xff]  ;;  %v6096_v44 = vld [vmem:[#allocation4_spill] sm:$0xff] }
 0x1fa   : > { %v2201_v49 = vsel %vm996_vm3, %v2199_v39, %v2200_v40  ;;  %v5195_v13 = vrot.slane %v5185_v26, %v4359_v58  ;;  %v5200_v15 = vrot.slane %v5185_v26, %v4387_v5  ;;  %v5229_v62 = vrot.slane %v5185_v26, %v6094_v29 }
 0x1fb   : > { %v2204_v47 = vsel %vm996_vm3, %v2202_v2, %v2203_v20  ;;  %v2219_v35 = vadd.f32 %v2201_v49, %v1991_v59  ;;  %v701_v14 = vmul.f32 %v5191_v33, %v4530_v22  ;;  %v702_v32 = vmul.f32 %v5191_v33, %v4538_v57 }
 0x1fc   : > { %v2220_v43 = vadd.f32 %v2204_v47, %v1992_v42  ;;  %v739_v3 = vmul.f32 %v5195_v13, %v4530_v22  ;;  %v740_v34 = vmul.f32 %v5195_v13, %v4533_v23  ;;  %v741_v10 = vmul.f32 %v5195_v13, %v4538_v57 }
 0x1fd   : > { %v2261_v58 = vadd.f32 %v4801_v53, %v2219_v35  ;;  %v742_v5 = vmul.f32 %v5195_v13, %v4541_v31  ;;  %v968_v52 = vmul.f32 %v5200_v15, %v4530_v22  ;;  %v969_v8 = vmul.f32 %v5200_v15, %v4533_v23 }
 0x1fe   : > { %v2262_v18 = vadd.f32 %v4801_v53, %v2220_v43  ;;  %v774_v48 = vrot.slane %v739_v3, 1  ;;  %v775_v17 = vrot.slane %v740_v34, 1  ;;  %v777_v11 = vrot.slane %v741_v10, 1 }
 0x1ff   : > { %v778_v12 = vrot.slane %v742_v5, 1  ;;  %v970_v61 = vmul.f32 %v5200_v15, %v4538_v57  ;;  %v971_v19 = vmul.f32 %v5200_v15, %v4541_v31  ;;  %v1003_v30 = vrot.slane %v968_v52, 2 }
 0x200   : > { %v4025_v25 = vpack.i.bf16 %v2262_v18, %v2261_v58  ;;  %v1004_v37 = vrot.slane %v969_v8, 2  ;;  %v776_v53 = vsel %vm767_vm2, %v774_v48, %v775_v17  ;;  %v5234_v27 = vrot.slane %v5185_v26, %v6095_v51 }
 0x201   : > { %v779_v54 = vsel %vm767_vm2, %v777_v11, %v778_v12  ;;  %v1006_v16 = vrot.slane %v970_v61, 2  ;;  %v802_v21 = vadd.f32 %v776_v53, %v701_v14  ;;  %v1007_v56 = vrot.slane %v971_v19, 2  ;;  %v6097_v11 = vld [vmem:[#allocation6_spill] sm:$0xff] }
 0x202   : > { %4026 = vrot.lane.b32.xlu1 %v4025_v25, %s4196_s26  ;;  %v803_v45 = vadd.f32 %v779_v54, %v702_v32  ;;  %v1005_v24 = vsel %vm996_vm3, %v1003_v30, %v1004_v37  ;;  %v1195_v46 = vmul.f32 %v5229_v62, %v4538_v57  ;;  %v5240_v59 = vrot.slane %v5185_v26, %v6096_v44 }
 0x203   : > { %v1031_v55 = vadd.f32 %v1005_v24, %v802_v21  ;;  %v1008_v39 = vsel %vm996_vm3, %v1006_v16, %v1007_v56  ;;  %v1257_v40 = vmul.f32 %v5234_v27, %v4538_v57  ;;  %v1258_v42 = vmul.f32 %v5234_v27, %v4541_v31  ;;  %v5283_v24 = vld [vmem:[%s6068_s3 + $0x8] ss:$0 sm:$0xff] }
 0x204   : > { %v1259_v2 = vmul.f32 %v5234_v27, %v4550_v60  ;;  %v1032_v20 = vadd.f32 %v1008_v39, %v803_v45  ;;  %v1260_v49 = vmul.f32 %v5234_v27, %v4553_v1  ;;  %v1485_v47 = vmul.f32 %v5240_v59, %v4538_v57  ;;  %v6098_v45 = vld [vmem:[#allocation5_spill] sm:$0xff] }
 0x205   : > { %v1486_v35 = vmul.f32 %v5240_v59, %v4541_v31  ;;  %v1203_v43 = vadd.f32 %v1195_v46, %v1031_v55  ;;  %v1291_v14 = vrot.slane %v1257_v40, 1  ;;  %v1292_v32 = vrot.slane %v1258_v42, 1 }
 0x206   : > { %v1196_v3 = vmul.f32 %v5229_v62, %v4550_v60  ;;  %v1294_v58 = vrot.slane %v1259_v2, 1  ;;  %v1295_v34 = vrot.slane %v1260_v49, 1  ;;  %v1487_v10 = vmul.f32 %v5240_v59, %v4550_v60 }
 0x207   : > { %v1488_v5 = vmul.f32 %v5240_v59, %v4553_v1  ;;  %v1293_v48 = vsel %vm767_vm2, %v1291_v14, %v1292_v32  ;;  %v1519_v52 = vrot.slane %v1485_v47, 2  ;;  %v1520_v8 = vrot.slane %v1486_v35, 2 }
 0x208   : > { %v1204_v18 = vadd.f32 %v1196_v3, %v1032_v20  ;;  %v1319_v17 = vadd.f32 %v1293_v48, %v1203_v43  ;;  %v5264_v12 = vrot.slane %v5185_v26, %v6097_v11  ;;  %v1296_v61 = vsel %vm767_vm2, %v1294_v58, %v1295_v34 }
 0x209   : > { %v1522_v25 = vrot.slane %v1487_v10, 2  ;;  %v1523_v19 = vrot.slane %v1488_v5, 2  ;;  %v1521_v53 = vsel %vm996_vm3, %v1519_v52, %v1520_v8  ;;  %v5276_v56 = vrot.slane %v5185_v26, %v6098_v45 }
 0x20a   : > { %v1773_v30 = vmul.f32 %v5264_v12, %v4550_v60  ;;  %v1320_v37 = vadd.f32 %v1296_v61, %v1204_v18  ;;  %v1774_v54 = vmul.f32 %v5264_v12, %v4553_v1  ;;  %v1775_v16 = vmul.f32 %v5264_v12, %v4558_v6 }
 0x20b   : > { %v1547_v21 = vadd.f32 %v1521_v53, %v1319_v17  ;;  %v1776_v29 = vmul.f32 %v5264_v12, %v4561_v7  ;;  %v1524_v51 = vsel %vm996_vm3, %v1522_v25, %v1523_v19  ;;  %v1711_v55 = vmul.f32 %v5276_v56, %v4550_v60 }
 0x20c   : > { %v1807_v46 = vrot.slane %v1773_v30, 1  ;;  %v5290_v44 = vmul.f32 %v5283_v24, %v4550_v60  ;;  %v1548_v26 = vadd.f32 %v1524_v51, %v1320_v37  ;;  %v1808_v39 = vrot.slane %v1774_v54, 1 }
 0x20d   : > { %v1810_v40 = vrot.slane %v1775_v16, 1  ;;  %v5294_v42 = vmul.f32 %v5283_v24, %v4553_v1  ;;  %v1719_v2 = vadd.f32 %v1711_v55, %v1547_v21  ;;  %v1811_v20 = vrot.slane %v1776_v29, 1 }
 0x20e   : > { %v743_v49 = vmul.f32 %v5195_v13, %v4550_v60  ;;  %v744_v47 = vmul.f32 %v5195_v13, %v4553_v1  ;;  %v2003_v35 = vmul.f32 %v5283_v24, %v4558_v6  ;;  %v745_v43 = vmul.f32 %v5195_v13, %v4558_v6 }
 0x20f   : > { %v746_v14 = vmul.f32 %v5195_v13, %v4561_v7  ;;  %v972_v32 = vmul.f32 %v5200_v15, %v4550_v60  ;;  %v2004_v3 = vmul.f32 %v5283_v24, %v4561_v7  ;;  %v973_v10 = vmul.f32 %v5200_v15, %v4553_v1 }
 0x210   : > { %v780_v58 = vrot.slane %v743_v49, 1  ;;  %v781_v34 = vrot.slane %v744_v47, 1  ;;  %v703_v5 = vmul.f32 %v5191_v33, %v4550_v60  ;;  %v783_v18 = vrot.slane %v745_v43, 1 }
 0x211   : > { %v784_v48 = vrot.slane %v746_v14, 1  ;;  %v974_v52 = vmul.f32 %v5200_v15, %v4558_v6  ;;  %v704_v8 = vmul.f32 %v5191_v33, %v4558_v6  ;;  %v975_v11 = vmul.f32 %v5200_v15, %v4561_v7  ;;  %v5339_v14 = vpop.permute.xlu1 %3996 }
 0x212   : > { %v782_v17 = vsel %vm767_vm2, %v780_v58, %v781_v34  ;;  %v1009_v61 = vrot.slane %v972_v32, 2  ;;  %v1010_v19 = vrot.slane %v973_v10, 2  ;;  %v1809_v60 = vsel %vm767_vm2, %v1807_v46, %v1808_v39 }
 0x213   : > { %v785_v25 = vsel %vm767_vm2, %v783_v18, %v784_v48  ;;  %v804_v1 = vadd.f32 %v782_v17, %v703_v5  ;;  %v1012_v30 = vrot.slane %v974_v52, 2  ;;  %v1712_v37 = vmul.f32 %v5276_v56, %v4558_v6 }
 0x214   : > { %v805_v53 = vadd.f32 %v785_v25, %v704_v8  ;;  %v1013_v54 = vrot.slane %v975_v11, 2  ;;  %v2035_v16 = vrot.slane %v5290_v44, 2  ;;  %v1011_v21 = vsel %vm996_vm3, %v1009_v61, %v1010_v19  ;;  %v5352_v25 = vpop.permute.xlu0 %3991 }
 0x215   : > { %v1261_v45 = vmul.f32 %v5234_v27, %v4558_v6  ;;  %v1262_v29 = vmul.f32 %v5234_v27, %v4561_v7  ;;  %v2036_v51 = vrot.slane %v5294_v42, 2  ;;  %v1720_v55 = vadd.f32 %v1712_v37, %v1548_v26 }
 0x216   : > { %v1014_v46 = vsel %vm996_vm3, %v1012_v30, %v1013_v54  ;;  %v1033_v39 = vadd.f32 %v1011_v21, %v804_v1  ;;  %v1197_v47 = vmul.f32 %v5229_v62, %v4558_v6  ;;  %v1263_v44 = vmul.f32 %v5234_v27, %v4573_v36 }
 0x217   : > { %v1034_v49 = vadd.f32 %v1014_v46, %v805_v53  ;;  %v1264_v43 = vmul.f32 %v5234_v27, %v4576_v38  ;;  %v1297_v32 = vrot.slane %v1261_v45, 1  ;;  %v1298_v58 = vrot.slane %v1262_v29, 1 }
 0x218   : > { %v1489_v26 = vmul.f32 %v5240_v59, %v4558_v6  ;;  %v1490_v42 = vmul.f32 %v5240_v59, %v4561_v7  ;;  %v1812_v34 = vsel %vm767_vm2, %v1810_v40, %v1811_v20  ;;  %v2038_v10 = vrot.slane %v2003_v35, 2 }
 0x219   : > { %v2039_v5 = vrot.slane %v2004_v3, 2  ;;  %v1205_v18 = vadd.f32 %v1197_v47, %v1033_v39  ;;  %v1835_v48 = vadd.f32 %v1809_v60, %v1719_v2  ;;  %v1836_v52 = vadd.f32 %v1812_v34, %v1720_v55  ;;  %v5357_v60 = vpop.permute.xlu1 %4001 }
 0x21a   : > { %v1198_v8 = vmul.f32 %v5229_v62, %v4573_v36  ;;  %v1300_v17 = vrot.slane %v1263_v44, 1  ;;  %v1301_v11 = vrot.slane %v1264_v43, 1  ;;  %v1491_v61 = vmul.f32 %v5240_v59, %v4573_v36 }
 0x21b   : > { %v1492_v6 = vmul.f32 %v5240_v59, %v4576_v38  ;;  %v1299_v40 = vsel %vm767_vm2, %v1297_v32, %v1298_v58  ;;  %v1525_v20 = vrot.slane %v1489_v26, 2  ;;  %v1526_v35 = vrot.slane %v1490_v42, 2 }
 0x21c   : > { %v1206_v7 = vadd.f32 %v1198_v8, %v1034_v49  ;;  %v2037_v2 = vsel %vm996_vm3, %v2035_v16, %v2036_v51  ;;  %v2040_v3 = vsel %vm996_vm3, %v2038_v10, %v2039_v5  ;;  %v1321_v1 = vadd.f32 %v1299_v40, %v1205_v18  ;;  %v5370_v51 = vld [vmem:[%s6069_s4] ss:$0 sm:$0xff] }
 0x21d   : > { %v2063_v19 = vadd.f32 %v2037_v2, %v1835_v48  ;;  %v2064_v30 = vadd.f32 %v2040_v3, %v1836_v52  ;;  %v1302_v53 = vsel %vm767_vm2, %v1300_v17, %v1301_v11  ;;  %v1528_v54 = vrot.slane %v1491_v61, 2 }
 0x21e   : > { %v1529_v21 = vrot.slane %v1492_v6, 2  ;;  %v1322_v29 = vadd.f32 %v1302_v53, %v1206_v7  ;;  %v1527_v55 = vsel %vm996_vm3, %v1525_v20, %v1526_v35  ;;  %v5365_v16 = vmul.f32 %v5264_v12, %v4573_v36  ;;  %v6099_v7 = vld [vmem:[#allocation7_spill] sm:$0xff] }
 0x21f   : > { %v1549_v47 = vadd.f32 %v1527_v55, %v1321_v1  ;;  %v5376_v44 = vadd.f32 %v5370_v51, %v2063_v19  ;;  %v5379_v43 = vadd.f32 %v5370_v51, %v2064_v30  ;;  %v1713_v32 = vmul.f32 %v5276_v56, %v4573_v36 }
 0x220   : > { %v5385_v58 = vmul.f32 %v5276_v56, %v4580_v28  ;;  %v1530_v26 = vsel %vm996_vm3, %v1528_v54, %v1529_v21  ;;  %v5390_v42 = vmul.f32 %v5264_v12, %v4576_v38  ;;  %v5394_v34 = vmul.f32 %v5264_v12, %v4580_v28 }
 0x221   : > { %v5398_v10 = vmul.f32 %v5264_v12, %v4583_v41  ;;  %v1550_v5 = vadd.f32 %v1530_v26, %v1322_v29  ;;  %v1813_v18 = vrot.slane %v5365_v16, 1  ;;  %v5403_v48 = vmul.f32 %v5283_v24, %v4573_v36 }
 0x222   : > { %v5407_v52 = vmul.f32 %v5283_v24, %v4576_v38  ;;  %v5409_v8 = vadd.f32 %v1713_v32, %v1549_v47  ;;  %v735_v17 = vmul.f32 %v5195_v13, %v4371_v63  ;;  %v736_v11 = vmul.f32 %v5195_v13, %v4374_v0 }
 0x223   : > { %v737_v61 = vmul.f32 %v5195_v13, %v4508_v50  ;;  %v699_v6 = vmul.f32 %v5191_v33, %v4371_v63  ;;  %v738_v40 = vmul.f32 %v5195_v13, %v6099_v7  ;;  %v964_v20 = vmul.f32 %v5200_v15, %v4371_v63 }
 0x224   : > { %v965_v35 = vmul.f32 %v5200_v15, %v4374_v0  ;;  %v1814_v2 = vrot.slane %v5390_v42, 1  ;;  %v768_v3 = vrot.slane %v735_v17, 1  ;;  %v769_v1 = vrot.slane %v736_v11, 1 }
 0x225   : > { %v771_v19 = vrot.slane %v737_v61, 1  ;;  %v1816_v30 = vrot.slane %v5394_v34, 1  ;;  %v772_v53 = vrot.slane %v738_v40, 1  ;;  %v966_v54 = vmul.f32 %v5200_v15, %v4508_v50 }
 0x226   : > { %v967_v21 = vmul.f32 %v5200_v15, %v6099_v7  ;;  %v700_v29 = vmul.f32 %v5191_v33, %v4508_v50  ;;  %v770_v55 = vsel %vm767_vm2, %v768_v3, %v769_v1  ;;  %v997_v47 = vrot.slane %v964_v20, 2 }
 0x227   : > { %v998_v32 = vrot.slane %v965_v35, 2  ;;  %v773_v26 = vsel %vm767_vm2, %v771_v19, %v772_v53  ;;  %v800_v17 = vadd.f32 %v770_v55, %v699_v6  ;;  %v1000_v11 = vrot.slane %v966_v54, 2 }
 0x228   : > { %v1001_v61 = vrot.slane %v967_v21, 2  ;;  %v801_v49 = vadd.f32 %v773_v26, %v700_v29  ;;  %v1193_v37 = vmul.f32 %v5229_v62, %v4508_v50  ;;  %v1194_v45 = vmul.f32 %v5229_v62, %v4530_v22 }
 0x229   : > { %v999_v40 = vsel %vm996_vm3, %v997_v47, %v998_v32  ;;  %v1253_v20 = vmul.f32 %v5234_v27, %v4508_v50  ;;  %v1254_v6 = vmul.f32 %v5234_v27, %v6099_v7  ;;  %v1255_v3 = vmul.f32 %v5234_v27, %v4530_v22 }
 0x22a   : > { %v1002_v46 = vsel %vm996_vm3, %v1000_v11, %v1001_v61  ;;  %v1029_v39 = vadd.f32 %v999_v40, %v800_v17  ;;  %v1256_v1 = vmul.f32 %v5234_v27, %v4533_v23  ;;  %v1481_v19 = vmul.f32 %v5240_v59, %v4508_v50 }
 0x22b   : > { %v1030_v35 = vadd.f32 %v1002_v46, %v801_v49  ;;  %v1285_v54 = vrot.slane %v1253_v20, 1  ;;  %v1286_v21 = vrot.slane %v1254_v6, 1  ;;  %v1482_v29 = vmul.f32 %v5240_v59, %v6099_v7 }
 0x22c   : > { %v1201_v53 = vadd.f32 %v1193_v37, %v1029_v39  ;;  %v1288_v47 = vrot.slane %v1255_v3, 1  ;;  %v1289_v32 = vrot.slane %v1256_v1, 1  ;;  %v1483_v46 = vmul.f32 %v5240_v59, %v4530_v22 }
 0x22d   : > { %v1202_v55 = vadd.f32 %v1194_v45, %v1030_v35  ;;  %v1817_v49 = vrot.slane %v5398_v10, 1  ;;  %v5458_v26 = vmul.f32 %v5283_v24, %v4580_v28  ;;  %v1287_v50 = vsel %vm767_vm2, %v1285_v54, %v1286_v21 }
 0x22e   : > { %v1484_v37 = vmul.f32 %v5240_v59, %v4533_v23  ;;  %v1290_v39 = vsel %vm767_vm2, %v1288_v47, %v1289_v32  ;;  %v1317_v7 = vadd.f32 %v1287_v50, %v1201_v53  ;;  %v1513_v45 = vrot.slane %v1481_v19, 2 }
 0x22f   : > { %v1514_v17 = vrot.slane %v1482_v29, 2  ;;  %v2008_v11 = vmul.f32 %v5283_v24, %v4583_v41  ;;  %v2041_v61 = vrot.slane %v5403_v48, 2  ;;  %v1318_v10 = vadd.f32 %v1290_v39, %v1202_v55 }
 0x230   : > { %v1516_v40 = vrot.slane %v1483_v46, 2  ;;  %v1722_v20 = vadd.f32 %v5385_v58, %v1550_v5  ;;  %v1517_v35 = vrot.slane %v1484_v37, 2  ;;  %v1709_v3 = vmul.f32 %v5276_v56, %v4530_v22 }
 0x231   : > { %v1515_v6 = vsel %vm996_vm3, %v1513_v45, %v1514_v17  ;;  %v1710_v19 = vmul.f32 %v5276_v56, %v4538_v57  ;;  %v1769_v53 = vmul.f32 %v5264_v12, %v4530_v22  ;;  %v1770_v48 = vmul.f32 %v5264_v12, %v4533_v23 }
 0x232   : > { %v1545_v1 = vadd.f32 %v1515_v6, %v1317_v7  ;;  %v1518_v54 = vsel %vm996_vm3, %v1516_v40, %v1517_v35  ;;  %v1771_v58 = vmul.f32 %v5264_v12, %v4538_v57  ;;  %v1772_v5 = vmul.f32 %v5264_v12, %v4541_v31 }
 0x233   : > { %v1997_v21 = vmul.f32 %v5283_v24, %v4530_v22  ;;  %v1546_v29 = vadd.f32 %v1518_v54, %v1318_v10  ;;  %v1801_v47 = vrot.slane %v1769_v53, 1  ;;  %v1802_v32 = vrot.slane %v1770_v48, 1 }
 0x234   : > { %v1717_v55 = vadd.f32 %v1709_v3, %v1545_v1  ;;  %v1804_v46 = vrot.slane %v1771_v58, 1  ;;  %v1805_v50 = vrot.slane %v1772_v5, 1  ;;  %v1998_v37 = vmul.f32 %v5283_v24, %v4533_v23  ;;  %v4007_v7 = vpop.permute.xlu1 %4006 }
 0x235   : > { %v1999_v39 = vmul.f32 %v5283_v24, %v4538_v57  ;;  %v1718_v45 = vadd.f32 %v1710_v19, %v1546_v29  ;;  %v1803_v17 = vsel %vm767_vm2, %v1801_v47, %v1802_v32  ;;  %v2000_v40 = vmul.f32 %v5283_v24, %v4541_v31  ;;  %v4012_v29 = vpop.permute.xlu0 %4011 }
 0x236   : > { %v2029_v22 = vrot.slane %v1997_v21, 2  ;;  %v1806_v10 = vsel %vm767_vm2, %v1804_v46, %v1805_v50  ;;  %v1833_v6 = vadd.f32 %v1803_v17, %v1717_v55  ;;  %v2030_v35 = vrot.slane %v1998_v37, 2 }
 0x237   : > { %v2032_v3 = vrot.slane %v1999_v39, 2  ;;  %v1815_v23 = vsel %vm767_vm2, %v1813_v18, %v1814_v2  ;;  %v2042_v57 = vrot.slane %v5407_v52, 2  ;;  %v1834_v1 = vadd.f32 %v1806_v10, %v1718_v45 }
 0x238   : > { %v2033_v19 = vrot.slane %v2000_v40, 2  ;;  %v1818_v31 = vsel %vm767_vm2, %v1816_v30, %v1817_v49  ;;  %v4009_v53 = vunpack.i.h.bf16 %v4007_v7  ;;  %v4008_v48 = vunpack.i.l.bf16 %v4007_v7 }
 0x239   : > { %v2031_v54 = vsel %vm996_vm3, %v2029_v22, %v2030_v35  ;;  %v2044_v58 = vrot.slane %v5458_v26, 2  ;;  %v2045_v5 = vrot.slane %v2008_v11, 2  ;;  %v4003_v18 = vunpack.i.l.bf16 %v5357_v60 }
 0x23a   : > { %v2034_v42 = vsel %vm996_vm3, %v2032_v3, %v2033_v19  ;;  %v2061_v16 = vadd.f32 %v2031_v54, %v1833_v6  ;;  %v1837_v52 = vadd.f32 %v1815_v23, %v5409_v8  ;;  %v1838_v2 = vadd.f32 %v1818_v31, %v1722_v20 }
 0x23b   : > { %v2062_v21 = vadd.f32 %v2034_v42, %v1834_v1  ;;  %v6100_v34 = vunpack.i.l.bf16 %v5339_v14  ;;  %v6101_v49 = vunpack.i.h.bf16 %v5339_v14  ;;  %v2043_v47 = vsel %vm996_vm3, %v2041_v61, %v2042_v57 }
 0x23c   : > { %v2227_v11 = vadd.f32 %v5370_v51, %v2061_v16  ;;  %v2046_v32 = vsel %vm996_vm3, %v2044_v58, %v2045_v5  ;;  %v2065_v46 = vadd.f32 %v2043_v47, %v1837_v52  ;;  %v6103_v50 = vunpack.i.h.bf16 %v5352_v25 }
 0x23d   : > { %v2329_v30 = vsel %vm506_vm0, %v5376_v44, %v6100_v34  ;;  %v2330_v26 = vsel %vm506_vm0, %v5379_v43, %v6101_v49  ;;  %v2228_v20 = vadd.f32 %v5370_v51, %v2062_v21  ;;  %v6102_v44 = vunpack.i.l.bf16 %v5352_v25 }
 0x23e   : > { %v2338_v55 = vsel %vm2335_vm4, %v2329_v30, %v4008_v48  ;;  %v2339_v8 = vsel %vm2335_vm4, %v2330_v26, %v4009_v53  ;;  %v2066_v43 = vadd.f32 %v2046_v32, %v1838_v2  ;;  %v6104_v45 = vunpack.i.h.bf16 %v5357_v60 }
 0x23f   : > { %v2327_v14 = vsel %vm506_vm0, %v2227_v11, %v6102_v44  ;;  %v2328_v37 = vsel %vm506_vm0, %v2228_v20, %v6103_v50  ;;  %v2345_v7 = vpack.c.bf16 %v2339_v8, %v2338_v55  ;;  %v4014_v61 = vunpack.i.h.bf16 %v4012_v29 }
 0x240   : > { %v2336_v39 = vsel %vm2335_vm4, %v2327_v14, %v4003_v18  ;;  %v2337_v17 = vsel %vm2335_vm4, %v2328_v37, %v6104_v45  ;;  %v4013_v40 = vunpack.i.l.bf16 %v4012_v29  ;;  %v747_v10 = vmul.f32 %v5195_v13, %v4573_v36 }
 0x241   : > { %v2344_v22 = vpack.c.bf16 %v2337_v17, %v2336_v39  ;;  %v748_v6 = vmul.f32 %v5195_v13, %v4576_v38  ;;  %v2231_v25 = vadd.f32 %v5370_v51, %v2065_v46  ;;  %v2232_v35 = vadd.f32 %v5370_v51, %v2066_v43 }
 0x242   : > { %v749_v57 = vmul.f32 %v5195_v13, %v4580_v28  ;;  %v750_v1 = vmul.f32 %v5195_v13, %v4583_v41  ;;  %v786_v54 = vrot.slane %v747_v10, 1  ;;  %v976_v42 = vmul.f32 %v5200_v15, %v4573_v36 }
 0x243   : > { %3854 = vmatprep.mubr.msk.bf16.mxu0 %vm2403_vm5, %v2344_v22  ;;  %v2332_v19 = vsel %vm506_vm0, %v2232_v35, %v4014_v61  ;;  %v2331_v31 = vsel %vm506_vm0, %v2231_v25, %v4013_v40  ;;  %v787_v58 = vrot.slane %v748_v6, 1  ;;  %v977_v16 = vmul.f32 %v5200_v15, %v4576_v38 }
 0x244   : > { %3855 = vmatmul.mubr.msk.bf16.vlgmr.msra.gmra.mrb[0].mxu0 %vm2403_vm5, %v2345_v7  ;;  %v789_v13 = vrot.slane %v749_v57, 1  ;;  %v790_v18 = vrot.slane %v750_v1, 1  ;;  %v978_v52 = vmul.f32 %v5200_v15, %v4580_v28  ;;  %v979_v2 = vmul.f32 %v5200_v15, %v4583_v41 }
 0x245   : > { %v788_v21 = vsel %vm767_vm2, %v786_v54, %v787_v58  ;;  %v705_v34 = vmul.f32 %v5191_v33, %v4573_v36  ;;  %v1015_v30 = vrot.slane %v976_v42, 2  ;;  %v1016_v49 = vrot.slane %v977_v16, 2 }
 0x246   : > { %v791_v26 = vsel %vm767_vm2, %v789_v13, %v790_v18  ;;  %v1018_v38 = vrot.slane %v978_v52, 2  ;;  %v1019_v11 = vrot.slane %v979_v2, 2  ;;  %v706_v55 = vmul.f32 %v5191_v33, %v4580_v28 }
 0x247   : > { %v806_v29 = vadd.f32 %v788_v21, %v705_v34  ;;  %v1017_v8 = vsel %vm996_vm3, %v1015_v30, %v1016_v49  ;;  %v1265_v15 = vmul.f32 %v5234_v27, %v4580_v28  ;;  %v1266_v36 = vmul.f32 %v5234_v27, %v4583_v41 }
 0x248   : > { %v807_v20 = vadd.f32 %v791_v26, %v706_v55  ;;  %v1020_v47 = vsel %vm996_vm3, %v1018_v38, %v1019_v11  ;;  %v1267_v32 = vmul.f32 %v5234_v27, %v4596_v4  ;;  %v1268_v44 = vmul.f32 %v5234_v27, %v4599_v9 }
 0x249   : > { %v1035_v14 = vadd.f32 %v1017_v8, %v806_v29  ;;  %v1199_v33 = vmul.f32 %v5229_v62, %v4580_v28  ;;  %v1200_v43 = vmul.f32 %v5229_v62, %v4596_v4  ;;  %v1303_v50 = vrot.slane %v1265_v15, 1 }
 0x24a   : > { %v4022_v3 = vpop.permute.xlu0 %4021  ;;  %v1036_v46 = vadd.f32 %v1020_v47, %v807_v20  ;;  %v1493_v37 = vmul.f32 %v5240_v59, %v4580_v28  ;;  %v1494_v39 = vmul.f32 %v5240_v59, %v4583_v41  ;;  %v1495_v7 = vmul.f32 %v5240_v59, %v4596_v4 }
 0x24b   : > { %v4024_v60 = vunpack.i.h.bf16 %v4022_v3  ;;  %v4023_v23 = vunpack.i.l.bf16 %v4022_v3  ;;  %v1304_v45 = vrot.slane %v1266_v36, 1  ;;  %v1306_v27 = vrot.slane %v1267_v32, 1 }
 0x24c   : > { %v1307_v17 = vrot.slane %v1268_v44, 1  ;;  %v1496_v61 = vmul.f32 %v5240_v59, %v4599_v9  ;;  %v1207_v40 = vadd.f32 %v1199_v33, %v1035_v14  ;;  %v1208_v22 = vadd.f32 %v1200_v43, %v1036_v46 }
 0x24d   : > { %v2340_v53 = vsel %vm2335_vm4, %v2331_v31, %v4023_v23  ;;  %v2341_v48 = vsel %vm2335_vm4, %v2332_v19, %v4024_v60  ;;  %v1531_v10 = vrot.slane %v1493_v37, 2  ;;  %v1532_v62 = vrot.slane %v1494_v39, 2  ;;  %v3724_v37 = vld [vmem:[%s6071_s6] ss:$0 sm:$0xff] }
 0x24e   : > { %v2346_v5 = vpack.c.bf16 %v2341_v48, %v2340_v53  ;;  %v1305_v6 = vsel %vm767_vm2, %v1303_v50, %v1304_v45  ;;  %v1308_v28 = vsel %vm767_vm2, %v1306_v27, %v1307_v17  ;;  %v1534_v25 = vrot.slane %v1495_v7, 2 }
 0x24f   : > { %v1535_v35 = vrot.slane %v1496_v61, 2  ;;  %v1323_v41 = vadd.f32 %v1305_v6, %v1207_v40  ;;  %v1324_v3 = vadd.f32 %v1308_v28, %v1208_v22  ;;  %v1783_v60 = vmul.f32 %v5264_v12, %v4371_v63 }
 0x250   : > { %3858 = vmatprep.mubr.msk.bf16.mxu0 %vm2403_vm5, %v2346_v5  ;;  %v1784_v23 = vmul.f32 %v5264_v12, %v4374_v0  ;;  %v1533_v59 = vsel %vm996_vm3, %v1531_v10, %v1532_v62  ;;  %v1781_v1 = vmul.f32 %v5264_v12, %v4596_v4  ;;  %v1782_v19 = vmul.f32 %v5264_v12, %v4599_v9 }
 0x251   : > { %v1536_v57 = vsel %vm996_vm3, %v1534_v25, %v1535_v35  ;;  %v1551_v31 = vadd.f32 %v1533_v59, %v1323_v41  ;;  %v1716_v53 = vmul.f32 %v5276_v56, %v4371_v63  ;;  %v1822_v54 = vrot.slane %v1783_v60, 1 }
 0x252   : > { %v1552_v48 = vadd.f32 %v1536_v57, %v1324_v3  ;;  %v1823_v58 = vrot.slane %v1784_v23, 1  ;;  %v2011_v5 = vmul.f32 %v5283_v24, %v4371_v63  ;;  %v2012_v42 = vmul.f32 %v5283_v24, %v4374_v0 }
 0x253   : > { %v1715_v16 = vmul.f32 %v5276_v56, %v4596_v4  ;;  %v1819_v13 = vrot.slane %v1781_v1, 1  ;;  %v1820_v18 = vrot.slane %v1782_v19, 1  ;;  %v2009_v12 = vmul.f32 %v5283_v24, %v4596_v4 }
 0x254   : > { %v2010_v52 = vmul.f32 %v5283_v24, %v4599_v9  ;;  %v1724_v21 = vadd.f32 %v1716_v53, %v1552_v48  ;;  %v1824_v34 = vsel %vm767_vm2, %v1822_v54, %v1823_v58  ;;  %v2050_v30 = vrot.slane %v2011_v5, 2 }
 0x255   : > { %v1723_v2 = vadd.f32 %v1715_v16, %v1551_v31  ;;  %v2051_v63 = vrot.slane %v2012_v42, 2  ;;  %v1821_v49 = vsel %vm767_vm2, %v1819_v13, %v1820_v18  ;;  %v2047_v0 = vrot.slane %v2009_v12, 2 }
 0x256   : > { %v2048_v26 = vrot.slane %v2010_v52, 2  ;;  %v1840_v56 = vadd.f32 %v1824_v34, %v1724_v21 }
 0x257   : > { %v1839_v38 = vadd.f32 %v1821_v49, %v1723_v2  ;;  %v2052_v11 = vsel %vm996_vm3, %v2050_v30, %v2051_v63 }
 0x258   : > { %v2049_v4 = vsel %vm996_vm3, %v2047_v0, %v2048_v26  ;;  %v2068_v8 = vadd.f32 %v2052_v11, %v1840_v56 }
 0x259   : > { %v2067_v55 = vadd.f32 %v2049_v4, %v1839_v38 }
 0x25a   : > { %v2234_v20 = vadd.f32 %v5370_v51, %v2068_v8 }
 0x25b   : > { %v2233_v15 = vadd.f32 %v5370_v51, %v2067_v55 }
 0x25f   : > { %v4017_v29 = vpop.permute.xlu1 %4016 }
 0x260   : > { %v4019_v9 = vunpack.i.h.bf16 %v4017_v29  ;;  %v4018_v24 = vunpack.i.l.bf16 %v4017_v29 }
 0x262   : > { %v2333_v44 = vsel %vm506_vm0, %v2233_v15, %v4018_v24  ;;  %v2334_v14 = vsel %vm506_vm0, %v2234_v20, %v4019_v9 }
 0x274   : > { %v4027_v47 = vpop.permute.xlu1 %4026 }
 0x275   : > { %v4029_v36 = vunpack.i.h.bf16 %v4027_v47  ;;  %v4028_v32 = vunpack.i.l.bf16 %v4027_v47 }
 0x277   : > { %v2342_v46 = vsel %vm2335_vm4, %v2333_v44, %v4028_v32  ;;  %v2343_v33 = vsel %vm2335_vm4, %v2334_v14, %v4029_v36 }
 0x278   : > { %v2347_v43 = vpack.c.bf16 %v2343_v33, %v2342_v46 }
 0x27a   : > { %3859 = vmatmul.mubr.msk.bf16.gmra.mrb[4].mxu0 %vm2403_vm5, %v2347_v43 }
 0x317   : > { %v3856_v50 = vpop.f32.mrb[0].mxu0 }
 0x318   : > { %v2450_v51 = vpop.f32.mrb[1].mxu0  ;;  %v2459_v7 = vadd.f32 %v3856_v50, %v3724_v37 }
 0x319   : > { %v3857_v39 = vpop.f32.mrb[2].mxu0  ;;  %v2451_v17 = vadd.f32 %v3724_v37, %v2450_v51 }
 0x31a   : > { %v2462_v45 = vadd.f32 %v3857_v39, %v3724_v37  ;;  %v2453_v27 = vpop.f32.mrb[3].mxu0 }
 0x31b   : > { %v2454_v61 = vadd.f32 %v3724_v37, %v2453_v27 }
 0x31c   : > { %v5621_v40 = vpack.c.bf16 %v2462_v45, %v2459_v7 }
 0x31d   : > { %v5623_v22 = vpack.c.bf16 %v2454_v61, %v2451_v17 }
 0x31e   : > { %2491 = vrot.lane.b32.xlu1 %v5621_v40, %s4197_s24 }
 0x31f   : > { %2489 = vrot.lane.b32.xlu0 %v5623_v22, %s4197_s24  ;;  %3870 = vmatprep.mubr.msk.bf16.mxu1 %vm2497_vm6, %v5623_v22 }
 0x34d   : > { %v3860_v10 = vpop.f32.mrb[4].mxu0 }
 0x34e   : > { %v2466_v62 = vpop.f32.mrb[5].mxu0  ;;  %v2475_v28 = vadd.f32 %v3860_v10, %v3724_v37 }
 0x34f   : > { %v3861_v6 = vpop.f32.mrb[6].mxu0  ;;  %v2467_v41 = vadd.f32 %v3724_v37, %v2466_v62 }
 0x350   : > { %v2478_v25 = vadd.f32 %v3861_v6, %v3724_v37  ;;  %v2469_v35 = vpop.f32.mrb[7].mxu0 }
 0x351   : > { %v2470_v3 = vadd.f32 %v3724_v37, %v2469_v35 }
 0x352   : > { %v5629_v60 = vpack.c.bf16 %v2478_v25, %v2475_v28 }
 0x353   : > { %v5631_v23 = vpack.c.bf16 %v2470_v3, %v2467_v41 }
 0x354   : > { %2495 = vrot.lane.b32.xlu1 %v5629_v60, %s4197_s24 }
 0x355   : > { %2493 = vrot.lane.b32.xlu0 %v5631_v23, %s4197_s24 }
 0x358   : > { %2778 = vrot.lane.b32.xlu1 %v5621_v40, %s4198_s27 }
 0x359   : > { %2776 = vrot.lane.b32.xlu0 %v5623_v22, %s4198_s27 }
 0x35c   : > { %2782 = vrot.lane.b32.xlu1 %v5629_v60, %s4198_s27 }
 0x35d   : > { %2780 = vrot.lane.b32.xlu0 %v5631_v23, %s4198_s27 }
 0x360   : > { %2770 = vrot.lane.b32.xlu1 %v5621_v40, %s4199_s25 }
 0x361   : > { %2768 = vrot.lane.b32.xlu0 %v5623_v22, %s4199_s25 }
 0x364   : > { %2774 = vrot.lane.b32.xlu1 %v5629_v60, %s4199_s25 }
 0x365   : > { %2772 = vrot.lane.b32.xlu0 %v5631_v23, %s4199_s25 }
 0x368   : > { %2681 = vrot.lane.b32.xlu1 %v5621_v40, %s4196_s26 }
 0x369   : > { %2679 = vrot.lane.b32.xlu0 %v5623_v22, %s4196_s26 }
 0x36d   : > { %2683 = vrot.lane.b32.xlu0 %v5631_v23, %s4196_s26 }
 0x390   : > { %v2492_v1 = vpop.permute.xlu1 %2491 }
 0x391   : > { %v2490_v59 = vpop.permute.xlu0 %2489  ;;  %v2514_v19 = vsel %vm2497_vm6, %v2492_v1, 0 }
 0x392   : > { %3966 = vmatprep.subr.msk.bf16.mxu1 %vm2497_vm6, %v2490_v59  ;;  %v2511_v57 = vsel %vm2497_vm6, %v2490_v59, 0 }
 0x393   : > { %3863 = vmatpush3.bf16.xpose.msra.mxu1 %v2511_v57 }
 0x394   : > { %3967 = vmatprep.subr.msk.bf16.mxu1 %vm2497_vm6, %v2492_v1 }
 0x39b   : > { %3865 = vmatpush3.bf16.xpose.msra.mxu1 %v2514_v19 }
 0x3c6   : > { %v2496_v31 = vpop.permute.xlu1 %2495 }
 0x3c7   : > { %v2494_v53 = vpop.permute.xlu0 %2493  ;;  %v2520_v16 = vsel %vm2497_vm6, %v2496_v31, 0 }
 0x3c8   : > { %3968 = vmatprep.subr.msk.bf16.mxu1 %vm2497_vm6, %v2494_v53  ;;  %v2517_v48 = vsel %vm2497_vm6, %v2494_v53, 0 }
 0x3c9   : > { %3867 = vmatpush3.bf16.xpose.msra.mxu1 %v2517_v48 }
 0x3ca   : > { %v2779_v54 = vpop.permute.xlu1 %2778  ;;  %3969 = vmatprep.subr.msk.bf16.mxu1 %vm2497_vm6, %v2496_v31 }
 0x3cb   : > { %v2777_v58 = vpop.permute.xlu0 %2776  ;;  %v2800_v30 = vsel %vm2497_vm6, %v2779_v54, 0 }
 0x3cc   : > { %v2797_v2 = vsel %vm2497_vm6, %v2777_v58, 0 }
 0x3ce   : > { %v2783_v5 = vpop.permute.xlu1 %2782 }
 0x3cf   : > { %v2781_v42 = vpop.permute.xlu0 %2780  ;;  %v2806_v0 = vsel %vm2497_vm6, %v2783_v5, 0 }
 0x3d0   : > { %v2803_v49 = vsel %vm2497_vm6, %v2781_v42, 0 }
 0x3d1   : > { %3869 = vmatpush3.bf16.xpose.msra.mxu1 %v2520_v16 }
 0x3d2   : > { %v2771_v13 = vpop.permute.xlu1 %2770  ;;  %3970 = vmatprep.subr.msk.bf16.mxu1 %vm2497_vm6, %v2777_v58 }
 0x3d3   : > { %v2769_v18 = vpop.permute.xlu0 %2768 }
 0x3d6   : > { %v2775_v12 = vpop.permute.xlu1 %2774 }
 0x3d7   : > { %v2773_v52 = vpop.permute.xlu0 %2772 }
 0x3d8   : > { %3871 = vmatmul.mubr.msk.bf16.vlgmr.msra.gmra.mrb[0].mxu1 %vm2497_vm6, %v5621_v40 }
 0x3d9   : > { %3874 = vmatprep.mubr.msk.bf16.mxu1 %vm2497_vm6, %v5631_v23  ;;  %3895 = vmatpush3.bf16.xpose.msra.mxu1 %v2797_v2 }
 0x3da   : > { %3971 = vmatprep.subr.msk.bf16.mxu1 %vm2497_vm6, %v2779_v54  ;;  %v2682_v34 = vpop.permute.xlu1 %2681 }
 0x3db   : > { %v2680_v21 = vpop.permute.xlu0 %2679 }
 0x3dc   : > { %3878 = vmatprep.subr.bf16.mxu0 %v2680_v21 }
 0x3dd   : > { %3879 = vmatpush3.bf16.msra.mxu0 %v2680_v21 }
 0x3de   : > { %3880 = vmatprep.subr.bf16.mxu0 %v2682_v34 }
 0x3df   : > { %v2684_v63 = vpop.permute.xlu0 %2683 }
 0x3e0   : > { %3875 = vmatmul.mubr.msk.bf16.gmra.mrb[4].mxu1 %vm2497_vm6, %v5629_v60 }
 0x3e1   : > { %3881 = vmatpush3.bf16.msra.mxu0 %v2682_v34  ;;  %3897 = vmatpush3.bf16.xpose.msra.mxu1 %v2800_v30 }
 0x3e2   : > { %3882 = vmatprep.subr.bf16.mxu0 %v2684_v63  ;;  %3902 = vmatprep.mubr.msk.bf16.mxu1 %vm2497_vm6, %v2769_v18 }
 0x3e3   : > { %3972 = vmatprep.subr.msk.bf16.mxu1 %vm2497_vm6, %v2781_v42 }
 0x3e5   : > { %3883 = vmatpush3.bf16.msra.mxu0 %v2684_v63 }
 0x3e9   : > { %3899 = vmatpush3.bf16.xpose.msra.mxu1 %v2803_v49 }
 0x3ea   : > { %3973 = vmatprep.subr.msk.bf16.mxu1 %vm2497_vm6, %v2783_v5 }
 0x3f1   : > { %3901 = vmatpush3.bf16.xpose.msra.mxu1 %v2806_v0 }
 0x3f8   : > { %3903 = vmatmul.mubr.msk.bf16.vlgmr.msra.gmra.mrb[8].mxu1 %vm2497_vm6, %v2771_v13 }
 0x3f9   : > { %3906 = vmatprep.mubr.msk.bf16.mxu1 %vm2497_vm6, %v2773_v52 }
 0x400   : > { %3907 = vmatmul.mubr.msk.bf16.gmra.mrb[12].mxu1 %vm2497_vm6, %v2775_v12 }
 0x4ab   : > { %v3872_v26 = vpop.f32.mrb[0].mxu1 }
 0x4ac   : > { %v2556_v38 = vpop.f32.mrb[1].mxu1  ;;  %v2593_v56 = vsel %vm2335_vm4, %v3872_v26, -inf }
 0x4ad   : > { %2594 = vmax.xlane.f32.xlu0 %v2593_v56  ;;  %v3873_v11 = vpop.f32.mrb[2].mxu1  ;;  %v2587_v55 = vsel %vm2335_vm4, %v2556_v38, -inf }
 0x4ae   : > { %v2559_v29 = vpop.f32.mrb[3].mxu1  ;;  %v2596_v24 = vsel %vm2335_vm4, %v3873_v11, -inf }
 0x4af   : > { %v2590_v4 = vsel %vm2335_vm4, %v2559_v29, -inf }
 0x4b0   : > { %2591 = vmax.xlane.f32.xlu1 %v2590_v4 }
 0x4b1   : > { %2588 = vmax.xlane.f32.xlu0 %v2587_v55 }
 0x4b3   : > { %v5678_v8 = vpop.f32.mrb[4].mxu1 }
 0x4b4   : > { %v5680_v9 = vpop.f32.mrb[5].mxu1  ;;  %v2605_v36 = vsel %vm2335_vm4, %v5678_v8, -inf }
 0x4b5   : > { %2597 = vmax.xlane.f32.xlu0 %v2596_v24  ;;  %v3877_v15 = vpop.f32.mrb[6].mxu1  ;;  %v2599_v44 = vsel %vm2335_vm4, %v5680_v9, -inf }
 0x4b6   : > { %v5683_v20 = vpop.f32.mrb[7].mxu1  ;;  %v2608_v47 = vsel %vm2335_vm4, %v3877_v15, -inf }
 0x4b7   : > { %2609 = vmax.xlane.f32.xlu1 %v2608_v47  ;;  %v2602_v32 = vsel %vm2335_vm4, %v5683_v20, -inf }
 0x4b9   : > { %2606 = vmax.xlane.f32.xlu0 %v2605_v36 }
 0x4bb   : > { %2603 = vmax.xlane.f32.xlu1 %v2602_v32 }
 0x4bd   : > { %2600 = vmax.xlane.f32.xlu0 %v2599_v44 }
 0x4cb   : > { %v5692_v14 = vpop.f32.mrb[8].mxu1 }
 0x4cc   : > { %v5694_v46 = vpop.f32.mrb[9].mxu1  ;;  %v2879_v33 = vsel %vm2335_vm4, %v5692_v14, -inf }
 0x4cd   : > { %2880 = vmax.xlane.f32.xlu0 %v2879_v33  ;;  %v5698_v43 = vpop.f32.mrb[10].mxu1  ;;  %v2873_v51 = vsel %vm2335_vm4, %v5694_v46, -inf }
 0x4ce   : > { %v5700_v50 = vpop.f32.mrb[11].mxu1  ;;  %v2882_v37 = vsel %vm2335_vm4, %v5698_v43, -inf }
 0x4cf   : > { %2883 = vmax.xlane.f32.xlu1 %v2882_v37  ;;  %v2876_v39 = vsel %vm2335_vm4, %v5700_v50, -inf }
 0x4d1   : > { %2874 = vmax.xlane.f32.xlu0 %v2873_v51 }
 0x4d3   : > { %v5708_v7 = vpop.f32.mrb[12].mxu1  ;;  %2877 = vmax.xlane.f32.xlu1 %v2876_v39 }
 0x4d4   : > { %v5710_v45 = vpop.f32.mrb[13].mxu1  ;;  %v2891_v27 = vsel %vm2335_vm4, %v5708_v7, -inf }
 0x4d5   : > { %2892 = vmax.xlane.f32.xlu0 %v2891_v27  ;;  %v5714_v17 = vpop.f32.mrb[14].mxu1  ;;  %v2885_v10 = vsel %vm2335_vm4, %v5710_v45, -inf }
 0x4d6   : > { %v5716_v61 = vpop.f32.mrb[15].mxu1  ;;  %v2894_v62 = vsel %vm2335_vm4, %v5714_v17, -inf }
 0x4d7   : > { %v2888_v6 = vsel %vm2335_vm4, %v5716_v61, -inf }
 0x4d9   : > { %2886 = vmax.xlane.f32.xlu0 %v2885_v10 }
 0x4e4   : > { %2965 = vrot.lane.b32.xlu1 %v5623_v22, %s4200_s28 }
 0x4ef   : > { %2685 = vrot.lane.b32.xlu0 %v5629_v60, %s4196_s26 }
 0x508   : > { %2895 = vmax.xlane.f32.xlu1 %v2894_v62 }
 0x50c   : > { %2889 = vmax.xlane.f32.xlu1 %v2888_v6 }
 0x51d   : > { %2967 = vrot.lane.b32.xlu1 %v5621_v40, %s4200_s28 }
 0x53a   : > { %v2595_v28 = vpop.xlane.xlu0 %2594 }
 0x53b   : > { %v2613_v25 = vsub.f32 %v3872_v26, %v2595_v28 }
 0x53d   : > { %v2623_v35 = vmul.f32 1.442695, %v2613_v25  ;;  %v2592_v41 = vpop.xlane.xlu1 %2591 }
 0x53e   : > { %v2589_v3 = vpop.xlane.xlu0 %2588  ;;  %v2612_v59 = vsub.f32 %v2559_v29, %v2592_v41 }
 0x53f   : > { %4080 = vpow2.f32 %v2623_v35  ;;  %v2611_v22 = vsub.f32 %v2556_v38, %v2589_v3 }
 0x540   : > { %v2621_v53 = vmul.f32 1.442695, %v2612_v59 }
 0x541   : > { %v2619_v57 = vmul.f32 1.442695, %v2611_v22 }
 0x542   : > { %v2598_v1 = vpop.xlane.xlu0 %2597 }
 0x543   : > { %4082 = vpow2.f32 %v2619_v57  ;;  %v2614_v19 = vsub.f32 %v3873_v11, %v2598_v1 }
 0x544   : > { %v2610_v31 = vpop.xlane.xlu1 %2609 }
 0x545   : > { %v2625_v48 = vmul.f32 1.442695, %v2614_v19  ;;  %v2618_v54 = vsub.f32 %v3877_v15, %v2610_v31 }
 0x546   : > { %v2607_v58 = vpop.xlane.xlu0 %2606 }
 0x547   : > { %4084 = vpow2.f32 %v2625_v48  ;;  %v2617_v40 = vsub.f32 %v5678_v8, %v2607_v58  ;;  %v2633_v16 = vmul.f32 1.442695, %v2618_v54 }
 0x548   : > { %v2604_v5 = vpop.xlane.xlu1 %2603  ;;  %4086 = vpow2.f32 %v2621_v53 }
 0x549   : > { %v5731_v42 = vpop.eup %4080  ;;  %v2631_v13 = vmul.f32 1.442695, %v2617_v40  ;;  %v2616_v18 = vsub.f32 %v5683_v20, %v2604_v5 }
 0x54a   : > { %v2601_v12 = vpop.xlane.xlu0 %2600  ;;  %v2641_v52 = vsel %vm2335_vm4, %v5731_v42, 0.0 }
 0x54b   : > { %4088 = vpow2.f32 %v2631_v13  ;;  %v2615_v2 = vsub.f32 %v5680_v9, %v2601_v12  ;;  %2642 = vadd.xlane.f32.xlu0 %v2641_v52  ;;  %v2629_v34 = vmul.f32 1.442695, %v2616_v18 }
 0x54c   : > { %4090 = vpow2.f32 %v2633_v16 }
 0x54d   : > { %v5737_v21 = vpop.eup %4082  ;;  %v2627_v30 = vmul.f32 1.442695, %v2615_v2 }
 0x54e   : > { %v2635_v63 = vsel %vm2335_vm4, %v5737_v21, 0.0 }
 0x54f   : > { %4092 = vpow2.f32 %v2627_v30  ;;  %2636 = vadd.xlane.f32.xlu0 %v2635_v63 }
 0x550   : > { %4094 = vpow2.f32 %v2629_v34 }
 0x551   : > { %v5741_v49 = vpop.eup %4084 }
 0x552   : > { %v2644_v0 = vsel %vm2335_vm4, %v5741_v49, 0.0  ;;  %v5745_v26 = vpop.eup %4086 }
 0x553   : > { %2645 = vadd.xlane.f32.xlu1 %v2644_v0  ;;  %v2638_v11 = vsel %vm2335_vm4, %v5745_v26, 0.0 }
 0x555   : > { %v5747_v38 = vpop.eup %4088 }
 0x556   : > { %v2653_v56 = vsel %vm2335_vm4, %v5747_v38, 0.0  ;;  %v5753_v29 = vpop.eup %4090 }
 0x557   : > { %2654 = vadd.xlane.f32.xlu0 %v2653_v56  ;;  %2639 = vadd.xlane.f32.xlu1 %v2638_v11  ;;  %v2656_v9 = vsel %vm2335_vm4, %v5753_v29, 0.0 }
 0x559   : > { %v5755_v4 = vpop.eup %4092 }
 0x55a   : > { %v2881_v55 = vpop.xlane.xlu0 %2880  ;;  %v2647_v8 = vsel %vm2335_vm4, %v5755_v4, 0.0  ;;  %v5761_v24 = vpop.eup %4094 }
 0x55b   : > { %v2899_v15 = vsub.f32 %v5692_v14, %v2881_v55  ;;  %2648 = vadd.xlane.f32.xlu0 %v2647_v8  ;;  %2657 = vadd.xlane.f32.xlu1 %v2656_v9  ;;  %v2650_v44 = vsel %vm2335_vm4, %v5761_v24, 0.0 }
 0x55c   : > { %v2884_v20 = vpop.xlane.xlu1 %2883 }
 0x55d   : > { %v2909_v47 = vmul.f32 1.442695, %v2899_v15  ;;  %v2900_v36 = vsub.f32 %v5698_v43, %v2884_v20 }
 0x55e   : > { %v2875_v32 = vpop.xlane.xlu0 %2874 }
 0x55f   : > { %4096 = vpow2.f32 %v2909_v47  ;;  %v2897_v33 = vsub.f32 %v5694_v46, %v2875_v32  ;;  %2651 = vadd.xlane.f32.xlu1 %v2650_v44  ;;  %v2911_v51 = vmul.f32 1.442695, %v2900_v36 }
 0x560   : > { %v2878_v37 = vpop.xlane.xlu1 %2877 }
 0x561   : > { %v2905_v39 = vmul.f32 1.442695, %v2897_v33  ;;  %v2898_v27 = vsub.f32 %v5700_v50, %v2878_v37 }
 0x562   : > { %v2893_v14 = vpop.xlane.xlu0 %2892 }
 0x563   : > { %4098 = vpow2.f32 %v2905_v39  ;;  %v2903_v10 = vsub.f32 %v5708_v7, %v2893_v14  ;;  %v2907_v62 = vmul.f32 1.442695, %v2898_v27 }
 0x564   : > { %4100 = vpow2.f32 %v2911_v51  ;;  %v5775_v50 = vpop.permute.xlu1 %2965 }
 0x565   : > { %v2917_v43 = vmul.f32 1.442695, %v2903_v10 }
 0x566   : > { %v2887_v6 = vpop.xlane.xlu0 %2886 }
 0x567   : > { %4102 = vpow2.f32 %v2917_v43  ;;  %v2901_v28 = vsub.f32 %v5710_v45, %v2887_v6 }
 0x568   : > { %4104 = vpow2.f32 %v2907_v62 }
 0x569   : > { %v5771_v25 = vpop.eup %4096  ;;  %v2913_v46 = vmul.f32 1.442695, %v2901_v28 }
 0x56a   : > { %v2686_v35 = vpop.permute.xlu0 %2685  ;;  %v2927_v41 = vsel %vm2335_vm4, %v5771_v25, 0.0 }
 0x56b   : > { %4106 = vpow2.f32 %v2913_v46  ;;  %3884 = vmatprep.subr.bf16.mxu0 %v2686_v35  ;;  %2928 = vadd.xlane.f32.xlu1 %v2927_v41 }
 0x56c   : > { %3885 = vmatpush3.bf16.msra.mxu0 %v2686_v35 }
 0x56d   : > { %v5777_v7 = vpop.eup %4098  ;;  %3910 = vmatprep.subr.bf16.mxu0 %v5775_v50 }
 0x56e   : > { %v2921_v45 = vsel %vm2335_vm4, %v5777_v7, 0.0  ;;  %v5782_v3 = vpop.eup %4100 }
 0x56f   : > { %2922 = vadd.xlane.f32.xlu1 %v2921_v45  ;;  %v2930_v57 = vsel %vm2335_vm4, %v5782_v3, 0.0 }
 0x571   : > { %v5784_v22 = vpop.eup %4102 }
 0x572   : > { %v2939_v59 = vsel %vm2335_vm4, %v5784_v22, 0.0  ;;  %v5790_v1 = vpop.eup %4104 }
 0x573   : > { %2940 = vadd.xlane.f32.xlu0 %v2939_v59  ;;  %2931 = vadd.xlane.f32.xlu1 %v2930_v57  ;;  %v2924_v53 = vsel %vm2335_vm4, %v5790_v1, 0.0 }
 0x575   : > { %v5792_v19 = vpop.eup %4106 }
 0x576   : > { %v2933_v31 = vsel %vm2335_vm4, %v5792_v19, 0.0 }
 0x577   : > { %2934 = vadd.xlane.f32.xlu0 %v2933_v31  ;;  %2925 = vadd.xlane.f32.xlu1 %v2924_v53 }
 0x595   : > { %v2896_v48 = vpop.xlane.xlu1 %2895 }
 0x596   : > { %v2904_v54 = vsub.f32 %v5714_v17, %v2896_v48 }
 0x598   : > { %v2919_v58 = vmul.f32 1.442695, %v2904_v54 }
 0x599   : > { %v2890_v40 = vpop.xlane.xlu1 %2889 }
 0x59a   : > { %4108 = vpow2.f32 %v2919_v58  ;;  %v2902_v5 = vsub.f32 %v5716_v61, %v2890_v40 }
 0x59c   : > { %v2915_v16 = vmul.f32 1.442695, %v2902_v5 }
 0x59d   : > { %v2968_v61 = vpop.permute.xlu1 %2967 }
 0x59e   : > { %4110 = vpow2.f32 %v2915_v16 }
 0x5a4   : > { %v5800_v13 = vpop.eup %4108 }
 0x5a5   : > { %v2942_v18 = vsel %vm2335_vm4, %v5800_v13, 0.0 }
 0x5a6   : > { %2943 = vadd.xlane.f32.xlu0 %v2942_v18 }
 0x5a8   : > { %v5804_v12 = vpop.eup %4110 }
 0x5a9   : > { %v2936_v52 = vsel %vm2335_vm4, %v5804_v12, 0.0 }
 0x5aa   : > { %2937 = vadd.xlane.f32.xlu1 %v2936_v52 }
 0x5bb   : > { %2971 = vrot.lane.b32.xlu1 %v5629_v60, %s4200_s28 }
 0x5bc   : > { %2969 = vrot.lane.b32.xlu0 %v5631_v23, %s4200_s28 }
 0x5d8   : > { %v2643_v17 = vpop.xlane.xlu0 %2642 }
 0x5dc   : > { %v2637_v2 = vpop.xlane.xlu0 %2636 }
 0x5e0   : > { %v2646_v34 = vpop.xlane.xlu1 %2645 }
 0x5e1   : > { %4112 = vrcp.f32 %v2646_v34 }
 0x5e2   : > { %4114 = vrcp.f32 %v2637_v2 }
 0x5e3   : > { %4116 = vrcp.f32 %v2643_v17 }
 0x5e4   : > { %v2655_v30 = vpop.xlane.xlu0 %2654  ;;  %v2640_v63 = vpop.xlane.xlu1 %2639 }
 0x5e5   : > { %4118 = vrcp.f32 %v2640_v63 }
 0x5e8   : > { %v2649_v0 = vpop.xlane.xlu0 %2648  ;;  %v2658_v56 = vpop.xlane.xlu1 %2657 }
 0x5e9   : > { %4120 = vrcp.f32 %v2649_v0 }
 0x5ea   : > { %4122 = vrcp.f32 %v2658_v56 }
 0x5eb   : > { %4124 = vrcp.f32 %v2655_v30  ;;  %v4113_v60 = vpop.eup %4112 }
 0x5ec   : > { %v2652_v11 = vpop.xlane.xlu1 %2651  ;;  %v4115_v55 = vpop.eup %4114  ;;  %v2670_v9 = vmul.f32 %v4113_v60, %v5741_v49 }
 0x5ed   : > { %4126 = vrcp.f32 %v2652_v11  ;;  %v4117_v23 = vpop.eup %4116  ;;  %v2667_v15 = vmul.f32 %v4115_v55, %v5737_v21 }
 0x5ee   : > { %v2669_v47 = vmul.f32 %v4117_v23, %v5731_v42 }
 0x5ef   : > { %v4119_v8 = vpop.eup %4118 }
 0x5f0   : > { %v2668_v20 = vmul.f32 %v4119_v8, %v5745_v26  ;;  %v2676_v44 = vpack.c.bf16 %v2670_v9, %v2669_v47 }
 0x5f2   : > { %v2675_v36 = vpack.c.bf16 %v2668_v20, %v2667_v15 }
 0x5f3   : > { %v4121_v32 = vpop.eup %4120 }
 0x5f4   : > { %v4123_v33 = vpop.eup %4122  ;;  %3886 = vmatprep.mubr.msk.bf16.mxu0 %vm2335_vm4, %v2675_v36  ;;  %v2671_v21 = vmul.f32 %v4121_v32, %v5755_v4 }
 0x5f5   : > { %v4125_v37 = vpop.eup %4124  ;;  %3887 = vmatmul.mubr.msk.bf16.vlgmr.msra.gmra.mrb[8].mxu0 %vm2335_vm4, %v2676_v44  ;;  %v2674_v42 = vmul.f32 %v4123_v33, %v5753_v29 }
 0x5f6   : > { %3911 = vmatpush3.bf16.msra.mxu0 %v5775_v50  ;;  %v2673_v27 = vmul.f32 %v4125_v37, %v5747_v38 }
 0x5f7   : > { %v4127_v51 = vpop.eup %4126  ;;  %3912 = vmatprep.subr.bf16.mxu0 %v2968_v61 }
 0x5f8   : > { %v2929_v49 = vpop.xlane.xlu1 %2928  ;;  %v2672_v26 = vmul.f32 %v4127_v51, %v5761_v24  ;;  %v2678_v10 = vpack.c.bf16 %v2674_v42, %v2673_v27 }
 0x5fa   : > { %v2677_v39 = vpack.c.bf16 %v2672_v26, %v2671_v21  ;;  %3913 = vmatpush3.bf16.msra.mxu0 %v2968_v61 }
 0x5fc   : > { %3890 = vmatprep.mubr.msk.bf16.mxu0 %vm2335_vm4, %v2677_v39  ;;  %v2923_v14 = vpop.xlane.xlu1 %2922 }
 0x5fd   : > { %3891 = vmatmul.mubr.msk.bf16.gmra.mrb[12].mxu0 %vm2335_vm4, %v2678_v10  ;;  %4128 = vrcp.f32 %v2923_v14 }
 0x600   : > { %v2932_v62 = vpop.xlane.xlu1 %2931  ;;  %v2941_v38 = vpop.xlane.xlu0 %2940 }
 0x604   : > { %v2926_v43 = vpop.xlane.xlu1 %2925  ;;  %v2935_v46 = vpop.xlane.xlu0 %2934 }
 0x605   : > { %4130 = vrcp.f32 %v2926_v43 }
 0x606   : > { %4132 = vrcp.f32 %v2932_v62 }
 0x607   : > { %v4129_v6 = vpop.eup %4128  ;;  %4134 = vrcp.f32 %v2929_v49 }
 0x608   : > { %v2953_v24 = vmul.f32 %v4129_v6, %v5777_v7 }
 0x60f   : > { %v4131_v4 = vpop.eup %4130 }
 0x610   : > { %v2954_v29 = vmul.f32 %v4131_v4, %v5790_v1  ;;  %v4133_v41 = vpop.eup %4132 }
 0x611   : > { %v4135_v59 = vpop.eup %4134  ;;  %v2956_v7 = vmul.f32 %v4133_v41, %v5782_v3  ;;  %v3751_v41 = vld [vmem:[%s6073_s8] ss:$0 sm:$0xff] }
 0x612   : > { %v2961_v28 = vpack.c.bf16 %v2954_v29, %v2953_v24  ;;  %v2955_v1 = vmul.f32 %v4135_v59, %v5771_v25  ;;  %v4056_v25 = vld [vmem:[%s6072_s7] sm:$0xff]  }
 0x614   : > { %3918 = vmatprep.mubr.msk.bf16.mxu0 %vm2335_vm4, %v2961_v28  ;;  %v2962_v31 = vpack.c.bf16 %v2956_v7, %v2955_v1 }
 0x633   : > { %v2944_v35 = vpop.xlane.xlu0 %2943 }
 0x634   : > { %4136 = vrcp.f32 %v2944_v35 }
 0x635   : > { %4138 = vrcp.f32 %v2935_v46 }
 0x636   : > { %4140 = vrcp.f32 %v2941_v38 }
 0x637   : > { %v2970_v50 = vpop.permute.xlu0 %2969  ;;  %v2938_v45 = vpop.xlane.xlu1 %2937 }
 0x638   : > { %4142 = vrcp.f32 %v2938_v45  ;;  %3914 = vmatprep.subr.bf16.mxu0 %v2970_v50 }
 0x639   : > { %3915 = vmatpush3.bf16.msra.mxu0 %v2970_v50 }
 0x63b   : > { %v2972_v57 = vpop.permute.xlu1 %2971 }
 0x63c   : > { %3916 = vmatprep.subr.bf16.mxu0 %v2972_v57 }
 0x63d   : > { %3917 = vmatpush3.bf16.msra.mxu0 %v2972_v57 }
 0x63e   : > { %v4137_v53 = vpop.eup %4136  ;;  %3926 = vmatprep.subr.bf16.mxu0 %v4056_v25 }
 0x63f   : > { %v4139_v48 = vpop.eup %4138  ;;  %v2960_v40 = vmul.f32 %v4137_v53, %v5800_v13  ;;  %v4057_v13 = vld [vmem:[%s6072_s7 + $0x8] sm:$0xff]  }
 0x640   : > { %3919 = vmatmul.mubr.msk.bf16.vlgmr.msra.gmra.mrb[16].mxu0 %vm2335_vm4, %v2962_v31  ;;  %v4141_v54 = vpop.eup %4140  ;;  %v2957_v5 = vmul.f32 %v4139_v48, %v5792_v19  ;;  %v4178_v31 = vld [vmem:[%s4298_s23] sm:$0xff] }
 0x641   : > { %v2959_v3 = vmul.f32 %v4141_v54, %v5784_v22  ;;  %3927 = vmatpush3.bf16.msra.mxu0 %v4056_v25  ;;  %v4179_v54 = vld [vmem:[%s4298_s23 + $0x10] sm:$0xff] }
 0x642   : > { %v4143_v58 = vpop.eup %4142  ;;  %3928 = vmatprep.subr.bf16.mxu0 %v4057_v13 }
 0x643   : > { %v2958_v16 = vmul.f32 %v4143_v58, %v5804_v12  ;;  %v2964_v52 = vpack.c.bf16 %v2960_v40, %v2959_v3 }
 0x645   : > { %v2963_v18 = vpack.c.bf16 %v2958_v16, %v2957_v5  ;;  %3929 = vmatpush3.bf16.msra.mxu0 %v4057_v13  ;;  %v4180_v5 = vld [vmem:[%s4298_s23 + $0x8] sm:$0xff]  ;;  %v4181_v13 = vld [vmem:[%s4298_s23 + $0x18] sm:$0xff] }
 0x647   : > { %3922 = vmatprep.mubr.msk.bf16.mxu0 %vm2335_vm4, %v2963_v18 }
 0x648   : > { %3923 = vmatmul.mubr.msk.bf16.gmra.mrb[20].mxu0 %vm2335_vm4, %v2964_v52 }
 0x6c8   : > { %v3888_v19 = vpop.f32.mrb[8].mxu0 }
 0x6c9   : > { %v2737_v22 = vpop.f32.mrb[9].mxu0 }
 0x6ca   : > { %v3889_v12 = vpop.f32.mrb[10].mxu0 }
 0x6cb   : > { %v2740_v17 = vpop.f32.mrb[11].mxu0 }
 0x6d0   : > { %v3892_v61 = vpop.f32.mrb[12].mxu0 }
 0x6d1   : > { %v2753_v2 = vpop.f32.mrb[13].mxu0 }
 0x6d2   : > { %v3893_v34 = vpop.f32.mrb[14].mxu0 }
 0x6d3   : > { %v2756_v30 = vpop.f32.mrb[15].mxu0 }
 0x713   : > { %v3920_v63 = vpop.f32.mrb[16].mxu0 }
 0x714   : > { %v3023_v0 = vpop.f32.mrb[17].mxu0 }
 0x715   : > { %v3921_v56 = vpop.f32.mrb[18].mxu0 }
 0x716   : > { %v4035_v11 = vpack.i.bf16 %v3921_v56, %v3920_v63  ;;  %v3026_v60 = vpop.f32.mrb[19].mxu0  ;;  %v4182_v63 = vld [vmem:[%s4298_s23 + $0x20] sm:$0xff]  ;;  %v4183_v56 = vld [vmem:[%s4298_s23 + $0x28] sm:$0xff] }
 0x717   : > { %v4030_v55 = vpack.i.bf16 %v3026_v60, %v3023_v0 }
 0x718   : > { %4036 = vrot.lane.b32.xlu1 %v4035_v11, %s4201_s17 }
 0x719   : > { %4031 = vrot.lane.b32.xlu0 %v4030_v55, %s4201_s17  ;;  %v4184_v55 = vld [vmem:[%s4298_s23 + $0x38] sm:$0xff] }
 0x71b   : > { %v3924_v23 = vpop.f32.mrb[20].mxu0 }
 0x71c   : > { %v3039_v8 = vpop.f32.mrb[21].mxu0 }
 0x71d   : > { %v3925_v9 = vpop.f32.mrb[22].mxu0 }
 0x71e   : > { %v4045_v15 = vpack.i.bf16 %v3925_v9, %v3924_v23  ;;  %v3042_v20 = vpop.f32.mrb[23].mxu0  ;;  %v4185_v9 = vld [vmem:[%s4298_s23 + $0x30] sm:$0xff] }
 0x71f   : > { %v4040_v47 = vpack.i.bf16 %v3042_v20, %v3039_v8 }
 0x720   : > { %4046 = vrot.lane.b32.xlu1 %v4045_v15, %s4201_s17 }
 0x721   : > { %4041 = vrot.lane.b32.xlu0 %v4040_v47, %s4201_s17 }
 0x78a   : > { %v4037_v36 = vpop.permute.xlu1 %4036 }
 0x78b   : > { %v4039_v32 = vunpack.i.h.bf16 %v4037_v36  ;;  %v4038_v44 = vunpack.i.l.bf16 %v4037_v36  ;;  %v4032_v33 = vpop.permute.xlu0 %4031 }
 0x78c   : > { %v4034_v37 = vunpack.i.h.bf16 %v4032_v33  ;;  %v4033_v51 = vunpack.i.l.bf16 %v4032_v33 }
 0x78d   : > { %v3089_v49 = vsel %vm2497_vm6, %v3889_v12, %v4039_v32  ;;  %v3088_v21 = vsel %vm2497_vm6, %v3888_v19, %v4038_v44 }
 0x78e   : > { %v3095_v26 = vpack.c.bf16 %v3089_v49, %v3088_v21  ;;  %v3087_v42 = vsel %vm2497_vm6, %v2740_v17, %v4034_v37  ;;  %v3086_v39 = vsel %vm2497_vm6, %v2737_v22, %v4033_v51 }
 0x78f   : > { %v3094_v27 = vpack.c.bf16 %v3087_v42, %v3086_v39 }
 0x791   : > { %3930 = vmatprep.mubr.msk.bf16.mxu0 %vm506_vm0, %v3094_v27 }
 0x792   : > { %3931 = vmatmul.mubr.msk.bf16.vlgmr.msra.gmra.mrb[24].mxu0 %vm506_vm0, %v3095_v26  ;;  %v4047_v14 = vpop.permute.xlu1 %4046 }
 0x793   : > { %v4049_v10 = vunpack.i.h.bf16 %v4047_v14  ;;  %v4048_v62 = vunpack.i.l.bf16 %v4047_v14  ;;  %v4042_v43 = vpop.permute.xlu0 %4041 }
 0x794   : > { %v4044_v6 = vunpack.i.h.bf16 %v4042_v43  ;;  %v4043_v4 = vunpack.i.l.bf16 %v4042_v43 }
 0x795   : > { %v3093_v24 = vsel %vm2497_vm6, %v3893_v34, %v4049_v10  ;;  %v3092_v29 = vsel %vm2497_vm6, %v3892_v61, %v4048_v62 }
 0x796   : > { %v3097_v28 = vpack.c.bf16 %v3093_v24, %v3092_v29  ;;  %v3091_v38 = vsel %vm2497_vm6, %v2756_v30, %v4044_v6  ;;  %v3090_v46 = vsel %vm2497_vm6, %v2753_v2, %v4043_v4 }
 0x797   : > { %v3096_v35 = vpack.c.bf16 %v3091_v38, %v3090_v46 }
 0x799   : > { %3934 = vmatprep.mubr.msk.bf16.mxu0 %vm506_vm0, %v3096_v35 }
 0x79a   : > { %3935 = vmatmul.mubr.msk.bf16.gmra.mrb[28].mxu0 %vm506_vm0, %v3097_v28 }
 0x865   : > { %v3932_v50 = vpop.f32.mrb[24].mxu0 }
 0x866   : > { %v3167_v45 = vpop.f32.mrb[25].mxu0  ;;  %v3176_v59 = vadd.f32 %v3932_v50, %v3751_v41 }
 0x867   : > { %v3168_v7 = vadd.f32 %v3751_v41, %v3167_v45  ;;  %v3933_v57 = vpop.f32.mrb[26].mxu0 }
 0x868   : > { %v3170_v1 = vpop.f32.mrb[27].mxu0  ;;  %v5862_v58 = vadd.f32 %v4179_v54, %v3176_v59  ;;  %v3179_v40 = vadd.f32 %v3933_v57, %v3751_v41 }
 0x869   : > { %v5859_v53 = vadd.f32 %v4178_v31, %v3168_v7  ;;  %v3171_v48 = vadd.f32 %v3751_v41, %v3170_v1 }
 0x86a   : > { %v5872_v19 = vadd.f32 %v4181_v13, %v3179_v40  ;;  %v3214_v17 = vsel %vm506_vm0, %v5862_v58, 0.0 }
 0x86b   : > { %v5865_v16 = vadd.f32 %v4180_v5, %v3171_v48  ;;  %v3208_v3 = vsel %vm506_vm0, %v5859_v53, 0.0 }
 0x86c   : > { %3209 = vadd.xlane.f32.xlu0 %v3208_v3  ;;  %v3217_v60 = vsel %vm506_vm0, %v5872_v19, 0.0 }
 0x86d   : > { %v3936_v18 = vpop.f32.mrb[28].mxu0  ;;  %v3211_v52 = vsel %vm506_vm0, %v5865_v16, 0.0 }
 0x86e   : > { %v3183_v25 = vpop.f32.mrb[29].mxu0  ;;  %3212 = vadd.xlane.f32.xlu1 %v3211_v52  ;;  %v3192_v30 = vadd.f32 %v3936_v18, %v3751_v41 }
 0x86f   : > { %v3184_v22 = vadd.f32 %v3751_v41, %v3183_v25  ;;  %v3937_v12 = vpop.f32.mrb[30].mxu0 }
 0x870   : > { %v3186_v61 = vpop.f32.mrb[31].mxu0  ;;  %3215 = vadd.xlane.f32.xlu0 %v3214_v17  ;;  %v3195_v2 = vadd.f32 %v3937_v12, %v3751_v41  ;;  %v5890_v15 = vadd.f32 %v4185_v9, %v3192_v30  ;;  %v4059_v12 = vld [vmem:[%s6076_s11 + $0x8] sm:$0xff]  }
 0x871   : > { %v3187_v34 = vadd.f32 %v3751_v41, %v3186_v61  ;;  %v5877_v0 = vadd.f32 %v4182_v63, %v3184_v22  ;;  %v4058_v22 = vld [vmem:[%s6076_s11] sm:$0xff]  }
 0x872   : > { %v5885_v23 = vadd.f32 %v4184_v55, %v3195_v2  ;;  %v3226_v36 = vsel %vm506_vm0, %v5890_v15, 0.0  ;;  %3938 = vmatprep.subr.bf16.mxu1 %v4058_v22 }
 0x873   : > { %v5880_v11 = vadd.f32 %v4183_v56, %v3187_v34  ;;  %v3220_v20 = vsel %vm506_vm0, %v5877_v0, 0.0  ;;  %3939 = vmatpush3.bf16.msra.mxu1 %v4058_v22 }
 0x874   : > { %3218 = vadd.xlane.f32.xlu0 %v3217_v60  ;;  %v3229_v47 = vsel %vm506_vm0, %v5885_v23, 0.0  ;;  %3940 = vmatprep.subr.bf16.mxu1 %v4059_v12 }
 0x875   : > { %v3223_v8 = vsel %vm506_vm0, %v5880_v11, 0.0 }
 0x876   : > { %3224 = vadd.xlane.f32.xlu1 %v3223_v8 }
 0x877   : > { %3941 = vmatpush3.bf16.msra.mxu1 %v4059_v12 }
 0x878   : > { %3221 = vadd.xlane.f32.xlu0 %v3220_v20 }
 0x87a   : > { %3230 = vadd.xlane.f32.xlu1 %v3229_v47 }
 0x87c   : > { %3227 = vadd.xlane.f32.xlu0 %v3226_v36 }
 0x8f9   : > { %v3210_v32 = vpop.xlane.xlu0 %3209 }
 0x8fa   : > { %v3232_v44 = vmul.f32 0.03125, %v3210_v32 }
 0x8fb   : > { %v3213_v33 = vpop.xlane.xlu1 %3212 }
 0x8fc   : > { %v5899_v37 = vsub.f32 %v5859_v53, %v3232_v44  ;;  %v3233_v51 = vmul.f32 0.03125, %v3213_v33 }
 0x8fd   : > { %v3216_v49 = vpop.xlane.xlu0 %3215 }
 0x8fe   : > { %v5902_v21 = vsub.f32 %v5865_v16, %v3233_v51  ;;  %v3234_v26 = vmul.f32 0.03125, %v3216_v49  ;;  %v3248_v42 = vmul.f32 %v5899_v37, %v5899_v37  ;;  %v3758_v51 = vld [vmem:[%s6074_s9] ss:$0 sm:$0xff] }
 0x900   : > { %v5907_v39 = vsub.f32 %v5862_v58, %v3234_v26  ;;  %v3256_v27 = vsel %vm506_vm0, %v3248_v42, 0.0  ;;  %v3249_v14 = vmul.f32 %v5902_v21, %v5902_v21 }
 0x901   : > { %3257 = vadd.xlane.f32.xlu0 %v3256_v27  ;;  %v3219_v10 = vpop.xlane.xlu0 %3218 }
 0x902   : > { %v3235_v62 = vmul.f32 0.03125, %v3219_v10  ;;  %v3259_v43 = vsel %vm506_vm0, %v3249_v14, 0.0  ;;  %v3250_v6 = vmul.f32 %v5907_v39, %v5907_v39 }
 0x903   : > { %3260 = vadd.xlane.f32.xlu1 %v3259_v43  ;;  %v3225_v4 = vpop.xlane.xlu1 %3224 }
 0x904   : > { %v5916_v24 = vsub.f32 %v5872_v19, %v3235_v62  ;;  %v3237_v29 = vmul.f32 0.03125, %v3225_v4  ;;  %v3262_v28 = vsel %vm506_vm0, %v3250_v6, 0.0 }
 0x905   : > { %3263 = vadd.xlane.f32.xlu0 %v3262_v28  ;;  %v3222_v38 = vpop.xlane.xlu0 %3221  ;;  %v3759_v28 = vld [vmem:[%s6075_s10] ss:$0 sm:$0xff] }
 0x906   : > { %v5920_v46 = vsub.f32 %v5880_v11, %v3237_v29  ;;  %v3236_v35 = vmul.f32 0.03125, %v3222_v38  ;;  %v3251_v41 = vmul.f32 %v5916_v24, %v5916_v24 }
 0x907   : > { %v3231_v50 = vpop.xlane.xlu1 %3230 }
 0x908   : > { %v5925_v45 = vsub.f32 %v5877_v0, %v3236_v35  ;;  %v3239_v59 = vmul.f32 0.03125, %v3231_v50  ;;  %v3265_v7 = vsel %vm506_vm0, %v3251_v41, 0.0  ;;  %v3253_v57 = vmul.f32 %v5920_v46, %v5920_v46 }
 0x909   : > { %3266 = vadd.xlane.f32.xlu1 %v3265_v7  ;;  %v3228_v1 = vpop.xlane.xlu0 %3227 }
 0x90a   : > { %v5931_v31 = vsub.f32 %v5885_v23, %v3239_v59  ;;  %v3238_v48 = vmul.f32 0.03125, %v3228_v1  ;;  %v3252_v54 = vmul.f32 %v5925_v45, %v5925_v45  ;;  %v3271_v5 = vsel %vm506_vm0, %v3253_v57, 0.0 }
 0x90c   : > { %v5936_v40 = vsub.f32 %v5890_v15, %v3238_v48  ;;  %v3268_v3 = vsel %vm506_vm0, %v3252_v54, 0.0  ;;  %v3255_v18 = vmul.f32 %v5931_v31, %v5931_v31 }
 0x90d   : > { %3272 = vadd.xlane.f32.xlu1 %v3271_v5  ;;  %3269 = vadd.xlane.f32.xlu0 %v3268_v3 }
 0x90e   : > { %v3254_v52 = vmul.f32 %v5936_v40, %v5936_v40  ;;  %v3277_v25 = vsel %vm506_vm0, %v3255_v18, 0.0 }
 0x910   : > { %v3274_v13 = vsel %vm506_vm0, %v3254_v52, 0.0 }
 0x911   : > { %3278 = vadd.xlane.f32.xlu1 %v3277_v25  ;;  %3275 = vadd.xlane.f32.xlu0 %v3274_v13 }
 0x98e   : > { %v3258_v17 = vpop.xlane.xlu0 %3257 }
 0x98f   : > { %v3280_v61 = vmul.f32 0.03125, %v3258_v17 }
 0x990   : > { %v3261_v2 = vpop.xlane.xlu1 %3260 }
 0x991   : > { %v3288_v34 = vadd.f32 1e-05, %v3280_v61  ;;  %v3281_v30 = vmul.f32 0.03125, %v3261_v2 }
 0x992   : > { %v3264_v63 = vpop.xlane.xlu0 %3263 }
 0x993   : > { %4144 = vrsqrt.f32 %v3288_v34  ;;  %v3289_v56 = vadd.f32 1e-05, %v3281_v30  ;;  %v3282_v60 = vmul.f32 0.03125, %v3264_v63 }
 0x995   : > { %4146 = vrsqrt.f32 %v3289_v56  ;;  %v3290_v55 = vadd.f32 1e-05, %v3282_v60 }
 0x996   : > { %v3267_v8 = vpop.xlane.xlu1 %3266 }
 0x997   : > { %4148 = vrsqrt.f32 %v3290_v55  ;;  %v3283_v9 = vmul.f32 0.03125, %v3267_v8  ;;  %v4061_v55 = vld [vmem:[%s6078_s13 + $0x8] sm:$0xff]   ;;  %v4063_v8 = vld [vmem:[%s6078_s13 + $0x18] sm:$0xff]  }
 0x999   : > { %v3291_v20 = vadd.f32 1e-05, %v3283_v9  ;;  %v3760_v9 = vld [vmem:[%s6077_s12] ss:$0 sm:$0xff] }
 0x99a   : > { %v3273_v47 = vpop.xlane.xlu1 %3272  ;;  %v3270_v36 = vpop.xlane.xlu0 %3269 }
 0x99b   : > { %4150 = vrsqrt.f32 %v3291_v20  ;;  %v3285_v32 = vmul.f32 0.03125, %v3273_v47  ;;  %v3284_v44 = vmul.f32 0.03125, %v3270_v36 }
 0x99d   : > { %v4145_v33 = vpop.eup %4144  ;;  %v3293_v49 = vadd.f32 1e-05, %v3285_v32  ;;  %v3292_v26 = vadd.f32 1e-05, %v3284_v44 }
 0x99e   : > { %v3304_v42 = vmul.f32 %v4145_v33, %v5899_v37  ;;  %v3279_v27 = vpop.xlane.xlu1 %3278  ;;  %v3276_v14 = vpop.xlane.xlu0 %3275 }
 0x99f   : > { %v4147_v10 = vpop.eup %4146  ;;  %4152 = vrsqrt.f32 %v3293_v49  ;;  %v3287_v62 = vmul.f32 0.03125, %v3279_v27  ;;  %v3286_v43 = vmul.f32 0.03125, %v3276_v14 }
 0x9a0   : > { %v3305_v6 = vmul.f32 %v4147_v10, %v5902_v21  ;;  %4154 = vrsqrt.f32 %v3292_v26  ;;  %v3318_v4 = vmul.f32 %v3758_v51, %v3304_v42 }
 0x9a1   : > { %v4149_v29 = vpop.eup %4148  ;;  %v3295_v38 = vadd.f32 1e-05, %v3287_v62  ;;  %v3294_v35 = vadd.f32 1e-05, %v3286_v43 }
 0x9a2   : > { %v3306_v41 = vmul.f32 %v4149_v29, %v5907_v39  ;;  %v3319_v37 = vmul.f32 %v3758_v51, %v3305_v6  ;;  %v3332_v50 = vadd.f32 %v3759_v28, %v3318_v4 }
 0x9a3   : > { %4156 = vrsqrt.f32 %v3295_v38 }
 0x9a4   : > { %4158 = vrsqrt.f32 %v3294_v35  ;;  %v3333_v59 = vadd.f32 %v3759_v28, %v3319_v37  ;;  %v3320_v57 = vmul.f32 %v3758_v51, %v3306_v41 }
 0x9a5   : > { %v4151_v7 = vpop.eup %4150 }
 0x9a6   : > { %v3307_v21 = vmul.f32 %v4151_v7, %v5916_v24  ;;  %v3340_v1 = vpack.c.bf16 %v3333_v59, %v3332_v50  ;;  %v3334_v3 = vadd.f32 %v3759_v28, %v3320_v57 }
 0x9a8   : > { %v3321_v48 = vmul.f32 %v3758_v51, %v3307_v21  ;;  %3942 = vmatprep.mubr.msk.bf16.mxu1 %vm506_vm0, %v3340_v1 }
 0x9a9   : > { %v4153_v54 = vpop.eup %4152 }
 0x9aa   : > { %v4155_v5 = vpop.eup %4154  ;;  %v3335_v18 = vadd.f32 %v3759_v28, %v3321_v48  ;;  %v3309_v52 = vmul.f32 %v4153_v54, %v5920_v46 }
 0x9ab   : > { %v3308_v39 = vmul.f32 %v4155_v5, %v5925_v45 }
 0x9ac   : > { %v3341_v25 = vpack.c.bf16 %v3335_v18, %v3334_v3  ;;  %v3323_v13 = vmul.f32 %v3758_v51, %v3309_v52 }
 0x9ad   : > { %v4157_v22 = vpop.eup %4156  ;;  %v3322_v12 = vmul.f32 %v3758_v51, %v3308_v39 }
 0x9ae   : > { %v4159_v17 = vpop.eup %4158  ;;  %v3311_v61 = vmul.f32 %v4157_v22, %v5931_v31  ;;  %3943 = vmatmul.mubr.msk.bf16.vlgmr.msra.gmra.mrb[16].mxu1 %vm506_vm0, %v3341_v25  ;;  %v3337_v24 = vadd.f32 %v3759_v28, %v3323_v13  ;;  %v4060_v31 = vld [vmem:[%s6078_s13] sm:$0xff]  }
 0x9af   : > { %v3310_v2 = vmul.f32 %v4159_v17, %v5936_v40  ;;  %v3336_v34 = vadd.f32 %v3759_v28, %v3322_v12  ;;  %3950 = vmatprep.subr.bf16.mxu0 %v4060_v31  ;;  %v4062_v40 = vld [vmem:[%s6078_s13 + $0x10] sm:$0xff]  }
 0x9b0   : > { %v3325_v30 = vmul.f32 %v3758_v51, %v3311_v61  ;;  %3951 = vmatpush3.bf16.msra.mxu0 %v4060_v31 }
 0x9b1   : > { %v3342_v63 = vpack.c.bf16 %v3337_v24, %v3336_v34  ;;  %v3324_v56 = vmul.f32 %v3758_v51, %v3310_v2  ;;  %3952 = vmatprep.subr.bf16.mxu0 %v4061_v55 }
 0x9b2   : > { %v3339_v60 = vadd.f32 %v3759_v28, %v3325_v30 }
 0x9b3   : > { %3946 = vmatprep.mubr.msk.bf16.mxu1 %vm506_vm0, %v3342_v63  ;;  %v3338_v46 = vadd.f32 %v3759_v28, %v3324_v56 }
 0x9b4   : > { %3953 = vmatpush3.bf16.msra.mxu0 %v4061_v55 }
 0x9b5   : > { %v3343_v45 = vpack.c.bf16 %v3339_v60, %v3338_v46  ;;  %3954 = vmatprep.subr.bf16.mxu0 %v4062_v40 }
 0x9b7   : > { %3947 = vmatmul.mubr.msk.bf16.gmra.mrb[20].mxu1 %vm506_vm0, %v3343_v45 }
 0x9b8   : > { %3955 = vmatpush3.bf16.msra.mxu0 %v4062_v40 }
 0x9b9   : > { %3956 = vmatprep.subr.bf16.mxu0 %v4063_v8 }
 0x9bc   : > { %3957 = vmatpush3.bf16.msra.mxu0 %v4063_v8 }
 0xa81   : > { %v3944_v20 = vpop.f32.mrb[16].mxu1 }
 0xa82   : > { %v5985_v47 = vadd.f32 %v3944_v20, %v3760_v9  ;;  %v3413_v36 = vpop.f32.mrb[17].mxu1 }
 0xa83   : > { %v5987_v32 = vadd.f32 %v3760_v9, %v3413_v36  ;;  %v3945_v44 = vpop.f32.mrb[18].mxu1 }
 0xa84   : > { %v3446_v33 = vmul.f32 %v5985_v47, %v5985_v47  ;;  %v5991_v51 = vadd.f32 %v3945_v44, %v3760_v9  ;;  %v3416_v49 = vpop.f32.mrb[19].mxu1 }
 0xa85   : > { %v3444_v26 = vmul.f32 %v5987_v32, %v5987_v32  ;;  %v5995_v42 = vadd.f32 %v3760_v9, %v3416_v49 }
 0xa86   : > { %v3454_v27 = vmul.f32 %v3446_v33, %v5985_v47  ;;  %v3447_v14 = vmul.f32 %v5991_v51, %v5991_v51 }
 0xa87   : > { %v3452_v10 = vmul.f32 %v3444_v26, %v5987_v32  ;;  %v3445_v62 = vmul.f32 %v5995_v42, %v5995_v42 }
 0xa88   : > { %v3462_v43 = vmul.f32 0.044715, %v3454_v27  ;;  %v3455_v6 = vmul.f32 %v3447_v14, %v5991_v51 }
 0xa89   : > { %v3460_v4 = vmul.f32 0.044715, %v3452_v10  ;;  %v3453_v29 = vmul.f32 %v3445_v62, %v5995_v42 }
 0xa8a   : > { %v3470_v28 = vadd.f32 %v3462_v43, %v5985_v47  ;;  %v3463_v38 = vmul.f32 0.044715, %v3455_v6  ;;  %v3948_v35 = vpop.f32.mrb[20].mxu1 }
 0xa8b   : > { %v3468_v41 = vadd.f32 %v3460_v4, %v5987_v32  ;;  %v3461_v37 = vmul.f32 0.044715, %v3453_v29  ;;  %v6007_v50 = vadd.f32 %v3948_v35, %v3760_v9  ;;  %v3429_v59 = vpop.f32.mrb[21].mxu1 }
 0xa8c   : > { %v3478_v7 = vmul.f32 0.7978846, %v3470_v28  ;;  %v3471_v57 = vadd.f32 %v3463_v38, %v5991_v51  ;;  %v6010_v21 = vadd.f32 %v3760_v9, %v3429_v59  ;;  %v3949_v1 = vpop.f32.mrb[22].mxu1 }
 0xa8d   : > { %v3476_v48 = vmul.f32 0.7978846, %v3468_v41  ;;  %v3469_v54 = vadd.f32 %v3461_v37, %v5995_v42  ;;  %v3450_v5 = vmul.f32 %v6007_v50, %v6007_v50  ;;  %v6015_v3 = vadd.f32 %v3949_v1, %v3760_v9  ;;  %v3432_v18 = vpop.f32.mrb[23].mxu1 }
 0xa8e   : > { %4160 = vtanh.f32 %v3478_v7  ;;  %v3479_v52 = vmul.f32 0.7978846, %v3471_v57  ;;  %v3448_v39 = vmul.f32 %v6010_v21, %v6010_v21  ;;  %v3433_v25 = vadd.f32 %v3760_v9, %v3432_v18 }
 0xa8f   : > { %4162 = vtanh.f32 %v3476_v48  ;;  %v3477_v13 = vmul.f32 0.7978846, %v3469_v54  ;;  %v3458_v22 = vmul.f32 %v3450_v5, %v6007_v50  ;;  %v3451_v12 = vmul.f32 %v6015_v3, %v6015_v3 }
 0xa90   : > { %4164 = vtanh.f32 %v3479_v52  ;;  %v3456_v17 = vmul.f32 %v3448_v39, %v6010_v21  ;;  %v3449_v61 = vmul.f32 %v3433_v25, %v3433_v25 }
 0xa91   : > { %4166 = vtanh.f32 %v3477_v13  ;;  %v3466_v24 = vmul.f32 0.044715, %v3458_v22  ;;  %v3459_v2 = vmul.f32 %v3451_v12, %v6015_v3 }
 0xa92   : > { %v3464_v34 = vmul.f32 0.044715, %v3456_v17  ;;  %v3457_v30 = vmul.f32 %v3449_v61, %v3433_v25  ;;  %v3767_v17 = vld [vmem:[%s6079_s14] ss:$0 sm:$0xff] }
 0xa93   : > { %v3474_v63 = vadd.f32 %v3466_v24, %v6007_v50  ;;  %v3467_v56 = vmul.f32 0.044715, %v3459_v2 }
 0xa94   : > { %v3472_v60 = vadd.f32 %v3464_v34, %v6010_v21  ;;  %v3465_v46 = vmul.f32 0.044715, %v3457_v30 }
 0xa95   : > { %v3482_v45 = vmul.f32 0.7978846, %v3474_v63  ;;  %v3475_v31 = vadd.f32 %v3467_v56, %v6015_v3 }
 0xa96   : > { %v3480_v55 = vmul.f32 0.7978846, %v3472_v60  ;;  %v3473_v40 = vadd.f32 %v3465_v46, %v3433_v25 }
 0xa97   : > { %4168 = vtanh.f32 %v3482_v45  ;;  %v3483_v8 = vmul.f32 0.7978846, %v3475_v31 }
 0xa98   : > { %v4161_v9 = vpop.eup %4160  ;;  %4170 = vtanh.f32 %v3480_v55  ;;  %v3481_v20 = vmul.f32 0.7978846, %v3473_v40 }
 0xa99   : > { %v4163_v36 = vpop.eup %4162  ;;  %v3494_v44 = vadd.f32 1.0, %v4161_v9  ;;  %4172 = vtanh.f32 %v3483_v8 }
 0xa9a   : > { %v4165_v33 = vpop.eup %4164  ;;  %v3492_v49 = vadd.f32 1.0, %v4163_v36  ;;  %4174 = vtanh.f32 %v3481_v20 }
 0xa9b   : > { %v4167_v26 = vpop.eup %4166  ;;  %v3502_v27 = vmul.f32 0.5, %v3494_v44  ;;  %v3495_v14 = vadd.f32 1.0, %v4165_v33 }
 0xa9c   : > { %v3500_v10 = vmul.f32 0.5, %v3492_v49  ;;  %v3493_v62 = vadd.f32 1.0, %v4167_v26 }
 0xa9d   : > { %v3503_v43 = vmul.f32 0.5, %v3495_v14  ;;  %v3510_v4 = vmul.f32 %v3502_v27, %v5985_v47 }
 0xa9e   : > { %v3501_v6 = vmul.f32 0.5, %v3493_v62  ;;  %v3508_v28 = vmul.f32 %v3500_v10, %v5987_v32 }
 0xa9f   : > { %v3511_v29 = vmul.f32 %v3503_v43, %v5991_v51 }
 0xaa0   : > { %v3509_v38 = vmul.f32 %v3501_v6, %v5995_v42 }
 0xaa1   : > { %v4169_v35 = vpop.eup %4168  ;;  %v3517_v41 = vpack.c.bf16 %v3511_v29, %v3510_v4 }
 0xaa2   : > { %v4171_v37 = vpop.eup %4170  ;;  %v3498_v59 = vadd.f32 1.0, %v4169_v35  ;;  %v3516_v7 = vpack.c.bf16 %v3509_v38, %v3508_v28 }
 0xaa3   : > { %v4173_v57 = vpop.eup %4172  ;;  %v3496_v1 = vadd.f32 1.0, %v4171_v37 }
 0xaa4   : > { %v4175_v48 = vpop.eup %4174  ;;  %v3506_v54 = vmul.f32 0.5, %v3498_v59  ;;  %v3499_v5 = vadd.f32 1.0, %v4173_v57  ;;  %3958 = vmatprep.mubr.msk.bf16.mxu0 %vm2335_vm4, %v3516_v7 }
 0xaa5   : > { %v3504_v18 = vmul.f32 0.5, %v3496_v1  ;;  %v3497_v47 = vadd.f32 1.0, %v4175_v48  ;;  %3959 = vmatmul.mubr.msk.bf16.vlgmr.msra.gmra.mrb[32].mxu0 %vm2335_vm4, %v3517_v41 }
 0xaa6   : > { %v3507_v32 = vmul.f32 0.5, %v3499_v5  ;;  %v3514_v42 = vmul.f32 %v3506_v54, %v6007_v50 }
 0xaa7   : > { %v3505_v51 = vmul.f32 0.5, %v3497_v47  ;;  %v3512_v39 = vmul.f32 %v3504_v18, %v6010_v21 }
 0xaa8   : > { %v3515_v52 = vmul.f32 %v3507_v32, %v6015_v3 }
 0xaa9   : > { %v3513_v13 = vmul.f32 %v3505_v51, %v3433_v25 }
 0xaaa   : > { %v3519_v22 = vpack.c.bf16 %v3515_v52, %v3514_v42 }
 0xaab   : > { %v3518_v12 = vpack.c.bf16 %v3513_v13, %v3512_v39 }
 0xaad   : > { %3962 = vmatprep.mubr.msk.bf16.mxu0 %vm2335_vm4, %v3518_v12 }
 0xaae   : > { %3963 = vmatmul.mubr.msk.bf16.gmra.mrb[36].mxu0 %vm2335_vm4, %v3519_v22 }
 0xb78   : > { %v3960_v61 = vpop.f32.mrb[32].mxu0 }
 0xb79   : > { %v3614_v24 = vadd.f32 %v3960_v61, %v3767_v17  ;;  %v3605_v2 = vpop.f32.mrb[33].mxu0 }
 0xb7a   : > { %v3606_v50 = vadd.f32 %v3767_v17, %v3605_v2  ;;  %v3961_v21 = vpop.f32.mrb[34].mxu0 }
 0xb7b   : > { %v3638_v3 = vadd.f32 %v3614_v24, %v5862_v58  ;;  %v3617_v25 = vadd.f32 %v3961_v21, %v3767_v17  ;;  %v3608_v34 = vpop.f32.mrb[35].mxu0 }
 0xb7c   : > { %v3636_v30 = vadd.f32 %v3606_v50, %v5859_v53  ;;  %v3609_v63 = vadd.f32 %v3767_v17, %v3608_v34 }
 0xb7d   : > { %3646 = vst.msk [vmem:[%s494_s21 + $0x10] sm:$0xff] %vm506_vm0, %v3638_v3  ;;  %v3639_v56 = vadd.f32 %v3617_v25, %v5872_v19 }
 0xb7e   : > { %3644 = vst.msk [vmem:[%s494_s21] sm:$0xff] %vm506_vm0, %v3636_v30  ;;  %v3637_v60 = vadd.f32 %v3609_v63, %v5865_v16 }
 0xb7f   : > { %3647 = vst.msk [vmem:[%s494_s21 + $0x18] sm:$0xff] %vm506_vm0, %v3639_v56 }
 0xb80   : > { %3645 = vst.msk [vmem:[%s494_s21 + $0x8] sm:$0xff] %vm506_vm0, %v3637_v60 }
 0xb81   : > { %v3964_v46 = vpop.f32.mrb[36].mxu0 }
 0xb82   : > { %v3630_v45 = vadd.f32 %v3964_v46, %v3767_v17  ;;  %v3621_v58 = vpop.f32.mrb[37].mxu0 }
 0xb83   : > { %v3622_v31 = vadd.f32 %v3767_v17, %v3621_v58  ;;  %v3965_v55 = vpop.f32.mrb[38].mxu0 }
 0xb84   : > { %v3642_v53 = vadd.f32 %v3630_v45, %v5890_v15  ;;  %v3633_v40 = vadd.f32 %v3965_v55, %v3767_v17  ;;  %v3624_v8 = vpop.f32.mrb[39].mxu0 }
 0xb85   : > { %v3640_v9 = vadd.f32 %v3622_v31, %v5877_v0  ;;  %v3625_v19 = vadd.f32 %v3767_v17, %v3624_v8 }
 0xb86   : > { %3650 = vst.msk [vmem:[%s494_s21 + $0x30] sm:$0xff] %vm506_vm0, %v3642_v53  ;;  %v3643_v16 = vadd.f32 %v3633_v40, %v5885_v23 }
 0xb87   : > { %3648 = vst.msk [vmem:[%s494_s21 + $0x20] sm:$0xff] %vm506_vm0, %v3640_v9  ;;  %v3641_v20 = vadd.f32 %v3625_v19, %v5880_v11 }
 0xb88   : > { %3651 = vst.msk [vmem:[%s494_s21 + $0x38] sm:$0xff] %vm506_vm0, %v3643_v16 }
 0xb89   : > { %3649 = vst.msk [vmem:[%s494_s21 + $0x28] sm:$0xff] %vm506_vm0, %v3641_v20 }
 0xb8a PF: > { %s25_s18 = sadd.s32 1, %s4192_s18  }
 0xb8b   : > { %p22_p4 = scmp.ge.s32.totalorder %s25_s18, 4  }
 0xb8d   :  { %24 = sbr.rel (!%p22_p4) target bundleno = 1 (0x1), region = 110 }

</bundles_post_ra>
